<compile_context>
chip_gen: v7x
topology: tpu7x:2x2x1
jax: 0.10.0
libtpu: 0.0.40
codegen_flags: <defaults>
</compile_context>

<pallas_src>
import math

import jax
import jax.numpy as jnp
from jax import lax
from jax.experimental import pallas as pl
from jax.experimental.pallas import tpu as pltpu


# --------------------------------------------------------------------------- #
# Stage 1: fused qkv projection (computed once per token, not once per q-tile) #
# --------------------------------------------------------------------------- #
def _qkv_proj_kernel(x_ref, wqkv_ref, bqkv_ref, q_ref, k_ref, v_ref):
    # x tile is (ts, C) in the caller's dtype; feed the MXU in the compute dtype
    # (bf16 by default), accumulate in f32, store q/k/v in the compute dtype.
    x = x_ref[...].astype(wqkv_ref.dtype)
    q_ref[...] = (jnp.dot(x, wqkv_ref[0], preferred_element_type=jnp.float32)
                  + bqkv_ref[0]).astype(q_ref.dtype)   # q is pre-scaled by 1/sqrt(C)
    k_ref[...] = (jnp.dot(x, wqkv_ref[1], preferred_element_type=jnp.float32)
                  + bqkv_ref[1]).astype(k_ref.dtype)
    v_ref[...] = (jnp.dot(x, wqkv_ref[2], preferred_element_type=jnp.float32)
                  + bqkv_ref[2]).astype(v_ref.dtype)


# --------------------------------------------------------------------------- #
# Stage 2: flash attention + out_proj + residual                               #
# --------------------------------------------------------------------------- #
def _flash_attn_kernel(res_ref, q_ref, k_ref, v_ref, wo_ref, bo_ref, o_ref,
                       m_scr, l_scr, acc_scr):
    kv = pl.program_id(2)

    # ---- per-q-tile init (first kv step): reset online-softmax state.
    @pl.when(kv == 0)
    def _init():
        m_scr[...] = jnp.full(m_scr.shape, -jnp.inf, dtype=jnp.float32)
        l_scr[...] = jnp.zeros(l_scr.shape, dtype=jnp.float32)
        acc_scr[...] = jnp.zeros(acc_scr.shape, dtype=jnp.float32)

    # ---- scores = q @ k^T in NT form (contract last dims -> no k relayout).
    # q/k are already in the MXU compute dtype (bf16 default); accumulate f32.
    s = lax.dot_general(q_ref[...], k_ref[...],
                        dimension_numbers=(((1,), (1,)), ((), ())),
                        preferred_element_type=jnp.float32)

    # ---- online-softmax update; bookkeeping stays f32 (no bf16 VPU/EUP on v5e).
    m_prev = m_scr[...]
    m_new = jnp.maximum(m_prev, jnp.max(s, axis=-1, keepdims=True))
    alpha = jnp.exp(m_prev - m_new)            # exp(-inf) == 0 on the first step
    p = jnp.exp(s - m_new)
    l_scr[...] = alpha * l_scr[...] + jnp.sum(p, axis=-1, keepdims=True)
    acc_scr[...] = alpha * acc_scr[...] + jnp.dot(
        p.astype(v_ref.dtype), v_ref[...], preferred_element_type=jnp.float32)
    m_scr[...] = m_new

    # ---- finalize: normalize, out_proj (bf16 operands, f32 acc), residual add.
    @pl.when(kv == pl.num_programs(2) - 1)
    def _final():
        attn = acc_scr[...] * pl.reciprocal(l_scr[...], approx=True)
        y = jnp.dot(attn.astype(wo_ref.dtype), wo_ref[...],
                    preferred_element_type=jnp.float32) + bo_ref[...]
        o_ref[...] = (y + res_ref[...].astype(jnp.float32)).astype(o_ref.dtype)


# --------------------------------------------------------------------------- #
# Tiling / VMEM helpers                                                        #
# --------------------------------------------------------------------------- #
def _pick_tile(s, target):
    """Largest divisor of s <= target, preferring MXU-friendly multiples of 256,
    then 128, then the bf16 sublane quantum 16; falls back to s itself."""
    if s <= target:
        return s
    for quantum in (256, 128, 16, 8):
        t = (target // quantum) * quantum
        while t >= quantum:
            if s % t == 0:
                return t
            t -= quantum
    return s


def _vmem_limit_bytes(tile_bytes):
    """Scoped-VMEM limit derived from the tile footprint (+50% headroom),
    clamped to [32 MiB, 64 MiB]: safe on v7x (64 MiB physical VMEM) as well as
    v5e/v6e (128 MiB), and always above the 16/32 MiB scoped defaults."""
    return int(min(64 << 20, max(32 << 20, 1.5 * tile_bytes + (4 << 20))))


# --------------------------------------------------------------------------- #
# Wrappers                                                                     #
# --------------------------------------------------------------------------- #
def vae_attention_block_nsc(x_nsc, w_in, b_in, w_out, b_out, *,
                            tq=None, tkv=None, ts=None,
                            compute_dtype=jnp.bfloat16):
    """Fused VAE attention block on token-major activations.

    x_nsc: (N, S, C).  Weights follow torch.nn.Linear convention:
      w_in: (3C, C), b_in: (3C,), w_out: (C, C), b_out: (C,).
    Returns (N, S, C) = out_proj(softmax(q k^T / sqrt(C)) v) + x.
    compute_dtype is the MXU operand dtype (bf16 default); accumulation is f32.
    """
    N, S, C = x_nsc.shape
    tq = _pick_tile(S, 512) if tq is None else tq     # >=256 fills the 256x256 MXU
    tkv = _pick_tile(S, 2048) if tkv is None else tkv  # v6e/v5e callers may pass tkv=S
    ts = _pick_tile(S, 1024) if ts is None else ts
    assert S % tq == 0 and S % tkv == 0 and S % ts == 0, "tile sizes must divide S"

    # Keep both v7x TensorCores busy on the parallel axes even when N == 1.
    if N * (S // tq) < 2 and tq % 2 == 0 and tq // 2 >= 128 and S % (tq // 2) == 0:
        tq //= 2

    f32 = jnp.float32
    inv = 1.0 / math.sqrt(C)                  # single head -> d_head == C
    w_in = w_in.astype(f32)
    b_in = b_in.astype(f32)
    # Split the fused in_proj, pre-transpose to (in, out), fold 1/sqrt(C) into q
    # -- all in f32 -- THEN cast the weights to the MXU compute dtype.
    wq_t = w_in[0 * C:1 * C].T * inv
    wk_t = w_in[1 * C:2 * C].T
    wv_t = w_in[2 * C:3 * C].T
    wqkv = jnp.stack([wq_t, wk_t, wv_t]).astype(compute_dtype)       # (3, C, C)
    bqkv = jnp.stack([b_in[0 * C:1 * C] * inv,
                      b_in[1 * C:2 * C],
                      b_in[2 * C:3 * C]]).reshape(3, 1, C).astype(f32)  # bias stays f32
    wo_t = w_out.astype(f32).T.astype(compute_dtype)                  # (C, C)
    bo = b_out.astype(f32).reshape(1, C)

    cdt_b = jnp.dtype(compute_dtype).itemsize
    x_b = jnp.dtype(x_nsc.dtype).itemsize

    # ---------------- stage 1: qkv projection (once per token) ----------------
    proj_est = 2 * (ts * C * x_b            # x tile (double-buffered)
                    + 3 * C * C * cdt_b     # stacked weights
                    + 3 * C * 4             # stacked biases (f32)
                    + 3 * ts * C * cdt_b)   # q/k/v output tiles
    qkv_io_spec = pl.BlockSpec((None, ts, C), lambda n, si: (n, si, 0))
    q, k, v = pl.pallas_call(
        _qkv_proj_kernel,
        out_shape=[jax.ShapeDtypeStruct((N, S, C), compute_dtype)] * 3,
        grid_spec=pltpu.PrefetchScalarGridSpec(
            num_scalar_prefetch=0,
            grid=(N, S // ts),
            in_specs=[
                qkv_io_spec,                                          # x
                pl.BlockSpec((3, C, C), lambda n, si: (0, 0, 0)),     # wq/wk/wv (resident)
                pl.BlockSpec((3, 1, C), lambda n, si: (0, 0, 0)),     # bq/bk/bv (resident)
            ],
            out_specs=[qkv_io_spec] * 3,
        ),
        compiler_params=pltpu.CompilerParams(
            dimension_semantics=("parallel", "parallel"),
            vmem_limit_bytes=_vmem_limit_bytes(proj_est)),
    )(x_nsc, wqkv, bqkv)

    # ------------- stage 2: flash attention + out_proj + residual -------------
    attn_est = (2 * (tq * C * x_b           # residual tile
                     + tq * C * cdt_b       # q tile
                     + 2 * tkv * C * cdt_b  # k, v tiles
                     + C * C * cdt_b        # w_out^T
                     + C * 4                # b_out
                     + tq * C * x_b)        # output tile
                + 2 * tq * 4 + tq * C * 4)  # m/l/acc scratch (f32, single-buffered)

    const = lambda n, qi, ki: (0, 0)
    out = pl.pallas_call(
        _flash_attn_kernel,
        out_shape=jax.ShapeDtypeStruct((N, S, C), x_nsc.dtype),
        grid_spec=pltpu.PrefetchScalarGridSpec(
            num_scalar_prefetch=0,
            grid=(N, S // tq, S // tkv),
            in_specs=[
                pl.BlockSpec((None, tq, C), lambda n, qi, ki: (n, qi, 0)),   # residual x
                pl.BlockSpec((None, tq, C), lambda n, qi, ki: (n, qi, 0)),   # q (pre-scaled)
                pl.BlockSpec((None, tkv, C), lambda n, qi, ki: (n, ki, 0)),  # k
                pl.BlockSpec((None, tkv, C), lambda n, qi, ki: (n, ki, 0)),  # v
                # TODO(synk): on v7x give these constant-index specs
                # pipeline_mode=pl.Buffered(1) (or copy once into persistent VMEM
                # scratch) to reclaim the double-buffer reservation.
                pl.BlockSpec((C, C), const),                                 # w_out^T
                pl.BlockSpec((1, C), const),                                 # b_out
            ],
            out_specs=pl.BlockSpec((None, tq, C), lambda n, qi, ki: (n, qi, 0)),
            scratch_shapes=[
                pltpu.VMEM((tq, 1), jnp.float32),   # m: running row max
                pltpu.VMEM((tq, 1), jnp.float32),   # l: running softmax denominator
                pltpu.VMEM((tq, C), jnp.float32),   # acc: running p @ v
            ],
        ),
        compiler_params=pltpu.CompilerParams(
            dimension_semantics=("parallel", "parallel", "arbitrary"),
            vmem_limit_bytes=_vmem_limit_bytes(attn_est)),
    )(x_nsc, q, k, v, wo_t, bo)
    return out


def vae_attention_block(x_nchw, w_in, b_in, w_out, b_out, *, tq=None, tkv=None,
                        ts=None, compute_dtype=jnp.bfloat16):
    """NCHW entry point matching the PyTorch module's forward() contract.

    NOTE: the NCHW <-> (N, S, C) transposes below are extra HBM passes over the
    activation; callers that keep VAE activations token-major should call
    vae_attention_block_nsc directly.
    """
    # TODO(synk): fold the layout change into the kernels' BlockSpecs over the
    # (N, C, S) view (feature-major q/k/v) to drop these transposes entirely.
    N, C, H, W = x_nchw.shape
    S = H * W
    x_nsc = jnp.transpose(x_nchw.reshape(N, C, S), (0, 2, 1))
    out_nsc = vae_attention_block_nsc(x_nsc, w_in, b_in, w_out, b_out,
                                      tq=tq, tkv=tkv, ts=ts,
                                      compute_dtype=compute_dtype)
    return jnp.transpose(out_nsc, (0, 2, 1)).reshape(N, C, H, W)


# --------------------------------------------------------------------------- #
# Deterministic init + plain-JAX reference (for the self-test)                 #
# --------------------------------------------------------------------------- #
def _init_params(key, in_channels):
    """Deterministic init mimicking nn.Linear default (uniform +-1/sqrt(fan_in))."""
    C = in_channels
    k1, k2, k3, k4 = jax.random.split(key, 4)
    bound = 1.0 / math.sqrt(C)
    w_in = jax.random.uniform(k1, (3 * C, C), jnp.float32, -bound, bound)
    b_in = jax.random.uniform(k2, (3 * C,), jnp.float32, -bound, bound)
    w_out = jax.random.uniform(k3, (C, C), jnp.float32, -bound, bound)
    b_out = jax.random.uniform(k4, (C,), jnp.float32, -bound, bound)
    return w_in, b_in, w_out, b_out


def _reference(x_nchw, w_in, b_in, w_out, b_out):
    """Plain-JAX f32 reference of the PyTorch forward."""
    N, C, H, W = x_nchw.shape
    S = H * W
    x = jnp.transpose(x_nchw.reshape(N, C, S), (0, 2, 1))          # (N, S, C)
    qkv = x @ w_in.T + b_in                                         # (N, S, 3C)
    q, k, v = jnp.split(qkv, 3, axis=-1)
    scores = jnp.einsum("nsc,ntc->nst", q, k) / math.sqrt(C)
    probs = jax.nn.softmax(scores, axis=-1)
    out = jnp.einsum("nst,ntc->nsc", probs, v)
    y = out @ w_out.T + b_out
    y = jnp.transpose(y, (0, 2, 1)).reshape(N, C, H, W)
    return y + x_nchw


if __name__ == "__main__":
    # Small shapes consistent with the module: N=2, C=32, 32x32 spatial -> S=1024.
    # Explicit tq = tkv = 256 gives a (2, 4, 4) attention grid so the multi-q-tile
    # and multi-kv-tile (online softmax) paths are both exercised, with tiles that
    # are MXU-friendly (256-aligned).
    N, C, H, W = 2, 32, 32, 32
    key = jax.random.PRNGKey(0)
    kx, kp = jax.random.split(key)
    x = jax.random.normal(kx, (N, C, H, W), jnp.float32)
    w_in, b_in, w_out, b_out = _init_params(kp, C)

    ref = _reference(x, w_in, b_in, w_out, b_out)

    # f32 compute path: tight numerical check of the kernel structure.
    out_f32 = vae_attention_block(x, w_in, b_in, w_out, b_out,
                                  tq=256, tkv=256, compute_dtype=jnp.float32)
    out_f32 = jax.block_until_ready(out_f32)
    assert out_f32.shape == (N, C, H, W)
    assert jnp.allclose(out_f32, ref, atol=5e-3, rtol=5e-3), "f32 path mismatch"

    # bf16 MXU-operand path (the performance configuration); looser tolerance for
    # the bf16 operand rounding (accumulation is still f32).
    out_bf16 = vae_attention_block(x, w_in, b_in, w_out, b_out,
                                   tq=256, tkv=256, compute_dtype=jnp.bfloat16)
    out_bf16 = jax.block_until_ready(out_bf16)
    assert out_bf16.shape == (N, C, H, W)
    assert jnp.allclose(out_bf16, ref, atol=3e-2, rtol=3e-2), "bf16 path mismatch"

    print("KERNEL_OK")
</pallas_src>

<mosaic_0001>
module attributes {stable_mosaic.version = 11 : i64} {
  func.func @_qkv_proj_kernel(%arg0: i32, %arg1: i32, %arg2: memref<1x1024x32xf32, #tpu.memory_space<vmem>>, %arg3: memref<3x32x32xf32, #tpu.memory_space<vmem>>, %arg4: memref<3x1x32xf32, #tpu.memory_space<vmem>>, %arg5: memref<1x1024x32xf32, #tpu.memory_space<vmem>>, %arg6: memref<1x1024x32xf32, #tpu.memory_space<vmem>>, %arg7: memref<1x1024x32xf32, #tpu.memory_space<vmem>>) attributes {dimension_semantics = [#tpu.dimension_semantics<parallel>, #tpu.dimension_semantics<parallel>], iteration_bounds = array<i64: 2, 1>, scalar_prefetch = 0 : i64, scratch_operands = 0 : i64, tpu.core_type = #tpu.core_type<tc>, window_params = [{transform_indices = @transform_0, window_bounds = array<i64: 1, 1024, 32>}, {pipeline_mode = #tpu.pipeline_mode<synchronous>, transform_indices = @transform_1, window_bounds = array<i64: 3, 32, 32>}, {pipeline_mode = #tpu.pipeline_mode<synchronous>, transform_indices = @transform_2, window_bounds = array<i64: 3, 1, 32>}, {transform_indices = @transform_3, window_bounds = array<i64: 1, 1024, 32>}, {transform_indices = @transform_4, window_bounds = array<i64: 1, 1024, 32>}, {transform_indices = @transform_5, window_bounds = array<i64: 1, 1024, 32>}]} {
    %c0 = arith.constant 0 : index
    %c0_0 = arith.constant 0 : index
    %c0_1 = arith.constant 0 : index
    %0 = vector.load %arg2[%c0, %c0_0, %c0_1] : memref<1x1024x32xf32, #tpu.memory_space<vmem>>, vector<1x1024x32xf32>
    %1 = vector.shape_cast %0 : vector<1x1024x32xf32> to vector<1024x32xf32>
    %c0_2 = arith.constant 0 : index
    %c0_3 = arith.constant 0 : index
    %c0_4 = arith.constant 0 : index
    %2 = vector.load %arg3[%c0_2, %c0_3, %c0_4] : memref<3x32x32xf32, #tpu.memory_space<vmem>>, vector<1x32x32xf32>
    %3 = vector.shape_cast %2 : vector<1x32x32xf32> to vector<32x32xf32>
    %cst = arith.constant dense<0.000000e+00> : vector<1024x32xf32>
    %4 = tpu.matmul %1, %3, %cst {dimension_numbers = #tpu.dot_dimension_numbers<[1], [0], [0], [1], [0, 0, 1, 1], [], []>} : vector<1024x32xf32>, vector<32x32xf32>, vector<1024x32xf32> -> vector<1024x32xf32>
    %c0_5 = arith.constant 0 : index
    %c0_6 = arith.constant 0 : index
    %c0_7 = arith.constant 0 : index
    %5 = vector.load %arg4[%c0_5, %c0_6, %c0_7] : memref<3x1x32xf32, #tpu.memory_space<vmem>>, vector<1x1x32xf32>
    %6 = vector.shape_cast %5 : vector<1x1x32xf32> to vector<1x32xf32>
    %7 = vector.broadcast %6 : vector<1x32xf32> to vector<1024x32xf32>
    %8 = arith.addf %4, %7 : vector<1024x32xf32>
    %c0_8 = arith.constant 0 : index
    %c0_9 = arith.constant 0 : index
    %c0_10 = arith.constant 0 : index
    %9 = vector.load %arg5[%c0_8, %c0_9, %c0_10] : memref<1x1024x32xf32, #tpu.memory_space<vmem>>, vector<1x1024x32xf32>
    %10 = vector.shape_cast %9 : vector<1x1024x32xf32> to vector<1024x32xf32>
    %11 = vector.shape_cast %8 : vector<1024x32xf32> to vector<1x1024x32xf32>
    tpu.vector_store %arg5[%c0_8, %c0_9, %c0_10], %11 {strides = array<i32>} : memref<1x1024x32xf32, #tpu.memory_space<vmem>>, vector<1x1024x32xf32>,
    %c1 = arith.constant 1 : index
    %c0_11 = arith.constant 0 : index
    %c0_12 = arith.constant 0 : index
    %12 = vector.load %arg3[%c1, %c0_11, %c0_12] : memref<3x32x32xf32, #tpu.memory_space<vmem>>, vector<1x32x32xf32>
    %13 = vector.shape_cast %12 : vector<1x32x32xf32> to vector<32x32xf32>
    %cst_13 = arith.constant dense<0.000000e+00> : vector<1024x32xf32>
    %14 = tpu.matmul %1, %13, %cst_13 {dimension_numbers = #tpu.dot_dimension_numbers<[1], [0], [0], [1], [0, 0, 1, 1], [], []>} : vector<1024x32xf32>, vector<32x32xf32>, vector<1024x32xf32> -> vector<1024x32xf32>
    %c1_14 = arith.constant 1 : index
    %c0_15 = arith.constant 0 : index
    %c0_16 = arith.constant 0 : index
    %15 = vector.load %arg4[%c1_14, %c0_15, %c0_16] : memref<3x1x32xf32, #tpu.memory_space<vmem>>, vector<1x1x32xf32>
    %16 = vector.shape_cast %15 : vector<1x1x32xf32> to vector<1x32xf32>
    %17 = vector.broadcast %16 : vector<1x32xf32> to vector<1024x32xf32>
    %18 = arith.addf %14, %17 : vector<1024x32xf32>
    %c0_17 = arith.constant 0 : index
    %c0_18 = arith.constant 0 : index
    %c0_19 = arith.constant 0 : index
    %19 = vector.load %arg6[%c0_17, %c0_18, %c0_19] : memref<1x1024x32xf32, #tpu.memory_space<vmem>>, vector<1x1024x32xf32>
    %20 = vector.shape_cast %19 : vector<1x1024x32xf32> to vector<1024x32xf32>
    %21 = vector.shape_cast %18 : vector<1024x32xf32> to vector<1x1024x32xf32>
    tpu.vector_store %arg6[%c0_17, %c0_18, %c0_19], %21 {strides = array<i32>} : memref<1x1024x32xf32, #tpu.memory_space<vmem>>, vector<1x1024x32xf32>,
    %c2 = arith.constant 2 : index
    %c0_20 = arith.constant 0 : index
    %c0_21 = arith.constant 0 : index
    %22 = vector.load %arg3[%c2, %c0_20, %c0_21] : memref<3x32x32xf32, #tpu.memory_space<vmem>>, vector<1x32x32xf32>
    %23 = vector.shape_cast %22 : vector<1x32x32xf32> to vector<32x32xf32>
    %cst_22 = arith.constant dense<0.000000e+00> : vector<1024x32xf32>
    %24 = tpu.matmul %1, %23, %cst_22 {dimension_numbers = #tpu.dot_dimension_numbers<[1], [0], [0], [1], [0, 0, 1, 1], [], []>} : vector<1024x32xf32>, vector<32x32xf32>, vector<1024x32xf32> -> vector<1024x32xf32>
    %c2_23 = arith.constant 2 : index
    %c0_24 = arith.constant 0 : index
    %c0_25 = arith.constant 0 : index
    %25 = vector.load %arg4[%c2_23, %c0_24, %c0_25] : memref<3x1x32xf32, #tpu.memory_space<vmem>>, vector<1x1x32xf32>
    %26 = vector.shape_cast %25 : vector<1x1x32xf32> to vector<1x32xf32>
    %27 = vector.broadcast %26 : vector<1x32xf32> to vector<1024x32xf32>
    %28 = arith.addf %24, %27 : vector<1024x32xf32>
    %c0_26 = arith.constant 0 : index
    %c0_27 = arith.constant 0 : index
    %c0_28 = arith.constant 0 : index
    %29 = vector.load %arg7[%c0_26, %c0_27, %c0_28] : memref<1x1024x32xf32, #tpu.memory_space<vmem>>, vector<1x1024x32xf32>
    %30 = vector.shape_cast %29 : vector<1x1024x32xf32> to vector<1024x32xf32>
    %31 = vector.shape_cast %28 : vector<1024x32xf32> to vector<1x1024x32xf32>
    tpu.vector_store %arg7[%c0_26, %c0_27, %c0_28], %31 {strides = array<i32>} : memref<1x1024x32xf32, #tpu.memory_space<vmem>>, vector<1x1024x32xf32>,
    return
  }
  func.func @transform_0(%arg0: i32, %arg1: i32) -> (i32, i32, i32) {
    %c0_i32 = arith.constant 0 : i32
    %c0_i32_0 = arith.constant 0 : i32
    return %arg0, %arg1, %c0_i32 : i32, i32, i32
  }
  func.func @transform_1(%arg0: i32, %arg1: i32) -> (i32, i32, i32) {
    %c0_i32 = arith.constant 0 : i32
    %c0_i32_0 = arith.constant 0 : i32
    %c0_i32_1 = arith.constant 0 : i32
    %c0_i32_2 = arith.constant 0 : i32
    return %c0_i32, %c0_i32_0, %c0_i32_1 : i32, i32, i32
  }
  func.func @transform_2(%arg0: i32, %arg1: i32) -> (i32, i32, i32) {
    %c0_i32 = arith.constant 0 : i32
    %c0_i32_0 = arith.constant 0 : i32
    %c0_i32_1 = arith.constant 0 : i32
    %c0_i32_2 = arith.constant 0 : i32
    return %c0_i32, %c0_i32_0, %c0_i32_1 : i32, i32, i32
  }
  func.func @transform_3(%arg0: i32, %arg1: i32) -> (i32, i32, i32) {
    %c0_i32 = arith.constant 0 : i32
    %c0_i32_0 = arith.constant 0 : i32
    return %arg0, %arg1, %c0_i32 : i32, i32, i32
  }
  func.func @transform_4(%arg0: i32, %arg1: i32) -> (i32, i32, i32) {
    %c0_i32 = arith.constant 0 : i32
    %c0_i32_0 = arith.constant 0 : i32
    return %arg0, %arg1, %c0_i32 : i32, i32, i32
  }
  func.func @transform_5(%arg0: i32, %arg1: i32) -> (i32, i32, i32) {
    %c0_i32 = arith.constant 0 : i32
    %c0_i32_0 = arith.constant 0 : i32
    return %arg0, %arg1, %c0_i32 : i32, i32, i32
  }
}

</mosaic_0001>

<bundles_post_ra>
// kernel: tpu_custom_call.1
= control target key start
LH: loop header
LB: loop body
LE: loop exit
PB: predicated region body
PF: predicated region fallthrough
CT: control target
= control target key end

     0   :  { %s5131_s18 = smov 0   ;;  %s5133_s19 = smov 0   ;;  %s7293_s0 = inlined_call_operand.vmem [shape: f32[2,1024,32], index: 0, kind: input, shape index: {}]   ;;  %s7294_s1 = inlined_call_operand.vmem [shape: f32[3,32,32], index: 1, kind: input, shape index: {}]   ;;  %s7295_s2 = inlined_call_operand.vmem [shape: f32[3,1,32], index: 2, kind: input, shape index: {}]   ;;  %s7296_s3 = inlined_call_operand.vmem [shape: f32[2,1024,32], index: 3, kind: output, shape index: {0}]   ;;  %s7297_s4 = inlined_call_operand.vmem [shape: f32[2,1024,32], index: 4, kind: output, shape index: {1}]   ;;  %s7298_s5 = inlined_call_operand.vmem [shape: f32[2,1024,32], index: 5, kind: output, shape index: {2}]  }
   0x1   :  { %s5135_s20 = smov 0  }
   0x2 LB: > { %s28_s21 = sadd.s32 1, %s5095_s19  ;;  %p3551_p0 = scmp.ge.s32.totalorder %s5099_s20, 1  ;;  %s5099_s20 = sphi %s5135_s20, %s16_s20   ;;  %s5095_s19 = sphi %s5133_s19, %s7316_s19   ;;  %s5091_s18 = sphi %s5131_s18, %s7315_s18  }
   0x3   : > { %p30_p1 = scmp.ge.s32.totalorder %s28_s21, 2  ;;  %p217_p2 = scmp.lt.s32.totalorder %s5099_s20, 3 }
   0x5   : > { %s7318_s21 = smov (%p30_p1, %s28_s21), 0  ;;  %p218_p3 = pnand %p3551_p0, %p217_p2 }
   0x7   : > { %221 = sbr.rel (%p218_p3) target bundleno = 621 (0x26d), region = 32 }
   0xe   : > { %v439_v0 = vld [vmem:[%s7294_s1] sm:$0xff]  ;;  %v440_v1 = vld [vmem:[%s7294_s1 + $0x8] sm:$0xff]  ;;  %v441_v2 = vld [vmem:[%s7294_s1 + $0x10] sm:$0xff]  ;;  %p272_p4 = scmp.lt.s32.totalorder %s5091_s18, 1  ;;  %vm450_vm0 = vcmask 261120  }
   0xf   : > { %v4959_v3 = vpack.c.bf16 %v440_v1, %v439_v0  ;;  %v442_v4 = vld [vmem:[%s7294_s1 + $0x18] sm:$0xff]  ;;  %v3689_v5 = vld [vmem:[%s7294_s1 + $0x20] sm:$0xff]  ;;  %v3690_v7 = vld [vmem:[%s7294_s1 + $0x28] sm:$0xff] }
  0x10   : > { %v4963_v6 = vpack.c.bf16 %v442_v4, %v441_v2  ;;  %s7320_s18 = smov (!%p272_p4, %s5091_s18), 1  ;;  %v3823_v8 = vld [vmem:[%s7294_s1 + $0x40] sm:$0xff]  ;;  %v3824_v9 = vld [vmem:[%s7294_s1 + $0x48] sm:$0xff]  ;;  %v4967_v10 = vpack.c.bf16 %v3690_v7, %v3689_v5  ;;  %v3691_v14 = vld [vmem:[%s7294_s1 + $0x30] sm:$0xff] }
  0x11   : > { %4960 = vmatprep.subr.bf16.mxu0 %v4959_v3  ;;  %4983 = vmatprep.subr.bf16.mxu1 %v4959_v3  ;;  %s5173_s13 = sshll.u32 %s7320_s18, 10  ;;  %v4975_v11 = vpack.c.bf16 %v3824_v9, %v3823_v8  ;;  %v3692_v15 = vld [vmem:[%s7294_s1 + $0x38] sm:$0xff]  ;;  %v3825_v16 = vld [vmem:[%s7294_s1 + $0x50] sm:$0xff] }
  0x12   : > { %4962 = vmatpush3.bf16.msra.mxu0 %v4959_v3  ;;  %4985 = vmatpush3.bf16.msra.mxu1 %v4959_v3  ;;  %s5179_s16 = scalar_lea.vmem %s7293_s0, %s5173_s13  ;;  %v3826_v17 = vld [vmem:[%s7294_s1 + $0x58] sm:$0xff]  ;;  %v4971_v22 = vpack.c.bf16 %v3692_v15, %v3691_v14  ;;  %s5822_s7 = scalar_lea.vmem %s7296_s3, %s5173_s13 }
  0x13   : > { %4964 = vmatprep.subr.bf16.mxu0 %v4963_v6  ;;  %4984 = vmatprep.subr.bf16.mxu1 %v4963_v6  ;;  %v5182_v12 = vld [vmem:[%s5179_s16] sm:$0xff]  ;;  %v5201_v18 = vld [vmem:[%s5179_s16 + $0x8] sm:$0xff]  ;;  %v5205_v20 = vld [vmem:[%s5179_s16 + $0x10] sm:$0xff]  ;;  %v4979_v23 = vpack.c.bf16 %v3826_v17, %v3825_v16  ;;  %s6435_s15 = scalar_lea.vmem %s7297_s4, %s5173_s13  ;;  %s6441_s22 = scalar_lea.vmem %s7298_s5, %s5173_s13 }
  0x14   : > { %v375_v13 = vld [vmem:[%s5179_s16 + $0x200] sm:$0xff]  ;;  %4367 = vmatprep.mubr.msk.f32.mxu0 %vm450_vm0, %v5182_v12  ;;  %v376_v19 = vld [vmem:[%s5179_s16 + $0x208] sm:$0xff]  ;;  %v377_v21 = vld [vmem:[%s5179_s16 + $0x210] sm:$0xff] }
  0x15   : > { %4463 = vmatprep.mubr.msk.f32.mxu1 %vm450_vm0, %v375_v13  ;;  %v5212_v24 = vld [vmem:[%s5179_s16 + $0x18] sm:$0xff]  ;;  %v5219_v26 = vld [vmem:[%s5179_s16 + $0x20] sm:$0xff]  ;;  %v5229_v28 = vld [vmem:[%s5179_s16 + $0x28] sm:$0xff] }
  0x16   : > { %4966 = vmatpush3.bf16.msra.mxu0 %v4963_v6  ;;  %4986 = vmatpush3.bf16.msra.mxu1 %v4963_v6  ;;  %v378_v25 = vld [vmem:[%s5179_s16 + $0x218] sm:$0xff]  ;;  %v379_v27 = vld [vmem:[%s5179_s16 + $0x220] sm:$0xff]  ;;  %v380_v29 = vld [vmem:[%s5179_s16 + $0x228] sm:$0xff] }
  0x17   : > { %4968 = vmatprep.subr.bf16.mxu1 %v4967_v10  ;;  %4976 = vmatprep.subr.bf16.mxu0 %v4975_v11  ;;  %v5233_v30 = vld [vmem:[%s5179_s16 + $0x30] sm:$0xff]  ;;  %v5243_v32 = vld [vmem:[%s5179_s16 + $0x38] sm:$0xff]  ;;  %v5247_v34 = vld [vmem:[%s5179_s16 + $0x40] sm:$0xff] }
  0x18   : > { %v381_v31 = vld [vmem:[%s5179_s16 + $0x230] sm:$0xff]  ;;  %v382_v33 = vld [vmem:[%s5179_s16 + $0x238] sm:$0xff]  ;;  %v383_v35 = vld [vmem:[%s5179_s16 + $0x240] sm:$0xff] }
  0x19   : > { %4368 = vmatmul.mubr.msk.f32.vlgmr.msra.gmra.mrb[0].mxu0 %vm450_vm0, %v5201_v18  ;;  %4464 = vmatmul.mubr.msk.f32.vlgmr.msra.gmra.mrb[0].mxu1 %vm450_vm0, %v376_v19  ;;  %v5257_v36 = vld [vmem:[%s5179_s16 + $0x48] sm:$0xff]  ;;  %v5261_v38 = vld [vmem:[%s5179_s16 + $0x50] sm:$0xff]  ;;  %v5271_v40 = vld [vmem:[%s5179_s16 + $0x58] sm:$0xff] }
  0x1a   : > { %4970 = vmatpush3.bf16.msra.mxu1 %v4967_v10  ;;  %4978 = vmatpush3.bf16.msra.mxu0 %v4975_v11  ;;  %v384_v37 = vld [vmem:[%s5179_s16 + $0x248] sm:$0xff]  ;;  %v385_v39 = vld [vmem:[%s5179_s16 + $0x250] sm:$0xff]  ;;  %v386_v41 = vld [vmem:[%s5179_s16 + $0x258] sm:$0xff] }
  0x1b   : > { %4370 = vmatprep.mubr.msk.f32.mxu0 %vm450_vm0, %v5205_v20  ;;  %4466 = vmatprep.mubr.msk.f32.mxu1 %vm450_vm0, %v377_v21  ;;  %v5275_v42 = vld [vmem:[%s5179_s16 + $0x60] sm:$0xff]  ;;  %v5285_v44 = vld [vmem:[%s5179_s16 + $0x68] sm:$0xff]  ;;  %v5289_v46 = vld [vmem:[%s5179_s16 + $0x70] sm:$0xff] }
  0x1c   : > { %4972 = vmatprep.subr.bf16.mxu1 %v4971_v22  ;;  %4980 = vmatprep.subr.bf16.mxu0 %v4979_v23  ;;  %v387_v43 = vld [vmem:[%s5179_s16 + $0x260] sm:$0xff]  ;;  %v388_v45 = vld [vmem:[%s5179_s16 + $0x268] sm:$0xff]  ;;  %v389_v47 = vld [vmem:[%s5179_s16 + $0x270] sm:$0xff] }
  0x1d   : > { %4371 = vmatmul.mubr.msk.f32.gmra.mrb[2].mxu0 %vm450_vm0, %v5212_v24  ;;  %4467 = vmatmul.mubr.msk.f32.gmra.mrb[2].mxu1 %vm450_vm0, %v378_v25  ;;  %v5299_v48 = vld [vmem:[%s5179_s16 + $0x78] sm:$0xff]  ;;  %v5303_v50 = vld [vmem:[%s5179_s16 + $0x80] sm:$0xff]  ;;  %v5313_v52 = vld [vmem:[%s5179_s16 + $0x88] sm:$0xff] }
  0x1e   : > { %4373 = vmatprep.mubr.msk.f32.mxu0 %vm450_vm0, %v5219_v26  ;;  %4469 = vmatprep.mubr.msk.f32.mxu1 %vm450_vm0, %v379_v27  ;;  %v390_v49 = vld [vmem:[%s5179_s16 + $0x278] sm:$0xff]  ;;  %v391_v51 = vld [vmem:[%s5179_s16 + $0x280] sm:$0xff]  ;;  %v392_v53 = vld [vmem:[%s5179_s16 + $0x288] sm:$0xff] }
  0x1f   : > { %4974 = vmatpush3.bf16.msra.mxu1 %v4971_v22  ;;  %4982 = vmatpush3.bf16.msra.mxu0 %v4979_v23  ;;  %v5317_v54 = vld [vmem:[%s5179_s16 + $0x90] sm:$0xff]  ;;  %v5327_v56 = vld [vmem:[%s5179_s16 + $0x98] sm:$0xff]  ;;  %v5331_v58 = vld [vmem:[%s5179_s16 + $0xa0] sm:$0xff] }
  0x20   : > { %v393_v55 = vld [vmem:[%s5179_s16 + $0x290] sm:$0xff]  ;;  %v394_v57 = vld [vmem:[%s5179_s16 + $0x298] sm:$0xff]  ;;  %v395_v59 = vld [vmem:[%s5179_s16 + $0x2a0] sm:$0xff] }
  0x21   : > { %4374 = vmatmul.mubr.msk.f32.gmra.mrb[4].mxu0 %vm450_vm0, %v5229_v28  ;;  %4470 = vmatmul.mubr.msk.f32.gmra.mrb[4].mxu1 %vm450_vm0, %v380_v29  ;;  %v5341_v60 = vld [vmem:[%s5179_s16 + $0xa8] sm:$0xff]  ;;  %v5345_v62 = vld [vmem:[%s5179_s16 + $0xb0] sm:$0xff]  ;;  %v5355_v0 = vld [vmem:[%s5179_s16 + $0xb8] sm:$0xff] }
  0x22   : > { %4376 = vmatprep.mubr.msk.f32.mxu0 %vm450_vm0, %v5233_v30  ;;  %4472 = vmatprep.mubr.msk.f32.mxu1 %vm450_vm0, %v381_v31  ;;  %v396_v61 = vld [vmem:[%s5179_s16 + $0x2a8] sm:$0xff]  ;;  %v397_v63 = vld [vmem:[%s5179_s16 + $0x2b0] sm:$0xff]  ;;  %v398_v1 = vld [vmem:[%s5179_s16 + $0x2b8] sm:$0xff] }
  0x23   : > { %v5359_v2 = vld [vmem:[%s5179_s16 + $0xc0] sm:$0xff]  ;;  %v5369_v4 = vld [vmem:[%s5179_s16 + $0xc8] sm:$0xff]  ;;  %v5373_v6 = vld [vmem:[%s5179_s16 + $0xd0] sm:$0xff] }
  0x24   : > { %v399_v3 = vld [vmem:[%s5179_s16 + $0x2c0] sm:$0xff]  ;;  %v400_v5 = vld [vmem:[%s5179_s16 + $0x2c8] sm:$0xff]  ;;  %v401_v7 = vld [vmem:[%s5179_s16 + $0x2d0] sm:$0xff] }
  0x25   : > { %4377 = vmatmul.mubr.msk.f32.gmra.mrb[6].mxu0 %vm450_vm0, %v5243_v32  ;;  %4473 = vmatmul.mubr.msk.f32.gmra.mrb[6].mxu1 %vm450_vm0, %v382_v33  ;;  %v5383_v8 = vld [vmem:[%s5179_s16 + $0xd8] sm:$0xff]  ;;  %v5387_v10 = vld [vmem:[%s5179_s16 + $0xe0] sm:$0xff]  ;;  %v5397_v13 = vld [vmem:[%s5179_s16 + $0xe8] sm:$0xff] }
  0x26   : > { %4379 = vmatprep.mubr.msk.f32.mxu0 %vm450_vm0, %v5247_v34  ;;  %4475 = vmatprep.mubr.msk.f32.mxu1 %vm450_vm0, %v383_v35  ;;  %v402_v9 = vld [vmem:[%s5179_s16 + $0x2d8] sm:$0xff]  ;;  %v403_v11 = vld [vmem:[%s5179_s16 + $0x2e0] sm:$0xff]  ;;  %v404_v14 = vld [vmem:[%s5179_s16 + $0x2e8] sm:$0xff] }
  0x27   : > { %v5401_v15 = vld [vmem:[%s5179_s16 + $0xf0] sm:$0xff]  ;;  %v5411_v17 = vld [vmem:[%s5179_s16 + $0xf8] sm:$0xff]  ;;  %v5415_v21 = vld [vmem:[%s5179_s16 + $0x100] sm:$0xff] }
  0x28   : > { %v405_v16 = vld [vmem:[%s5179_s16 + $0x2f0] sm:$0xff]  ;;  %v406_v19 = vld [vmem:[%s5179_s16 + $0x2f8] sm:$0xff]  ;;  %v407_v22 = vld [vmem:[%s5179_s16 + $0x300] sm:$0xff] }
  0x29   : > { %4380 = vmatmul.mubr.msk.f32.gmra.mrb[8].mxu0 %vm450_vm0, %v5257_v36  ;;  %4476 = vmatmul.mubr.msk.f32.gmra.mrb[8].mxu1 %vm450_vm0, %v384_v37  ;;  %v5425_v23 = vld [vmem:[%s5179_s16 + $0x108] sm:$0xff]  ;;  %v5429_v27 = vld [vmem:[%s5179_s16 + $0x110] sm:$0xff]  ;;  %v5439_v31 = vld [vmem:[%s5179_s16 + $0x118] sm:$0xff] }
  0x2a   : > { %4382 = vmatprep.mubr.msk.f32.mxu0 %vm450_vm0, %v5261_v38  ;;  %4478 = vmatprep.mubr.msk.f32.mxu1 %vm450_vm0, %v385_v39  ;;  %v408_v25 = vld [vmem:[%s5179_s16 + $0x308] sm:$0xff]  ;;  %v409_v29 = vld [vmem:[%s5179_s16 + $0x310] sm:$0xff]  ;;  %v410_v33 = vld [vmem:[%s5179_s16 + $0x318] sm:$0xff] }
  0x2b   : > { %v5443_v35 = vld [vmem:[%s5179_s16 + $0x120] sm:$0xff]  ;;  %v5453_v39 = vld [vmem:[%s5179_s16 + $0x128] sm:$0xff] }
  0x2c   : > { %v411_v37 = vld [vmem:[%s5179_s16 + $0x320] sm:$0xff] }
  0x2d   : > { %4383 = vmatmul.mubr.msk.f32.gmra.mrb[10].mxu0 %vm450_vm0, %v5271_v40  ;;  %4479 = vmatmul.mubr.msk.f32.gmra.mrb[10].mxu1 %vm450_vm0, %v386_v41  ;;  %v412_v41 = vld [vmem:[%s5179_s16 + $0x328] sm:$0xff] }
  0x2e   : > { %4385 = vmatprep.mubr.msk.f32.mxu0 %vm450_vm0, %v5275_v42  ;;  %4481 = vmatprep.mubr.msk.f32.mxu1 %vm450_vm0, %v387_v43  ;;  %v5457_v43 = vld [vmem:[%s5179_s16 + $0x130] sm:$0xff] }
  0x31   : > { %4386 = vmatmul.mubr.msk.f32.gmra.mrb[12].mxu0 %vm450_vm0, %v5285_v44  ;;  %4482 = vmatmul.mubr.msk.f32.gmra.mrb[12].mxu1 %vm450_vm0, %v388_v45  ;;  %v413_v45 = vld [vmem:[%s5179_s16 + $0x330] sm:$0xff] }
  0x32   : > { %4388 = vmatprep.mubr.msk.f32.mxu0 %vm450_vm0, %v5289_v46  ;;  %4484 = vmatprep.mubr.msk.f32.mxu1 %vm450_vm0, %v389_v47  ;;  %v5467_v47 = vld [vmem:[%s5179_s16 + $0x138] sm:$0xff] }
  0x35   : > { %4389 = vmatmul.mubr.msk.f32.gmra.mrb[14].mxu0 %vm450_vm0, %v5299_v48  ;;  %4485 = vmatmul.mubr.msk.f32.gmra.mrb[14].mxu1 %vm450_vm0, %v390_v49  ;;  %v414_v49 = vld [vmem:[%s5179_s16 + $0x338] sm:$0xff] }
  0x36   : > { %4391 = vmatprep.mubr.msk.f32.mxu0 %vm450_vm0, %v5303_v50  ;;  %4487 = vmatprep.mubr.msk.f32.mxu1 %vm450_vm0, %v391_v51  ;;  %v5471_v51 = vld [vmem:[%s5179_s16 + $0x140] sm:$0xff] }
  0x39   : > { %4392 = vmatmul.mubr.msk.f32.gmra.mrb[16].mxu0 %vm450_vm0, %v5313_v52  ;;  %4488 = vmatmul.mubr.msk.f32.gmra.mrb[16].mxu1 %vm450_vm0, %v392_v53  ;;  %v415_v53 = vld [vmem:[%s5179_s16 + $0x340] sm:$0xff] }
  0x3a   : > { %4394 = vmatprep.mubr.msk.f32.mxu0 %vm450_vm0, %v5317_v54  ;;  %4490 = vmatprep.mubr.msk.f32.mxu1 %vm450_vm0, %v393_v55  ;;  %v5481_v55 = vld [vmem:[%s5179_s16 + $0x148] sm:$0xff] }
  0x3d   : > { %4395 = vmatmul.mubr.msk.f32.gmra.mrb[18].mxu0 %vm450_vm0, %v5327_v56  ;;  %4491 = vmatmul.mubr.msk.f32.gmra.mrb[18].mxu1 %vm450_vm0, %v394_v57  ;;  %v416_v57 = vld [vmem:[%s5179_s16 + $0x348] sm:$0xff] }
  0x3e   : > { %4397 = vmatprep.mubr.msk.f32.mxu0 %vm450_vm0, %v5331_v58  ;;  %4493 = vmatprep.mubr.msk.f32.mxu1 %vm450_vm0, %v395_v59  ;;  %v5485_v59 = vld [vmem:[%s5179_s16 + $0x150] sm:$0xff] }
  0x41   : > { %4398 = vmatmul.mubr.msk.f32.gmra.mrb[20].mxu0 %vm450_vm0, %v5341_v60  ;;  %4494 = vmatmul.mubr.msk.f32.gmra.mrb[20].mxu1 %vm450_vm0, %v396_v61  ;;  %v417_v61 = vld [vmem:[%s5179_s16 + $0x350] sm:$0xff] }
  0x42   : > { %4400 = vmatprep.mubr.msk.f32.mxu0 %vm450_vm0, %v5345_v62  ;;  %4496 = vmatprep.mubr.msk.f32.mxu1 %vm450_vm0, %v397_v63  ;;  %v5495_v63 = vld [vmem:[%s5179_s16 + $0x158] sm:$0xff] }
  0x45   : > { %4401 = vmatmul.mubr.msk.f32.gmra.mrb[22].mxu0 %vm450_vm0, %v5355_v0  ;;  %4497 = vmatmul.mubr.msk.f32.gmra.mrb[22].mxu1 %vm450_vm0, %v398_v1  ;;  %v418_v1 = vld [vmem:[%s5179_s16 + $0x358] sm:$0xff] }
  0x46   : > { %4403 = vmatprep.mubr.msk.f32.mxu0 %vm450_vm0, %v5359_v2  ;;  %4499 = vmatprep.mubr.msk.f32.mxu1 %vm450_vm0, %v399_v3  ;;  %v5499_v3 = vld [vmem:[%s5179_s16 + $0x160] sm:$0xff] }
  0x49   : > { %4404 = vmatmul.mubr.msk.f32.gmra.mrb[24].mxu0 %vm450_vm0, %v5369_v4  ;;  %4500 = vmatmul.mubr.msk.f32.gmra.mrb[24].mxu1 %vm450_vm0, %v400_v5  ;;  %v419_v5 = vld [vmem:[%s5179_s16 + $0x360] sm:$0xff] }
  0x4a   : > { %4406 = vmatprep.mubr.msk.f32.mxu0 %vm450_vm0, %v5373_v6  ;;  %4502 = vmatprep.mubr.msk.f32.mxu1 %vm450_vm0, %v401_v7  ;;  %v5509_v7 = vld [vmem:[%s5179_s16 + $0x168] sm:$0xff] }
  0x4d   : > { %4407 = vmatmul.mubr.msk.f32.gmra.mrb[26].mxu0 %vm450_vm0, %v5383_v8  ;;  %4503 = vmatmul.mubr.msk.f32.gmra.mrb[26].mxu1 %vm450_vm0, %v402_v9  ;;  %v420_v9 = vld [vmem:[%s5179_s16 + $0x368] sm:$0xff] }
  0x4e   : > { %4409 = vmatprep.mubr.msk.f32.mxu0 %vm450_vm0, %v5387_v10  ;;  %4505 = vmatprep.mubr.msk.f32.mxu1 %vm450_vm0, %v403_v11  ;;  %v5513_v11 = vld [vmem:[%s5179_s16 + $0x170] sm:$0xff] }
  0x51   : > { %4410 = vmatmul.mubr.msk.f32.gmra.mrb[28].mxu0 %vm450_vm0, %v5397_v13  ;;  %4506 = vmatmul.mubr.msk.f32.gmra.mrb[28].mxu1 %vm450_vm0, %v404_v14  ;;  %v421_v14 = vld [vmem:[%s5179_s16 + $0x370] sm:$0xff] }
  0x52   : > { %4412 = vmatprep.mubr.msk.f32.mxu0 %vm450_vm0, %v5401_v15  ;;  %4508 = vmatprep.mubr.msk.f32.mxu1 %vm450_vm0, %v405_v16  ;;  %v5523_v16 = vld [vmem:[%s5179_s16 + $0x178] sm:$0xff] }
  0x55   : > { %4413 = vmatmul.mubr.msk.f32.gmra.mrb[30].mxu0 %vm450_vm0, %v5411_v17  ;;  %4509 = vmatmul.mubr.msk.f32.gmra.mrb[30].mxu1 %vm450_vm0, %v406_v19  ;;  %v422_v19 = vld [vmem:[%s5179_s16 + $0x378] sm:$0xff] }
  0x56   : > { %4415 = vmatprep.mubr.msk.f32.mxu0 %vm450_vm0, %v5415_v21  ;;  %4511 = vmatprep.mubr.msk.f32.mxu1 %vm450_vm0, %v407_v22  ;;  %v5527_v22 = vld [vmem:[%s5179_s16 + $0x180] sm:$0xff] }
  0x59   : > { %4416 = vmatmul.mubr.msk.f32.gmra.mrb[32].mxu0 %vm450_vm0, %v5425_v23  ;;  %4512 = vmatmul.mubr.msk.f32.gmra.mrb[32].mxu1 %vm450_vm0, %v408_v25  ;;  %v423_v25 = vld [vmem:[%s5179_s16 + $0x380] sm:$0xff] }
  0x5a   : > { %4418 = vmatprep.mubr.msk.f32.mxu0 %vm450_vm0, %v5429_v27  ;;  %4514 = vmatprep.mubr.msk.f32.mxu1 %vm450_vm0, %v409_v29  ;;  %v5537_v29 = vld [vmem:[%s5179_s16 + $0x188] sm:$0xff] }
  0x5d   : > { %4419 = vmatmul.mubr.msk.f32.gmra.mrb[34].mxu0 %vm450_vm0, %v5439_v31  ;;  %4515 = vmatmul.mubr.msk.f32.gmra.mrb[34].mxu1 %vm450_vm0, %v410_v33  ;;  %v424_v33 = vld [vmem:[%s5179_s16 + $0x388] sm:$0xff] }
  0x5e   : > { %4421 = vmatprep.mubr.msk.f32.mxu0 %vm450_vm0, %v5443_v35  ;;  %4517 = vmatprep.mubr.msk.f32.mxu1 %vm450_vm0, %v411_v37  ;;  %v5541_v37 = vld [vmem:[%s5179_s16 + $0x190] sm:$0xff] }
  0x61   : > { %4422 = vmatmul.mubr.msk.f32.gmra.mrb[36].mxu0 %vm450_vm0, %v5453_v39  ;;  %4518 = vmatmul.mubr.msk.f32.gmra.mrb[36].mxu1 %vm450_vm0, %v412_v41  ;;  %v425_v41 = vld [vmem:[%s5179_s16 + $0x390] sm:$0xff] }
  0x62   : > { %4424 = vmatprep.mubr.msk.f32.mxu0 %vm450_vm0, %v5457_v43  ;;  %4520 = vmatprep.mubr.msk.f32.mxu1 %vm450_vm0, %v413_v45  ;;  %v5551_v45 = vld [vmem:[%s5179_s16 + $0x198] sm:$0xff] }
  0x65   : > { %4425 = vmatmul.mubr.msk.f32.gmra.mrb[38].mxu0 %vm450_vm0, %v5467_v47  ;;  %4521 = vmatmul.mubr.msk.f32.gmra.mrb[38].mxu1 %vm450_vm0, %v414_v49  ;;  %v426_v49 = vld [vmem:[%s5179_s16 + $0x398] sm:$0xff] }
  0x66   : > { %4427 = vmatprep.mubr.msk.f32.mxu0 %vm450_vm0, %v5471_v51  ;;  %4523 = vmatprep.mubr.msk.f32.mxu1 %vm450_vm0, %v415_v53  ;;  %v5555_v53 = vld [vmem:[%s5179_s16 + $0x1a0] sm:$0xff] }
  0x69   : > { %4428 = vmatmul.mubr.msk.f32.gmra.mrb[40].mxu0 %vm450_vm0, %v5481_v55  ;;  %4524 = vmatmul.mubr.msk.f32.gmra.mrb[40].mxu1 %vm450_vm0, %v416_v57  ;;  %v427_v57 = vld [vmem:[%s5179_s16 + $0x3a0] sm:$0xff] }
  0x6a   : > { %4430 = vmatprep.mubr.msk.f32.mxu0 %vm450_vm0, %v5485_v59  ;;  %4526 = vmatprep.mubr.msk.f32.mxu1 %vm450_vm0, %v417_v61  ;;  %v5565_v61 = vld [vmem:[%s5179_s16 + $0x1a8] sm:$0xff] }
  0x6d   : > { %4431 = vmatmul.mubr.msk.f32.gmra.mrb[42].mxu0 %vm450_vm0, %v5495_v63  ;;  %4527 = vmatmul.mubr.msk.f32.gmra.mrb[42].mxu1 %vm450_vm0, %v418_v1  ;;  %v428_v1 = vld [vmem:[%s5179_s16 + $0x3a8] sm:$0xff] }
  0x6e   : > { %4433 = vmatprep.mubr.msk.f32.mxu0 %vm450_vm0, %v5499_v3  ;;  %4529 = vmatprep.mubr.msk.f32.mxu1 %vm450_vm0, %v419_v5  ;;  %v5569_v5 = vld [vmem:[%s5179_s16 + $0x1b0] sm:$0xff] }
  0x71   : > { %4434 = vmatmul.mubr.msk.f32.gmra.mrb[44].mxu0 %vm450_vm0, %v5509_v7  ;;  %4530 = vmatmul.mubr.msk.f32.gmra.mrb[44].mxu1 %vm450_vm0, %v420_v9  ;;  %v429_v9 = vld [vmem:[%s5179_s16 + $0x3b0] sm:$0xff] }
  0x72   : > { %4436 = vmatprep.mubr.msk.f32.mxu0 %vm450_vm0, %v5513_v11  ;;  %4532 = vmatprep.mubr.msk.f32.mxu1 %vm450_vm0, %v421_v14  ;;  %v5579_v14 = vld [vmem:[%s5179_s16 + $0x1b8] sm:$0xff] }
  0x75   : > { %4437 = vmatmul.mubr.msk.f32.gmra.mrb[46].mxu0 %vm450_vm0, %v5523_v16  ;;  %4533 = vmatmul.mubr.msk.f32.gmra.mrb[46].mxu1 %vm450_vm0, %v422_v19  ;;  %v430_v19 = vld [vmem:[%s5179_s16 + $0x3b8] sm:$0xff] }
  0x76   : > { %4439 = vmatprep.mubr.msk.f32.mxu0 %vm450_vm0, %v5527_v22  ;;  %4535 = vmatprep.mubr.msk.f32.mxu1 %vm450_vm0, %v423_v25  ;;  %v5583_v25 = vld [vmem:[%s5179_s16 + $0x1c0] sm:$0xff] }
  0x77   : > { %7307 = vst [vmem:[#allocation2_spill] sm:$0xff] %v5583_v25 }
  0x79   : > { %4440 = vmatmul.mubr.msk.f32.gmra.mrb[48].mxu0 %vm450_vm0, %v5537_v29  ;;  %4536 = vmatmul.mubr.msk.f32.gmra.mrb[48].mxu1 %vm450_vm0, %v424_v33  ;;  %v431_v33 = vld [vmem:[%s5179_s16 + $0x3c0] sm:$0xff] }
  0x7a   : > { %4442 = vmatprep.mubr.msk.f32.mxu0 %vm450_vm0, %v5541_v37  ;;  %4538 = vmatprep.mubr.msk.f32.mxu1 %vm450_vm0, %v425_v41  ;;  %v5593_v41 = vld [vmem:[%s5179_s16 + $0x1c8] sm:$0xff] }
  0x7b   : > { %7308 = vst [vmem:[#allocation3_spill] sm:$0xff] %v5593_v41 }
  0x7d   : > { %4443 = vmatmul.mubr.msk.f32.gmra.mrb[50].mxu0 %vm450_vm0, %v5551_v45  ;;  %4539 = vmatmul.mubr.msk.f32.gmra.mrb[50].mxu1 %vm450_vm0, %v426_v49  ;;  %v432_v49 = vld [vmem:[%s5179_s16 + $0x3c8] sm:$0xff] }
  0x7e   : > { %4445 = vmatprep.mubr.msk.f32.mxu0 %vm450_vm0, %v5555_v53  ;;  %4541 = vmatprep.mubr.msk.f32.mxu1 %vm450_vm0, %v427_v57  ;;  %v5597_v57 = vld [vmem:[%s5179_s16 + $0x1d0] sm:$0xff] }
  0x7f   : > { %7309 = vst [vmem:[#allocation4_spill] sm:$0xff] %v5597_v57 }
  0x81   : > { %4446 = vmatmul.mubr.msk.f32.gmra.mrb[52].mxu0 %vm450_vm0, %v5565_v61  ;;  %4542 = vmatmul.mubr.msk.f32.gmra.mrb[52].mxu1 %vm450_vm0, %v428_v1  ;;  %v433_v1 = vld [vmem:[%s5179_s16 + $0x3d0] sm:$0xff] }
  0x82   : > { %4448 = vmatprep.mubr.msk.f32.mxu0 %vm450_vm0, %v5569_v5  ;;  %4544 = vmatprep.mubr.msk.f32.mxu1 %vm450_vm0, %v429_v9  ;;  %v5607_v9 = vld [vmem:[%s5179_s16 + $0x1d8] sm:$0xff] }
  0x85   : > { %4449 = vmatmul.mubr.msk.f32.gmra.mrb[54].mxu0 %vm450_vm0, %v5579_v14  ;;  %4545 = vmatmul.mubr.msk.f32.gmra.mrb[54].mxu1 %vm450_vm0, %v430_v19  ;;  %v434_v19 = vld [vmem:[%s5179_s16 + $0x3d8] sm:$0xff] }
  0x86   : > { %4451 = vmatprep.mubr.msk.f32.mxu0 %vm450_vm0, %v5583_v25  ;;  %4547 = vmatprep.mubr.msk.f32.mxu1 %vm450_vm0, %v431_v33  ;;  %v5611_v33 = vld [vmem:[%s5179_s16 + $0x1e0] sm:$0xff] }
  0x87   : > { %7310 = vst [vmem:[#allocation5_spill] sm:$0xff] %v5611_v33  ;;  %v435_v25 = vld [vmem:[%s5179_s16 + $0x3e0] sm:$0xff] }
  0x89   : > { %4452 = vmatmul.mubr.msk.f32.gmra.mrb[56].mxu0 %vm450_vm0, %v5593_v41  ;;  %4548 = vmatmul.mubr.msk.f32.gmra.mrb[56].mxu1 %vm450_vm0, %v432_v49  ;;  %v5621_v49 = vld [vmem:[%s5179_s16 + $0x1e8] sm:$0xff]  ;;  %v437_v41 = vld [vmem:[%s5179_s16 + $0x3f0] sm:$0xff] }
  0x8a   : > { %4454 = vmatprep.mubr.msk.f32.mxu0 %vm450_vm0, %v5597_v57  ;;  %4550 = vmatprep.mubr.msk.f32.mxu1 %vm450_vm0, %v433_v1  ;;  %v436_v1 = vld [vmem:[%s5179_s16 + $0x3e8] sm:$0xff]  ;;  %v5625_v57 = vld [vmem:[%s5179_s16 + $0x1f0] sm:$0xff] }
  0x8d   : > { %4455 = vmatmul.mubr.msk.f32.gmra.mrb[58].mxu0 %vm450_vm0, %v5607_v9  ;;  %4551 = vmatmul.mubr.msk.f32.gmra.mrb[58].mxu1 %vm450_vm0, %v434_v19  ;;  %v5635_v19 = vld [vmem:[%s5179_s16 + $0x1f8] sm:$0xff] }
  0x8e   : > { %4457 = vmatprep.mubr.msk.f32.mxu0 %vm450_vm0, %v5611_v33  ;;  %4553 = vmatprep.mubr.msk.f32.mxu1 %vm450_vm0, %v435_v25  ;;  %v438_v33 = vld [vmem:[%s5179_s16 + $0x3f8] sm:$0xff] }
  0x91   : > { %4458 = vmatmul.mubr.msk.f32.gmra.mrb[60].mxu0 %vm450_vm0, %v5621_v49  ;;  %4554 = vmatmul.mubr.msk.f32.gmra.mrb[60].mxu1 %vm450_vm0, %v436_v1 }
  0x92   : > { %4460 = vmatprep.mubr.msk.f32.mxu0 %vm450_vm0, %v5625_v57  ;;  %4556 = vmatprep.mubr.msk.f32.mxu1 %vm450_vm0, %v437_v41 }
  0x95   : > { %4461 = vmatmul.mubr.msk.f32.gmra.mrb[62].mxu0 %vm450_vm0, %v5635_v19  ;;  %4557 = vmatmul.mubr.msk.f32.gmra.mrb[62].mxu1 %vm450_vm0, %v438_v33  ;;  %v7311_v33 = vld [vmem:[#allocation2_spill] sm:$0xff] }
  0x96   : > { %4567 = vmatprep.mubr.msk.f32.mxu1 %vm450_vm0, %v5182_v12  ;;  %4767 = vmatprep.mubr.msk.f32.mxu0 %vm450_vm0, %v5182_v12  ;;  %v5812_v12 = vld [vmem:[%s7295_s2] ss:$0 sm:$0xff] }
  0x99   : > { %4568 = vmatmul.mubr.msk.f32.vlgmr.msra.gmra.mrb[64].mxu1 %vm450_vm0, %v5201_v18  ;;  %4768 = vmatmul.mubr.msk.f32.vlgmr.msra.gmra.mrb[64].mxu0 %vm450_vm0, %v5201_v18 }
  0x9a   : > { %4570 = vmatprep.mubr.msk.f32.mxu1 %vm450_vm0, %v5205_v20  ;;  %4770 = vmatprep.mubr.msk.f32.mxu0 %vm450_vm0, %v5205_v20 }
  0x9d   : > { %4571 = vmatmul.mubr.msk.f32.gmra.mrb[66].mxu1 %vm450_vm0, %v5212_v24  ;;  %4771 = vmatmul.mubr.msk.f32.gmra.mrb[66].mxu0 %vm450_vm0, %v5212_v24 }
  0x9e   : > { %4573 = vmatprep.mubr.msk.f32.mxu1 %vm450_vm0, %v5219_v26  ;;  %4773 = vmatprep.mubr.msk.f32.mxu0 %vm450_vm0, %v5219_v26 }
  0xa1   : > { %4574 = vmatmul.mubr.msk.f32.gmra.mrb[68].mxu1 %vm450_vm0, %v5229_v28  ;;  %4774 = vmatmul.mubr.msk.f32.gmra.mrb[68].mxu0 %vm450_vm0, %v5229_v28 }
  0xa2   : > { %4576 = vmatprep.mubr.msk.f32.mxu1 %vm450_vm0, %v5233_v30  ;;  %4776 = vmatprep.mubr.msk.f32.mxu0 %vm450_vm0, %v5233_v30 }
  0xa5   : > { %4577 = vmatmul.mubr.msk.f32.gmra.mrb[70].mxu1 %vm450_vm0, %v5243_v32  ;;  %4777 = vmatmul.mubr.msk.f32.gmra.mrb[70].mxu0 %vm450_vm0, %v5243_v32 }
  0xa6   : > { %4579 = vmatprep.mubr.msk.f32.mxu1 %vm450_vm0, %v5247_v34  ;;  %4779 = vmatprep.mubr.msk.f32.mxu0 %vm450_vm0, %v5247_v34 }
  0xa9   : > { %4580 = vmatmul.mubr.msk.f32.gmra.mrb[72].mxu1 %vm450_vm0, %v5257_v36  ;;  %4780 = vmatmul.mubr.msk.f32.gmra.mrb[72].mxu0 %vm450_vm0, %v5257_v36 }
  0xaa   : > { %4582 = vmatprep.mubr.msk.f32.mxu1 %vm450_vm0, %v5261_v38  ;;  %4782 = vmatprep.mubr.msk.f32.mxu0 %vm450_vm0, %v5261_v38 }
  0xad   : > { %4583 = vmatmul.mubr.msk.f32.gmra.mrb[74].mxu1 %vm450_vm0, %v5271_v40  ;;  %4783 = vmatmul.mubr.msk.f32.gmra.mrb[74].mxu0 %vm450_vm0, %v5271_v40 }
  0xae   : > { %4585 = vmatprep.mubr.msk.f32.mxu1 %vm450_vm0, %v5275_v42  ;;  %4785 = vmatprep.mubr.msk.f32.mxu0 %vm450_vm0, %v5275_v42 }
  0xb1   : > { %4586 = vmatmul.mubr.msk.f32.gmra.mrb[76].mxu1 %vm450_vm0, %v5285_v44  ;;  %4786 = vmatmul.mubr.msk.f32.gmra.mrb[76].mxu0 %vm450_vm0, %v5285_v44 }
  0xb2   : > { %4588 = vmatprep.mubr.msk.f32.mxu1 %vm450_vm0, %v5289_v46  ;;  %4788 = vmatprep.mubr.msk.f32.mxu0 %vm450_vm0, %v5289_v46 }
  0xb5   : > { %4589 = vmatmul.mubr.msk.f32.gmra.mrb[78].mxu1 %vm450_vm0, %v5299_v48  ;;  %4789 = vmatmul.mubr.msk.f32.gmra.mrb[78].mxu0 %vm450_vm0, %v5299_v48 }
  0xb6   : > { %4591 = vmatprep.mubr.msk.f32.mxu1 %vm450_vm0, %v5303_v50  ;;  %4791 = vmatprep.mubr.msk.f32.mxu0 %vm450_vm0, %v5303_v50 }
  0xb9   : > { %4592 = vmatmul.mubr.msk.f32.gmra.mrb[80].mxu1 %vm450_vm0, %v5313_v52  ;;  %4792 = vmatmul.mubr.msk.f32.gmra.mrb[80].mxu0 %vm450_vm0, %v5313_v52 }
  0xba   : > { %4594 = vmatprep.mubr.msk.f32.mxu1 %vm450_vm0, %v5317_v54  ;;  %4794 = vmatprep.mubr.msk.f32.mxu0 %vm450_vm0, %v5317_v54 }
  0xbd   : > { %4595 = vmatmul.mubr.msk.f32.gmra.mrb[82].mxu1 %vm450_vm0, %v5327_v56  ;;  %4795 = vmatmul.mubr.msk.f32.gmra.mrb[82].mxu0 %vm450_vm0, %v5327_v56 }
  0xbe   : > { %4597 = vmatprep.mubr.msk.f32.mxu1 %vm450_vm0, %v5331_v58  ;;  %4797 = vmatprep.mubr.msk.f32.mxu0 %vm450_vm0, %v5331_v58 }
  0xc1   : > { %4598 = vmatmul.mubr.msk.f32.gmra.mrb[84].mxu1 %vm450_vm0, %v5341_v60  ;;  %4798 = vmatmul.mubr.msk.f32.gmra.mrb[84].mxu0 %vm450_vm0, %v5341_v60 }
  0xc2   : > { %4600 = vmatprep.mubr.msk.f32.mxu1 %vm450_vm0, %v5345_v62  ;;  %4800 = vmatprep.mubr.msk.f32.mxu0 %vm450_vm0, %v5345_v62 }
  0xc5   : > { %4601 = vmatmul.mubr.msk.f32.gmra.mrb[86].mxu1 %vm450_vm0, %v5355_v0  ;;  %4801 = vmatmul.mubr.msk.f32.gmra.mrb[86].mxu0 %vm450_vm0, %v5355_v0 }
  0xc6   : > { %4603 = vmatprep.mubr.msk.f32.mxu1 %vm450_vm0, %v5359_v2  ;;  %4803 = vmatprep.mubr.msk.f32.mxu0 %vm450_vm0, %v5359_v2 }
  0xc9   : > { %4604 = vmatmul.mubr.msk.f32.gmra.mrb[88].mxu1 %vm450_vm0, %v5369_v4  ;;  %4804 = vmatmul.mubr.msk.f32.gmra.mrb[88].mxu0 %vm450_vm0, %v5369_v4 }
  0xca   : > { %4606 = vmatprep.mubr.msk.f32.mxu1 %vm450_vm0, %v5373_v6  ;;  %4806 = vmatprep.mubr.msk.f32.mxu0 %vm450_vm0, %v5373_v6 }
  0xcd   : > { %4607 = vmatmul.mubr.msk.f32.gmra.mrb[90].mxu1 %vm450_vm0, %v5383_v8  ;;  %4807 = vmatmul.mubr.msk.f32.gmra.mrb[90].mxu0 %vm450_vm0, %v5383_v8 }
  0xce   : > { %4609 = vmatprep.mubr.msk.f32.mxu1 %vm450_vm0, %v5387_v10  ;;  %4809 = vmatprep.mubr.msk.f32.mxu0 %vm450_vm0, %v5387_v10 }
  0xd1   : > { %4610 = vmatmul.mubr.msk.f32.gmra.mrb[92].mxu1 %vm450_vm0, %v5397_v13  ;;  %4810 = vmatmul.mubr.msk.f32.gmra.mrb[92].mxu0 %vm450_vm0, %v5397_v13 }
  0xd2   : > { %4612 = vmatprep.mubr.msk.f32.mxu1 %vm450_vm0, %v5401_v15  ;;  %4812 = vmatprep.mubr.msk.f32.mxu0 %vm450_vm0, %v5401_v15 }
  0xd5   : > { %4613 = vmatmul.mubr.msk.f32.gmra.mrb[94].mxu1 %vm450_vm0, %v5411_v17  ;;  %4813 = vmatmul.mubr.msk.f32.gmra.mrb[94].mxu0 %vm450_vm0, %v5411_v17 }
  0xd6   : > { %4615 = vmatprep.mubr.msk.f32.mxu1 %vm450_vm0, %v5415_v21  ;;  %4815 = vmatprep.mubr.msk.f32.mxu0 %vm450_vm0, %v5415_v21 }
  0xd9   : > { %4616 = vmatmul.mubr.msk.f32.gmra.mrb[96].mxu1 %vm450_vm0, %v5425_v23  ;;  %4816 = vmatmul.mubr.msk.f32.gmra.mrb[96].mxu0 %vm450_vm0, %v5425_v23 }
  0xda   : > { %4618 = vmatprep.mubr.msk.f32.mxu1 %vm450_vm0, %v5429_v27  ;;  %4818 = vmatprep.mubr.msk.f32.mxu0 %vm450_vm0, %v5429_v27 }
  0xdd   : > { %4619 = vmatmul.mubr.msk.f32.gmra.mrb[98].mxu1 %vm450_vm0, %v5439_v31  ;;  %4819 = vmatmul.mubr.msk.f32.gmra.mrb[98].mxu0 %vm450_vm0, %v5439_v31 }
  0xde   : > { %4621 = vmatprep.mubr.msk.f32.mxu1 %vm450_vm0, %v5443_v35  ;;  %4821 = vmatprep.mubr.msk.f32.mxu0 %vm450_vm0, %v5443_v35 }
  0xe1   : > { %4622 = vmatmul.mubr.msk.f32.gmra.mrb[100].mxu1 %vm450_vm0, %v5453_v39  ;;  %4822 = vmatmul.mubr.msk.f32.gmra.mrb[100].mxu0 %vm450_vm0, %v5453_v39 }
  0xe2   : > { %4624 = vmatprep.mubr.msk.f32.mxu1 %vm450_vm0, %v5457_v43  ;;  %4824 = vmatprep.mubr.msk.f32.mxu0 %vm450_vm0, %v5457_v43 }
  0xe5   : > { %4625 = vmatmul.mubr.msk.f32.gmra.mrb[102].mxu1 %vm450_vm0, %v5467_v47  ;;  %4825 = vmatmul.mubr.msk.f32.gmra.mrb[102].mxu0 %vm450_vm0, %v5467_v47 }
  0xe6   : > { %4627 = vmatprep.mubr.msk.f32.mxu1 %vm450_vm0, %v5471_v51  ;;  %4827 = vmatprep.mubr.msk.f32.mxu0 %vm450_vm0, %v5471_v51 }
  0xe9   : > { %4628 = vmatmul.mubr.msk.f32.gmra.mrb[104].mxu1 %vm450_vm0, %v5481_v55  ;;  %4828 = vmatmul.mubr.msk.f32.gmra.mrb[104].mxu0 %vm450_vm0, %v5481_v55 }
  0xea   : > { %4630 = vmatprep.mubr.msk.f32.mxu1 %vm450_vm0, %v5485_v59  ;;  %4830 = vmatprep.mubr.msk.f32.mxu0 %vm450_vm0, %v5485_v59 }
  0xec   : > { %v4369_v18 = vpop.f32.mrb[0].mxu0  ;;  %v4465_v20 = vpop.f32.mrb[0].mxu1 }
  0xed   : > { %v907_v24 = vadd.f32 %v4369_v18, %v5812_v12  ;;  %v1227_v26 = vadd.f32 %v4465_v20, %v5812_v12  ;;  %v901_v28 = vpop.f32.mrb[1].mxu0  ;;  %v1221_v30 = vpop.f32.mrb[1].mxu1  ;;  %4631 = vmatmul.mubr.msk.f32.gmra.mrb[106].mxu1 %vm450_vm0, %v5495_v63  ;;  %4831 = vmatmul.mubr.msk.f32.gmra.mrb[106].mxu0 %vm450_vm0, %v5495_v63 }
  0xee   : > { %v902_v32 = vadd.f32 %v5812_v12, %v901_v28  ;;  %v1222_v34 = vadd.f32 %v5812_v12, %v1221_v30  ;;  %4633 = vmatprep.mubr.msk.f32.mxu1 %vm450_vm0, %v5499_v3  ;;  %4833 = vmatprep.mubr.msk.f32.mxu0 %vm450_vm0, %v5499_v3  ;;  %v7312_v28 = vld [vmem:[#allocation3_spill] sm:$0xff] }
  0xef   : > { %1541 = vst.msk [vmem:[%s5822_s7 + $0x8] sm:$0xff] %vm450_vm0, %v907_v24  ;;  %1605 = vst.msk [vmem:[%s5822_s7 + $0x208] sm:$0xff] %vm450_vm0, %v1227_v26 }
  0xf0   : > { %1540 = vst.msk [vmem:[%s5822_s7] sm:$0xff] %vm450_vm0, %v902_v32  ;;  %1604 = vst.msk [vmem:[%s5822_s7 + $0x200] sm:$0xff] %vm450_vm0, %v1222_v34  ;;  %v4372_v36 = vpop.f32.mrb[2].mxu0  ;;  %v4468_v38 = vpop.f32.mrb[2].mxu1  ;;  %v7313_v34 = vld [vmem:[#allocation4_spill] sm:$0xff] }
  0xf1   : > { %v917_v40 = vadd.f32 %v4372_v36, %v5812_v12  ;;  %v1237_v42 = vadd.f32 %v4468_v38, %v5812_v12  ;;  %v911_v44 = vpop.f32.mrb[3].mxu0  ;;  %v1231_v46 = vpop.f32.mrb[3].mxu1  ;;  %4634 = vmatmul.mubr.msk.f32.gmra.mrb[108].mxu1 %vm450_vm0, %v5509_v7  ;;  %4834 = vmatmul.mubr.msk.f32.gmra.mrb[108].mxu0 %vm450_vm0, %v5509_v7 }
  0xf2   : > { %v912_v48 = vadd.f32 %v5812_v12, %v911_v44  ;;  %v1232_v50 = vadd.f32 %v5812_v12, %v1231_v46  ;;  %4636 = vmatprep.mubr.msk.f32.mxu1 %vm450_vm0, %v5513_v11  ;;  %4836 = vmatprep.mubr.msk.f32.mxu0 %vm450_vm0, %v5513_v11 }
  0xf3   : > { %1543 = vst.msk [vmem:[%s5822_s7 + $0x18] sm:$0xff] %vm450_vm0, %v917_v40  ;;  %1607 = vst.msk [vmem:[%s5822_s7 + $0x218] sm:$0xff] %vm450_vm0, %v1237_v42 }
  0xf4   : > { %1542 = vst.msk [vmem:[%s5822_s7 + $0x10] sm:$0xff] %vm450_vm0, %v912_v48  ;;  %1606 = vst.msk [vmem:[%s5822_s7 + $0x210] sm:$0xff] %vm450_vm0, %v1232_v50  ;;  %v4375_v52 = vpop.f32.mrb[4].mxu0  ;;  %v4471_v54 = vpop.f32.mrb[4].mxu1 }
  0xf5   : > { %v927_v56 = vadd.f32 %v4375_v52, %v5812_v12  ;;  %v1247_v58 = vadd.f32 %v4471_v54, %v5812_v12  ;;  %v921_v60 = vpop.f32.mrb[5].mxu0  ;;  %v1241_v62 = vpop.f32.mrb[5].mxu1  ;;  %4637 = vmatmul.mubr.msk.f32.gmra.mrb[110].mxu1 %vm450_vm0, %v5523_v16  ;;  %4837 = vmatmul.mubr.msk.f32.gmra.mrb[110].mxu0 %vm450_vm0, %v5523_v16  ;;  %v7314_v52 = vld [vmem:[#allocation5_spill] sm:$0xff] }
  0xf6   : > { %v922_v0 = vadd.f32 %v5812_v12, %v921_v60  ;;  %v1242_v2 = vadd.f32 %v5812_v12, %v1241_v62  ;;  %4639 = vmatprep.mubr.msk.f32.mxu1 %vm450_vm0, %v5527_v22  ;;  %4839 = vmatprep.mubr.msk.f32.mxu0 %vm450_vm0, %v5527_v22 }
  0xf7   : > { %1545 = vst.msk [vmem:[%s5822_s7 + $0x28] sm:$0xff] %vm450_vm0, %v927_v56  ;;  %1609 = vst.msk [vmem:[%s5822_s7 + $0x228] sm:$0xff] %vm450_vm0, %v1247_v58 }
  0xf8   : > { %1544 = vst.msk [vmem:[%s5822_s7 + $0x20] sm:$0xff] %vm450_vm0, %v922_v0  ;;  %1608 = vst.msk [vmem:[%s5822_s7 + $0x220] sm:$0xff] %vm450_vm0, %v1242_v2  ;;  %v4378_v4 = vpop.f32.mrb[6].mxu0  ;;  %v4474_v6 = vpop.f32.mrb[6].mxu1 }
  0xf9   : > { %v937_v8 = vadd.f32 %v4378_v4, %v5812_v12  ;;  %v1257_v10 = vadd.f32 %v4474_v6, %v5812_v12  ;;  %v931_v13 = vpop.f32.mrb[7].mxu0  ;;  %v1251_v15 = vpop.f32.mrb[7].mxu1  ;;  %4640 = vmatmul.mubr.msk.f32.gmra.mrb[112].mxu1 %vm450_vm0, %v5537_v29  ;;  %4840 = vmatmul.mubr.msk.f32.gmra.mrb[112].mxu0 %vm450_vm0, %v5537_v29 }
  0xfa   : > { %v932_v17 = vadd.f32 %v5812_v12, %v931_v13  ;;  %v1252_v21 = vadd.f32 %v5812_v12, %v1251_v15  ;;  %4642 = vmatprep.mubr.msk.f32.mxu1 %vm450_vm0, %v5541_v37  ;;  %4842 = vmatprep.mubr.msk.f32.mxu0 %vm450_vm0, %v5541_v37 }
  0xfb   : > { %1547 = vst.msk [vmem:[%s5822_s7 + $0x38] sm:$0xff] %vm450_vm0, %v937_v8  ;;  %1611 = vst.msk [vmem:[%s5822_s7 + $0x238] sm:$0xff] %vm450_vm0, %v1257_v10 }
  0xfc   : > { %1546 = vst.msk [vmem:[%s5822_s7 + $0x30] sm:$0xff] %vm450_vm0, %v932_v17  ;;  %1610 = vst.msk [vmem:[%s5822_s7 + $0x230] sm:$0xff] %vm450_vm0, %v1252_v21  ;;  %v4381_v23 = vpop.f32.mrb[8].mxu0  ;;  %v4477_v27 = vpop.f32.mrb[8].mxu1  ;;  %v5011_v17 = vld [vmem:[%s5179_s16 + $0x200] sm:$0xff] }
  0xfd   : > { %v947_v31 = vadd.f32 %v4381_v23, %v5812_v12  ;;  %v1267_v35 = vadd.f32 %v4477_v27, %v5812_v12  ;;  %v941_v39 = vpop.f32.mrb[9].mxu0  ;;  %v1261_v43 = vpop.f32.mrb[9].mxu1  ;;  %4643 = vmatmul.mubr.msk.f32.gmra.mrb[114].mxu1 %vm450_vm0, %v5551_v45  ;;  %4843 = vmatmul.mubr.msk.f32.gmra.mrb[114].mxu0 %vm450_vm0, %v5551_v45 }
  0xfe   : > { %v942_v47 = vadd.f32 %v5812_v12, %v941_v39  ;;  %v1262_v51 = vadd.f32 %v5812_v12, %v1261_v43  ;;  %4645 = vmatprep.mubr.msk.f32.mxu1 %vm450_vm0, %v5555_v53  ;;  %4845 = vmatprep.mubr.msk.f32.mxu0 %vm450_vm0, %v5555_v53  ;;  %v5012_v39 = vld [vmem:[%s5179_s16 + $0x208] sm:$0xff] }
  0xff   : > { %1549 = vst.msk [vmem:[%s5822_s7 + $0x48] sm:$0xff] %vm450_vm0, %v947_v31  ;;  %1613 = vst.msk [vmem:[%s5822_s7 + $0x248] sm:$0xff] %vm450_vm0, %v1267_v35 }
 0x100   : > { %1548 = vst.msk [vmem:[%s5822_s7 + $0x40] sm:$0xff] %vm450_vm0, %v942_v47  ;;  %1612 = vst.msk [vmem:[%s5822_s7 + $0x240] sm:$0xff] %vm450_vm0, %v1262_v51  ;;  %v4384_v55 = vpop.f32.mrb[10].mxu0  ;;  %v4480_v59 = vpop.f32.mrb[10].mxu1  ;;  %v5013_v51 = vld [vmem:[%s5179_s16 + $0x210] sm:$0xff] }
 0x101   : > { %v957_v63 = vadd.f32 %v4384_v55, %v5812_v12  ;;  %v1277_v3 = vadd.f32 %v4480_v59, %v5812_v12  ;;  %v951_v7 = vpop.f32.mrb[11].mxu0  ;;  %v1271_v11 = vpop.f32.mrb[11].mxu1  ;;  %4646 = vmatmul.mubr.msk.f32.gmra.mrb[116].mxu1 %vm450_vm0, %v5565_v61  ;;  %4846 = vmatmul.mubr.msk.f32.gmra.mrb[116].mxu0 %vm450_vm0, %v5565_v61 }
 0x102   : > { %v952_v16 = vadd.f32 %v5812_v12, %v951_v7  ;;  %v1272_v22 = vadd.f32 %v5812_v12, %v1271_v11  ;;  %4648 = vmatprep.mubr.msk.f32.mxu1 %vm450_vm0, %v5569_v5  ;;  %4848 = vmatprep.mubr.msk.f32.mxu0 %vm450_vm0, %v5569_v5 }
 0x103   : > { %1551 = vst.msk [vmem:[%s5822_s7 + $0x58] sm:$0xff] %vm450_vm0, %v957_v63  ;;  %1615 = vst.msk [vmem:[%s5822_s7 + $0x258] sm:$0xff] %vm450_vm0, %v1277_v3 }
 0x104   : > { %1550 = vst.msk [vmem:[%s5822_s7 + $0x50] sm:$0xff] %vm450_vm0, %v952_v16  ;;  %1614 = vst.msk [vmem:[%s5822_s7 + $0x250] sm:$0xff] %vm450_vm0, %v1272_v22  ;;  %v4387_v29 = vpop.f32.mrb[12].mxu0  ;;  %v4483_v37 = vpop.f32.mrb[12].mxu1  ;;  %v5014_v16 = vld [vmem:[%s5179_s16 + $0x218] sm:$0xff] }
 0x105   : > { %v967_v45 = vadd.f32 %v4387_v29, %v5812_v12  ;;  %v1287_v53 = vadd.f32 %v4483_v37, %v5812_v12  ;;  %v961_v61 = vpop.f32.mrb[13].mxu0  ;;  %v1281_v5 = vpop.f32.mrb[13].mxu1  ;;  %4649 = vmatmul.mubr.msk.f32.gmra.mrb[118].mxu1 %vm450_vm0, %v5579_v14  ;;  %4849 = vmatmul.mubr.msk.f32.gmra.mrb[118].mxu0 %vm450_vm0, %v5579_v14  ;;  %v5015_v37 = vld [vmem:[%s5179_s16 + $0x220] sm:$0xff] }
 0x106   : > { %v962_v25 = vadd.f32 %v5812_v12, %v961_v61  ;;  %v1282_v41 = vadd.f32 %v5812_v12, %v1281_v5  ;;  %4651 = vmatprep.mubr.msk.f32.mxu1 %vm450_vm0, %v7311_v33  ;;  %4851 = vmatprep.mubr.msk.f32.mxu0 %vm450_vm0, %v7311_v33  ;;  %v5016_v33 = vld [vmem:[%s5179_s16 + $0x228] sm:$0xff] }
 0x107   : > { %1553 = vst.msk [vmem:[%s5822_s7 + $0x68] sm:$0xff] %vm450_vm0, %v967_v45  ;;  %1617 = vst.msk [vmem:[%s5822_s7 + $0x268] sm:$0xff] %vm450_vm0, %v1287_v53 }
 0x108   : > { %1552 = vst.msk [vmem:[%s5822_s7 + $0x60] sm:$0xff] %vm450_vm0, %v962_v25  ;;  %1616 = vst.msk [vmem:[%s5822_s7 + $0x260] sm:$0xff] %vm450_vm0, %v1282_v41  ;;  %v4390_v14 = vpop.f32.mrb[14].mxu0  ;;  %v4486_v1 = vpop.f32.mrb[14].mxu1 }
 0x109   : > { %v977_v18 = vadd.f32 %v4390_v14, %v5812_v12  ;;  %v1297_v20 = vadd.f32 %v4486_v1, %v5812_v12  ;;  %v971_v24 = vpop.f32.mrb[15].mxu0  ;;  %v1291_v26 = vpop.f32.mrb[15].mxu1  ;;  %4652 = vmatmul.mubr.msk.f32.gmra.mrb[120].mxu1 %vm450_vm0, %v7312_v28  ;;  %4852 = vmatmul.mubr.msk.f32.gmra.mrb[120].mxu0 %vm450_vm0, %v7312_v28 }
 0x10a   : > { %v972_v30 = vadd.f32 %v5812_v12, %v971_v24  ;;  %v1292_v32 = vadd.f32 %v5812_v12, %v1291_v26  ;;  %4654 = vmatprep.mubr.msk.f32.mxu1 %vm450_vm0, %v7313_v34  ;;  %4854 = vmatprep.mubr.msk.f32.mxu0 %vm450_vm0, %v7313_v34  ;;  %v5018_v34 = vld [vmem:[%s5179_s16 + $0x238] sm:$0xff] }
 0x10b   : > { %1555 = vst.msk [vmem:[%s5822_s7 + $0x78] sm:$0xff] %vm450_vm0, %v977_v18  ;;  %1619 = vst.msk [vmem:[%s5822_s7 + $0x278] sm:$0xff] %vm450_vm0, %v1297_v20  ;;  %v5017_v18 = vld [vmem:[%s5179_s16 + $0x230] sm:$0xff] }
 0x10c   : > { %1554 = vst.msk [vmem:[%s5822_s7 + $0x70] sm:$0xff] %vm450_vm0, %v972_v30  ;;  %1618 = vst.msk [vmem:[%s5822_s7 + $0x270] sm:$0xff] %vm450_vm0, %v1292_v32  ;;  %v4393_v36 = vpop.f32.mrb[16].mxu0  ;;  %v4489_v38 = vpop.f32.mrb[16].mxu1 }
 0x10d   : > { %v987_v40 = vadd.f32 %v4393_v36, %v5812_v12  ;;  %v1307_v42 = vadd.f32 %v4489_v38, %v5812_v12  ;;  %v981_v44 = vpop.f32.mrb[17].mxu0  ;;  %v1301_v46 = vpop.f32.mrb[17].mxu1  ;;  %4655 = vmatmul.mubr.msk.f32.gmra.mrb[122].mxu1 %vm450_vm0, %v5607_v9  ;;  %4855 = vmatmul.mubr.msk.f32.gmra.mrb[122].mxu0 %vm450_vm0, %v5607_v9 }
 0x10e   : > { %v982_v48 = vadd.f32 %v5812_v12, %v981_v44  ;;  %v1302_v50 = vadd.f32 %v5812_v12, %v1301_v46  ;;  %4657 = vmatprep.mubr.msk.f32.mxu1 %vm450_vm0, %v7314_v52  ;;  %4857 = vmatprep.mubr.msk.f32.mxu0 %vm450_vm0, %v7314_v52 }
 0x10f   : > { %1557 = vst.msk [vmem:[%s5822_s7 + $0x88] sm:$0xff] %vm450_vm0, %v987_v40  ;;  %1621 = vst.msk [vmem:[%s5822_s7 + $0x288] sm:$0xff] %vm450_vm0, %v1307_v42  ;;  %v5019_v40 = vld [vmem:[%s5179_s16 + $0x240] sm:$0xff] }
 0x110   : > { %1556 = vst.msk [vmem:[%s5822_s7 + $0x80] sm:$0xff] %vm450_vm0, %v982_v48  ;;  %1620 = vst.msk [vmem:[%s5822_s7 + $0x280] sm:$0xff] %vm450_vm0, %v1302_v50  ;;  %v4396_v9 = vpop.f32.mrb[18].mxu0  ;;  %v4492_v54 = vpop.f32.mrb[18].mxu1 }
 0x111   : > { %v997_v56 = vadd.f32 %v4396_v9, %v5812_v12  ;;  %v1317_v58 = vadd.f32 %v4492_v54, %v5812_v12  ;;  %v991_v60 = vpop.f32.mrb[19].mxu0  ;;  %v1311_v62 = vpop.f32.mrb[19].mxu1  ;;  %4658 = vmatmul.mubr.msk.f32.gmra.mrb[124].mxu1 %vm450_vm0, %v5621_v49  ;;  %4858 = vmatmul.mubr.msk.f32.gmra.mrb[124].mxu0 %vm450_vm0, %v5621_v49  ;;  %v5020_v9 = vld [vmem:[%s5179_s16 + $0x248] sm:$0xff] }
 0x112   : > { %v992_v0 = vadd.f32 %v5812_v12, %v991_v60  ;;  %v1312_v2 = vadd.f32 %v5812_v12, %v1311_v62  ;;  %4660 = vmatprep.mubr.msk.f32.mxu1 %vm450_vm0, %v5625_v57  ;;  %4860 = vmatprep.mubr.msk.f32.mxu0 %vm450_vm0, %v5625_v57 }
 0x113   : > { %1559 = vst.msk [vmem:[%s5822_s7 + $0x98] sm:$0xff] %vm450_vm0, %v997_v56  ;;  %1623 = vst.msk [vmem:[%s5822_s7 + $0x298] sm:$0xff] %vm450_vm0, %v1317_v58  ;;  %v5021_v58 = vld [vmem:[%s5179_s16 + $0x250] sm:$0xff] }
 0x114   : > { %1558 = vst.msk [vmem:[%s5822_s7 + $0x90] sm:$0xff] %vm450_vm0, %v992_v0  ;;  %1622 = vst.msk [vmem:[%s5822_s7 + $0x290] sm:$0xff] %vm450_vm0, %v1312_v2  ;;  %v4399_v49 = vpop.f32.mrb[20].mxu0  ;;  %v4495_v4 = vpop.f32.mrb[20].mxu1 }
 0x115   : > { %v1007_v6 = vadd.f32 %v4399_v49, %v5812_v12  ;;  %v1327_v8 = vadd.f32 %v4495_v4, %v5812_v12  ;;  %v1001_v10 = vpop.f32.mrb[21].mxu0  ;;  %v1321_v57 = vpop.f32.mrb[21].mxu1  ;;  %4661 = vmatmul.mubr.msk.f32.gmra.mrb[126].mxu1 %vm450_vm0, %v5635_v19  ;;  %4861 = vmatmul.mubr.msk.f32.gmra.mrb[126].mxu0 %vm450_vm0, %v5635_v19 }
 0x116   : > { %v1002_v13 = vadd.f32 %v5812_v12, %v1001_v10  ;;  %v1322_v15 = vadd.f32 %v5812_v12, %v1321_v57  ;;  %4663 = vmatprep.mubr.msk.f32.mxu1 %vm450_vm0, %v5011_v17  ;;  %4863 = vmatprep.mubr.msk.f32.mxu0 %vm450_vm0, %v5011_v17  ;;  %v5023_v57 = vld [vmem:[%s5179_s16 + $0x260] sm:$0xff] }
 0x117   : > { %1561 = vst.msk [vmem:[%s5822_s7 + $0xa8] sm:$0xff] %vm450_vm0, %v1007_v6  ;;  %1625 = vst.msk [vmem:[%s5822_s7 + $0x2a8] sm:$0xff] %vm450_vm0, %v1327_v8  ;;  %v5022_v6 = vld [vmem:[%s5179_s16 + $0x258] sm:$0xff] }
 0x118   : > { %1560 = vst.msk [vmem:[%s5822_s7 + $0xa0] sm:$0xff] %vm450_vm0, %v1002_v13  ;;  %1624 = vst.msk [vmem:[%s5822_s7 + $0x2a0] sm:$0xff] %vm450_vm0, %v1322_v15  ;;  %v4402_v19 = vpop.f32.mrb[22].mxu0  ;;  %v4498_v21 = vpop.f32.mrb[22].mxu1 }
 0x119   : > { %v1017_v23 = vadd.f32 %v4402_v19, %v5812_v12  ;;  %v1337_v27 = vadd.f32 %v4498_v21, %v5812_v12  ;;  %v1011_v31 = vpop.f32.mrb[23].mxu0  ;;  %v1331_v35 = vpop.f32.mrb[23].mxu1  ;;  %4664 = vmatmul.mubr.msk.f32.gmra.mrb[128].mxu1 %vm450_vm0, %v5012_v39  ;;  %4864 = vmatmul.mubr.msk.f32.gmra.mrb[128].mxu0 %vm450_vm0, %v5012_v39  ;;  %v5025_v39 = vld [vmem:[%s5179_s16 + $0x270] sm:$0xff] }
 0x11a   : > { %v1012_v43 = vadd.f32 %v5812_v12, %v1011_v31  ;;  %v1332_v47 = vadd.f32 %v5812_v12, %v1331_v35  ;;  %4666 = vmatprep.mubr.msk.f32.mxu1 %vm450_vm0, %v5013_v51  ;;  %4866 = vmatprep.mubr.msk.f32.mxu0 %vm450_vm0, %v5013_v51 }
 0x11b   : > { %1563 = vst.msk [vmem:[%s5822_s7 + $0xb8] sm:$0xff] %vm450_vm0, %v1017_v23  ;;  %1627 = vst.msk [vmem:[%s5822_s7 + $0x2b8] sm:$0xff] %vm450_vm0, %v1337_v27  ;;  %v5024_v27 = vld [vmem:[%s5179_s16 + $0x268] sm:$0xff] }
 0x11c   : > { %1562 = vst.msk [vmem:[%s5822_s7 + $0xb0] sm:$0xff] %vm450_vm0, %v1012_v43  ;;  %1626 = vst.msk [vmem:[%s5822_s7 + $0x2b0] sm:$0xff] %vm450_vm0, %v1332_v47  ;;  %v4405_v55 = vpop.f32.mrb[24].mxu0  ;;  %v4501_v59 = vpop.f32.mrb[24].mxu1 }
 0x11d   : > { %v1027_v63 = vadd.f32 %v4405_v55, %v5812_v12  ;;  %v1347_v3 = vadd.f32 %v4501_v59, %v5812_v12  ;;  %v1021_v7 = vpop.f32.mrb[25].mxu0  ;;  %v1341_v11 = vpop.f32.mrb[25].mxu1  ;;  %4667 = vmatmul.mubr.msk.f32.gmra.mrb[130].mxu1 %vm450_vm0, %v5014_v16  ;;  %4867 = vmatmul.mubr.msk.f32.gmra.mrb[130].mxu0 %vm450_vm0, %v5014_v16  ;;  %v5027_v16 = vld [vmem:[%s5179_s16 + $0x280] sm:$0xff] }
 0x11e   : > { %v1022_v22 = vadd.f32 %v5812_v12, %v1021_v7  ;;  %v1342_v29 = vadd.f32 %v5812_v12, %v1341_v11  ;;  %4669 = vmatprep.mubr.msk.f32.mxu1 %vm450_vm0, %v5015_v37  ;;  %4869 = vmatprep.mubr.msk.f32.mxu0 %vm450_vm0, %v5015_v37 }
 0x11f   : > { %1565 = vst.msk [vmem:[%s5822_s7 + $0xc8] sm:$0xff] %vm450_vm0, %v1027_v63  ;;  %1629 = vst.msk [vmem:[%s5822_s7 + $0x2c8] sm:$0xff] %vm450_vm0, %v1347_v3  ;;  %v5026_v3 = vld [vmem:[%s5179_s16 + $0x278] sm:$0xff] }
 0x120   : > { %1564 = vst.msk [vmem:[%s5822_s7 + $0xc0] sm:$0xff] %vm450_vm0, %v1022_v22  ;;  %1628 = vst.msk [vmem:[%s5822_s7 + $0x2c0] sm:$0xff] %vm450_vm0, %v1342_v29  ;;  %v4408_v45 = vpop.f32.mrb[26].mxu0  ;;  %v4504_v53 = vpop.f32.mrb[26].mxu1 }
 0x121   : > { %v1037_v61 = vadd.f32 %v4408_v45, %v5812_v12  ;;  %v1357_v5 = vadd.f32 %v4504_v53, %v5812_v12  ;;  %v1031_v25 = vpop.f32.mrb[27].mxu0  ;;  %v1351_v41 = vpop.f32.mrb[27].mxu1  ;;  %4670 = vmatmul.mubr.msk.f32.gmra.mrb[132].mxu1 %vm450_vm0, %v5016_v33  ;;  %4870 = vmatmul.mubr.msk.f32.gmra.mrb[132].mxu0 %vm450_vm0, %v5016_v33  ;;  %v5029_v33 = vld [vmem:[%s5179_s16 + $0x290] sm:$0xff] }
 0x122   : > { %v1032_v14 = vadd.f32 %v5812_v12, %v1031_v25  ;;  %v1352_v1 = vadd.f32 %v5812_v12, %v1351_v41  ;;  %4672 = vmatprep.mubr.msk.f32.mxu1 %vm450_vm0, %v5017_v18  ;;  %4872 = vmatprep.mubr.msk.f32.mxu0 %vm450_vm0, %v5017_v18 }
 0x123   : > { %1567 = vst.msk [vmem:[%s5822_s7 + $0xd8] sm:$0xff] %vm450_vm0, %v1037_v61  ;;  %1631 = vst.msk [vmem:[%s5822_s7 + $0x2d8] sm:$0xff] %vm450_vm0, %v1357_v5  ;;  %v5028_v5 = vld [vmem:[%s5179_s16 + $0x288] sm:$0xff] }
 0x124   : > { %1566 = vst.msk [vmem:[%s5822_s7 + $0xd0] sm:$0xff] %vm450_vm0, %v1032_v14  ;;  %1630 = vst.msk [vmem:[%s5822_s7 + $0x2d0] sm:$0xff] %vm450_vm0, %v1352_v1  ;;  %v4411_v20 = vpop.f32.mrb[28].mxu0  ;;  %v4507_v24 = vpop.f32.mrb[28].mxu1 }
 0x125   : > { %v1047_v26 = vadd.f32 %v4411_v20, %v5812_v12  ;;  %v1367_v28 = vadd.f32 %v4507_v24, %v5812_v12  ;;  %v1041_v30 = vpop.f32.mrb[29].mxu0  ;;  %v1361_v32 = vpop.f32.mrb[29].mxu1  ;;  %4673 = vmatmul.mubr.msk.f32.gmra.mrb[134].mxu1 %vm450_vm0, %v5018_v34  ;;  %4873 = vmatmul.mubr.msk.f32.gmra.mrb[134].mxu0 %vm450_vm0, %v5018_v34  ;;  %v5031_v34 = vld [vmem:[%s5179_s16 + $0x2a0] sm:$0xff] }
 0x126   : > { %v1042_v36 = vadd.f32 %v5812_v12, %v1041_v30  ;;  %v1362_v38 = vadd.f32 %v5812_v12, %v1361_v32  ;;  %4675 = vmatprep.mubr.msk.f32.mxu1 %vm450_vm0, %v5019_v40  ;;  %4875 = vmatprep.mubr.msk.f32.mxu0 %vm450_vm0, %v5019_v40 }
 0x127   : > { %1569 = vst.msk [vmem:[%s5822_s7 + $0xe8] sm:$0xff] %vm450_vm0, %v1047_v26  ;;  %1633 = vst.msk [vmem:[%s5822_s7 + $0x2e8] sm:$0xff] %vm450_vm0, %v1367_v28  ;;  %v5030_v28 = vld [vmem:[%s5179_s16 + $0x298] sm:$0xff] }
 0x128   : > { %1568 = vst.msk [vmem:[%s5822_s7 + $0xe0] sm:$0xff] %vm450_vm0, %v1042_v36  ;;  %1632 = vst.msk [vmem:[%s5822_s7 + $0x2e0] sm:$0xff] %vm450_vm0, %v1362_v38  ;;  %v4414_v42 = vpop.f32.mrb[30].mxu0  ;;  %v4510_v44 = vpop.f32.mrb[30].mxu1 }
 0x129   : > { %v1057_v46 = vadd.f32 %v4414_v42, %v5812_v12  ;;  %v1377_v48 = vadd.f32 %v4510_v44, %v5812_v12  ;;  %v1051_v50 = vpop.f32.mrb[31].mxu0  ;;  %v1371_v52 = vpop.f32.mrb[31].mxu1  ;;  %4676 = vmatmul.mubr.msk.f32.gmra.mrb[136].mxu1 %vm450_vm0, %v5020_v9  ;;  %4876 = vmatmul.mubr.msk.f32.gmra.mrb[136].mxu0 %vm450_vm0, %v5020_v9  ;;  %v5033_v9 = vld [vmem:[%s5179_s16 + $0x2b0] sm:$0xff] }
 0x12a   : > { %v1052_v54 = vadd.f32 %v5812_v12, %v1051_v50  ;;  %v1372_v56 = vadd.f32 %v5812_v12, %v1371_v52  ;;  %4678 = vmatprep.mubr.msk.f32.mxu1 %vm450_vm0, %v5021_v58  ;;  %4878 = vmatprep.mubr.msk.f32.mxu0 %vm450_vm0, %v5021_v58 }
 0x12b   : > { %1571 = vst.msk [vmem:[%s5822_s7 + $0xf8] sm:$0xff] %vm450_vm0, %v1057_v46  ;;  %1635 = vst.msk [vmem:[%s5822_s7 + $0x2f8] sm:$0xff] %vm450_vm0, %v1377_v48  ;;  %v5032_v48 = vld [vmem:[%s5179_s16 + $0x2a8] sm:$0xff] }
 0x12c   : > { %1570 = vst.msk [vmem:[%s5822_s7 + $0xf0] sm:$0xff] %vm450_vm0, %v1052_v54  ;;  %1634 = vst.msk [vmem:[%s5822_s7 + $0x2f0] sm:$0xff] %vm450_vm0, %v1372_v56  ;;  %v4417_v60 = vpop.f32.mrb[32].mxu0  ;;  %v4513_v62 = vpop.f32.mrb[32].mxu1 }
 0x12d   : > { %v1067_v0 = vadd.f32 %v4417_v60, %v5812_v12  ;;  %v1387_v2 = vadd.f32 %v4513_v62, %v5812_v12  ;;  %v1061_v49 = vpop.f32.mrb[33].mxu0  ;;  %v1381_v4 = vpop.f32.mrb[33].mxu1  ;;  %4679 = vmatmul.mubr.msk.f32.gmra.mrb[138].mxu1 %vm450_vm0, %v5022_v6  ;;  %4879 = vmatmul.mubr.msk.f32.gmra.mrb[138].mxu0 %vm450_vm0, %v5022_v6  ;;  %v5035_v6 = vld [vmem:[%s5179_s16 + $0x2c0] sm:$0xff] }
 0x12e   : > { %v1062_v8 = vadd.f32 %v5812_v12, %v1061_v49  ;;  %v1382_v10 = vadd.f32 %v5812_v12, %v1381_v4  ;;  %4681 = vmatprep.mubr.msk.f32.mxu1 %vm450_vm0, %v5023_v57  ;;  %4881 = vmatprep.mubr.msk.f32.mxu0 %vm450_vm0, %v5023_v57 }
 0x12f   : > { %1573 = vst.msk [vmem:[%s5822_s7 + $0x108] sm:$0xff] %vm450_vm0, %v1067_v0  ;;  %1637 = vst.msk [vmem:[%s5822_s7 + $0x308] sm:$0xff] %vm450_vm0, %v1387_v2  ;;  %v5034_v2 = vld [vmem:[%s5179_s16 + $0x2b8] sm:$0xff] }
 0x130   : > { %1572 = vst.msk [vmem:[%s5822_s7 + $0x100] sm:$0xff] %vm450_vm0, %v1062_v8  ;;  %1636 = vst.msk [vmem:[%s5822_s7 + $0x300] sm:$0xff] %vm450_vm0, %v1382_v10  ;;  %v4420_v13 = vpop.f32.mrb[34].mxu0  ;;  %v4516_v15 = vpop.f32.mrb[34].mxu1 }
 0x131   : > { %v1077_v17 = vadd.f32 %v4420_v13, %v5812_v12  ;;  %v1397_v19 = vadd.f32 %v4516_v15, %v5812_v12  ;;  %v1071_v21 = vpop.f32.mrb[35].mxu0  ;;  %v1391_v23 = vpop.f32.mrb[35].mxu1  ;;  %4682 = vmatmul.mubr.msk.f32.gmra.mrb[140].mxu1 %vm450_vm0, %v5024_v27  ;;  %4882 = vmatmul.mubr.msk.f32.gmra.mrb[140].mxu0 %vm450_vm0, %v5024_v27  ;;  %v5037_v27 = vld [vmem:[%s5179_s16 + $0x2d0] sm:$0xff] }
 0x132   : > { %v1072_v31 = vadd.f32 %v5812_v12, %v1071_v21  ;;  %v1392_v35 = vadd.f32 %v5812_v12, %v1391_v23  ;;  %4684 = vmatprep.mubr.msk.f32.mxu1 %vm450_vm0, %v5025_v39  ;;  %4884 = vmatprep.mubr.msk.f32.mxu0 %vm450_vm0, %v5025_v39 }
 0x133   : > { %1575 = vst.msk [vmem:[%s5822_s7 + $0x118] sm:$0xff] %vm450_vm0, %v1077_v17  ;;  %1639 = vst.msk [vmem:[%s5822_s7 + $0x318] sm:$0xff] %vm450_vm0, %v1397_v19  ;;  %v5036_v19 = vld [vmem:[%s5179_s16 + $0x2c8] sm:$0xff] }
 0x134   : > { %1574 = vst.msk [vmem:[%s5822_s7 + $0x110] sm:$0xff] %vm450_vm0, %v1072_v31  ;;  %1638 = vst.msk [vmem:[%s5822_s7 + $0x310] sm:$0xff] %vm450_vm0, %v1392_v35  ;;  %v4423_v43 = vpop.f32.mrb[36].mxu0  ;;  %v4519_v47 = vpop.f32.mrb[36].mxu1 }
 0x135   : > { %v1087_v51 = vadd.f32 %v4423_v43, %v5812_v12  ;;  %v1407_v55 = vadd.f32 %v4519_v47, %v5812_v12  ;;  %v1081_v59 = vpop.f32.mrb[37].mxu0  ;;  %v1401_v63 = vpop.f32.mrb[37].mxu1  ;;  %4685 = vmatmul.mubr.msk.f32.gmra.mrb[142].mxu1 %vm450_vm0, %v5026_v3  ;;  %4885 = vmatmul.mubr.msk.f32.gmra.mrb[142].mxu0 %vm450_vm0, %v5026_v3  ;;  %v5039_v3 = vld [vmem:[%s5179_s16 + $0x2e0] sm:$0xff] }
 0x136   : > { %v1082_v7 = vadd.f32 %v5812_v12, %v1081_v59  ;;  %v1402_v11 = vadd.f32 %v5812_v12, %v1401_v63  ;;  %4687 = vmatprep.mubr.msk.f32.mxu1 %vm450_vm0, %v5027_v16  ;;  %4887 = vmatprep.mubr.msk.f32.mxu0 %vm450_vm0, %v5027_v16 }
 0x137   : > { %1577 = vst.msk [vmem:[%s5822_s7 + $0x128] sm:$0xff] %vm450_vm0, %v1087_v51  ;;  %1641 = vst.msk [vmem:[%s5822_s7 + $0x328] sm:$0xff] %vm450_vm0, %v1407_v55  ;;  %v5038_v55 = vld [vmem:[%s5179_s16 + $0x2d8] sm:$0xff] }
 0x138   : > { %1576 = vst.msk [vmem:[%s5822_s7 + $0x120] sm:$0xff] %vm450_vm0, %v1082_v7  ;;  %1640 = vst.msk [vmem:[%s5822_s7 + $0x320] sm:$0xff] %vm450_vm0, %v1402_v11  ;;  %v4426_v22 = vpop.f32.mrb[38].mxu0  ;;  %v4522_v29 = vpop.f32.mrb[38].mxu1 }
 0x139   : > { %v1097_v37 = vadd.f32 %v4426_v22, %v5812_v12  ;;  %v1417_v45 = vadd.f32 %v4522_v29, %v5812_v12  ;;  %v1091_v53 = vpop.f32.mrb[39].mxu0  ;;  %v1411_v61 = vpop.f32.mrb[39].mxu1  ;;  %4688 = vmatmul.mubr.msk.f32.gmra.mrb[144].mxu1 %vm450_vm0, %v5028_v5  ;;  %4888 = vmatmul.mubr.msk.f32.gmra.mrb[144].mxu0 %vm450_vm0, %v5028_v5  ;;  %v5041_v5 = vld [vmem:[%s5179_s16 + $0x2f0] sm:$0xff] }
 0x13a   : > { %v1092_v25 = vadd.f32 %v5812_v12, %v1091_v53  ;;  %v1412_v41 = vadd.f32 %v5812_v12, %v1411_v61  ;;  %4690 = vmatprep.mubr.msk.f32.mxu1 %vm450_vm0, %v5029_v33  ;;  %4890 = vmatprep.mubr.msk.f32.mxu0 %vm450_vm0, %v5029_v33 }
 0x13b   : > { %1579 = vst.msk [vmem:[%s5822_s7 + $0x138] sm:$0xff] %vm450_vm0, %v1097_v37  ;;  %1643 = vst.msk [vmem:[%s5822_s7 + $0x338] sm:$0xff] %vm450_vm0, %v1417_v45  ;;  %v5040_v45 = vld [vmem:[%s5179_s16 + $0x2e8] sm:$0xff] }
 0x13c   : > { %1578 = vst.msk [vmem:[%s5822_s7 + $0x130] sm:$0xff] %vm450_vm0, %v1092_v25  ;;  %1642 = vst.msk [vmem:[%s5822_s7 + $0x330] sm:$0xff] %vm450_vm0, %v1412_v41  ;;  %v4429_v14 = vpop.f32.mrb[40].mxu0  ;;  %v4525_v1 = vpop.f32.mrb[40].mxu1 }
 0x13d   : > { %v1107_v18 = vadd.f32 %v4429_v14, %v5812_v12  ;;  %v1427_v20 = vadd.f32 %v4525_v1, %v5812_v12  ;;  %v1101_v24 = vpop.f32.mrb[41].mxu0  ;;  %v1421_v26 = vpop.f32.mrb[41].mxu1  ;;  %4691 = vmatmul.mubr.msk.f32.gmra.mrb[146].mxu1 %vm450_vm0, %v5030_v28  ;;  %4891 = vmatmul.mubr.msk.f32.gmra.mrb[146].mxu0 %vm450_vm0, %v5030_v28  ;;  %v5043_v28 = vld [vmem:[%s5179_s16 + $0x300] sm:$0xff] }
 0x13e   : > { %v1102_v30 = vadd.f32 %v5812_v12, %v1101_v24  ;;  %v1422_v32 = vadd.f32 %v5812_v12, %v1421_v26  ;;  %4693 = vmatprep.mubr.msk.f32.mxu1 %vm450_vm0, %v5031_v34  ;;  %4893 = vmatprep.mubr.msk.f32.mxu0 %vm450_vm0, %v5031_v34 }
 0x13f   : > { %1581 = vst.msk [vmem:[%s5822_s7 + $0x148] sm:$0xff] %vm450_vm0, %v1107_v18  ;;  %1645 = vst.msk [vmem:[%s5822_s7 + $0x348] sm:$0xff] %vm450_vm0, %v1427_v20  ;;  %v5042_v20 = vld [vmem:[%s5179_s16 + $0x2f8] sm:$0xff] }
 0x140   : > { %1580 = vst.msk [vmem:[%s5822_s7 + $0x140] sm:$0xff] %vm450_vm0, %v1102_v30  ;;  %1644 = vst.msk [vmem:[%s5822_s7 + $0x340] sm:$0xff] %vm450_vm0, %v1422_v32  ;;  %v4432_v36 = vpop.f32.mrb[42].mxu0  ;;  %v4528_v38 = vpop.f32.mrb[42].mxu1 }
 0x141   : > { %v1117_v40 = vadd.f32 %v4432_v36, %v5812_v12  ;;  %v1437_v42 = vadd.f32 %v4528_v38, %v5812_v12  ;;  %v1111_v44 = vpop.f32.mrb[43].mxu0  ;;  %v1431_v46 = vpop.f32.mrb[43].mxu1  ;;  %4694 = vmatmul.mubr.msk.f32.gmra.mrb[148].mxu1 %vm450_vm0, %v5032_v48  ;;  %4894 = vmatmul.mubr.msk.f32.gmra.mrb[148].mxu0 %vm450_vm0, %v5032_v48  ;;  %v5045_v48 = vld [vmem:[%s5179_s16 + $0x310] sm:$0xff] }
 0x142   : > { %v1112_v50 = vadd.f32 %v5812_v12, %v1111_v44  ;;  %v1432_v52 = vadd.f32 %v5812_v12, %v1431_v46  ;;  %4696 = vmatprep.mubr.msk.f32.mxu1 %vm450_vm0, %v5033_v9  ;;  %4896 = vmatprep.mubr.msk.f32.mxu0 %vm450_vm0, %v5033_v9 }
 0x143   : > { %1583 = vst.msk [vmem:[%s5822_s7 + $0x158] sm:$0xff] %vm450_vm0, %v1117_v40  ;;  %1647 = vst.msk [vmem:[%s5822_s7 + $0x358] sm:$0xff] %vm450_vm0, %v1437_v42  ;;  %v5044_v42 = vld [vmem:[%s5179_s16 + $0x308] sm:$0xff] }
 0x144   : > { %1582 = vst.msk [vmem:[%s5822_s7 + $0x150] sm:$0xff] %vm450_vm0, %v1112_v50  ;;  %1646 = vst.msk [vmem:[%s5822_s7 + $0x350] sm:$0xff] %vm450_vm0, %v1432_v52  ;;  %v4435_v54 = vpop.f32.mrb[44].mxu0  ;;  %v4531_v56 = vpop.f32.mrb[44].mxu1 }
 0x145   : > { %v1127_v58 = vadd.f32 %v4435_v54, %v5812_v12  ;;  %v1447_v60 = vadd.f32 %v4531_v56, %v5812_v12  ;;  %v1121_v62 = vpop.f32.mrb[45].mxu0  ;;  %v1441_v0 = vpop.f32.mrb[45].mxu1  ;;  %4697 = vmatmul.mubr.msk.f32.gmra.mrb[150].mxu1 %vm450_vm0, %v5034_v2  ;;  %4897 = vmatmul.mubr.msk.f32.gmra.mrb[150].mxu0 %vm450_vm0, %v5034_v2  ;;  %v5047_v2 = vld [vmem:[%s5179_s16 + $0x320] sm:$0xff] }
 0x146   : > { %v1122_v49 = vadd.f32 %v5812_v12, %v1121_v62  ;;  %v1442_v4 = vadd.f32 %v5812_v12, %v1441_v0  ;;  %4699 = vmatprep.mubr.msk.f32.mxu1 %vm450_vm0, %v5035_v6  ;;  %4899 = vmatprep.mubr.msk.f32.mxu0 %vm450_vm0, %v5035_v6 }
 0x147   : > { %1585 = vst.msk [vmem:[%s5822_s7 + $0x168] sm:$0xff] %vm450_vm0, %v1127_v58  ;;  %1649 = vst.msk [vmem:[%s5822_s7 + $0x368] sm:$0xff] %vm450_vm0, %v1447_v60  ;;  %v5046_v60 = vld [vmem:[%s5179_s16 + $0x318] sm:$0xff] }
 0x148   : > { %1584 = vst.msk [vmem:[%s5822_s7 + $0x160] sm:$0xff] %vm450_vm0, %v1122_v49  ;;  %1648 = vst.msk [vmem:[%s5822_s7 + $0x360] sm:$0xff] %vm450_vm0, %v1442_v4  ;;  %v4438_v8 = vpop.f32.mrb[46].mxu0  ;;  %v4534_v10 = vpop.f32.mrb[46].mxu1 }
 0x149   : > { %v1137_v57 = vadd.f32 %v4438_v8, %v5812_v12  ;;  %v1457_v13 = vadd.f32 %v4534_v10, %v5812_v12  ;;  %v1131_v15 = vpop.f32.mrb[47].mxu0  ;;  %v1451_v17 = vpop.f32.mrb[47].mxu1  ;;  %4700 = vmatmul.mubr.msk.f32.gmra.mrb[152].mxu1 %vm450_vm0, %v5036_v19  ;;  %4900 = vmatmul.mubr.msk.f32.gmra.mrb[152].mxu0 %vm450_vm0, %v5036_v19  ;;  %v5049_v19 = vld [vmem:[%s5179_s16 + $0x330] sm:$0xff] }
 0x14a   : > { %v1132_v21 = vadd.f32 %v5812_v12, %v1131_v15  ;;  %v1452_v23 = vadd.f32 %v5812_v12, %v1451_v17  ;;  %4702 = vmatprep.mubr.msk.f32.mxu1 %vm450_vm0, %v5037_v27  ;;  %4902 = vmatprep.mubr.msk.f32.mxu0 %vm450_vm0, %v5037_v27 }
 0x14b   : > { %1587 = vst.msk [vmem:[%s5822_s7 + $0x178] sm:$0xff] %vm450_vm0, %v1137_v57  ;;  %1651 = vst.msk [vmem:[%s5822_s7 + $0x378] sm:$0xff] %vm450_vm0, %v1457_v13  ;;  %v5048_v13 = vld [vmem:[%s5179_s16 + $0x328] sm:$0xff] }
 0x14c   : > { %1586 = vst.msk [vmem:[%s5822_s7 + $0x170] sm:$0xff] %vm450_vm0, %v1132_v21  ;;  %1650 = vst.msk [vmem:[%s5822_s7 + $0x370] sm:$0xff] %vm450_vm0, %v1452_v23  ;;  %v4441_v31 = vpop.f32.mrb[48].mxu0  ;;  %v4537_v35 = vpop.f32.mrb[48].mxu1 }
 0x14d   : > { %v1147_v39 = vadd.f32 %v4441_v31, %v5812_v12  ;;  %v1467_v43 = vadd.f32 %v4537_v35, %v5812_v12  ;;  %v1141_v47 = vpop.f32.mrb[49].mxu0  ;;  %v1461_v51 = vpop.f32.mrb[49].mxu1  ;;  %4703 = vmatmul.mubr.msk.f32.gmra.mrb[154].mxu1 %vm450_vm0, %v5038_v55  ;;  %4903 = vmatmul.mubr.msk.f32.gmra.mrb[154].mxu0 %vm450_vm0, %v5038_v55  ;;  %v5051_v55 = vld [vmem:[%s5179_s16 + $0x340] sm:$0xff] }
 0x14e   : > { %v1142_v59 = vadd.f32 %v5812_v12, %v1141_v47  ;;  %v1462_v63 = vadd.f32 %v5812_v12, %v1461_v51  ;;  %4705 = vmatprep.mubr.msk.f32.mxu1 %vm450_vm0, %v5039_v3  ;;  %4905 = vmatprep.mubr.msk.f32.mxu0 %vm450_vm0, %v5039_v3 }
 0x14f   : > { %1589 = vst.msk [vmem:[%s5822_s7 + $0x188] sm:$0xff] %vm450_vm0, %v1147_v39  ;;  %1653 = vst.msk [vmem:[%s5822_s7 + $0x388] sm:$0xff] %vm450_vm0, %v1467_v43  ;;  %v5050_v43 = vld [vmem:[%s5179_s16 + $0x338] sm:$0xff] }
 0x150   : > { %1588 = vst.msk [vmem:[%s5822_s7 + $0x180] sm:$0xff] %vm450_vm0, %v1142_v59  ;;  %1652 = vst.msk [vmem:[%s5822_s7 + $0x380] sm:$0xff] %vm450_vm0, %v1462_v63  ;;  %v4444_v7 = vpop.f32.mrb[50].mxu0  ;;  %v4540_v11 = vpop.f32.mrb[50].mxu1 }
 0x151   : > { %v1157_v16 = vadd.f32 %v4444_v7, %v5812_v12  ;;  %v1477_v22 = vadd.f32 %v4540_v11, %v5812_v12  ;;  %v1151_v29 = vpop.f32.mrb[51].mxu0  ;;  %v1471_v37 = vpop.f32.mrb[51].mxu1  ;;  %4706 = vmatmul.mubr.msk.f32.gmra.mrb[156].mxu1 %vm450_vm0, %v5040_v45  ;;  %4906 = vmatmul.mubr.msk.f32.gmra.mrb[156].mxu0 %vm450_vm0, %v5040_v45  ;;  %v6413_v45 = vld [vmem:[%s7295_s2 + $0x1] ss:$0 sm:$0xff] }
 0x152   : > { %v1152_v53 = vadd.f32 %v5812_v12, %v1151_v29  ;;  %v1472_v61 = vadd.f32 %v5812_v12, %v1471_v37  ;;  %4708 = vmatprep.mubr.msk.f32.mxu1 %vm450_vm0, %v5041_v5  ;;  %4908 = vmatprep.mubr.msk.f32.mxu0 %vm450_vm0, %v5041_v5 }
 0x153   : > { %1591 = vst.msk [vmem:[%s5822_s7 + $0x198] sm:$0xff] %vm450_vm0, %v1157_v16  ;;  %1655 = vst.msk [vmem:[%s5822_s7 + $0x398] sm:$0xff] %vm450_vm0, %v1477_v22  ;;  %v5052_v22 = vld [vmem:[%s5179_s16 + $0x348] sm:$0xff] }
 0x154   : > { %1590 = vst.msk [vmem:[%s5822_s7 + $0x190] sm:$0xff] %vm450_vm0, %v1152_v53  ;;  %1654 = vst.msk [vmem:[%s5822_s7 + $0x390] sm:$0xff] %vm450_vm0, %v1472_v61  ;;  %v4447_v25 = vpop.f32.mrb[52].mxu0  ;;  %v4543_v41 = vpop.f32.mrb[52].mxu1  ;;  %v5053_v53 = vld [vmem:[%s5179_s16 + $0x350] sm:$0xff] }
 0x155   : > { %v1167_v33 = vadd.f32 %v4447_v25, %v5812_v12  ;;  %v1487_v14 = vadd.f32 %v4543_v41, %v5812_v12  ;;  %v1161_v1 = vpop.f32.mrb[53].mxu0  ;;  %v1481_v18 = vpop.f32.mrb[53].mxu1  ;;  %4709 = vmatmul.mubr.msk.f32.gmra.mrb[158].mxu1 %vm450_vm0, %v5042_v20  ;;  %4909 = vmatmul.mubr.msk.f32.gmra.mrb[158].mxu0 %vm450_vm0, %v5042_v20  ;;  %v6420_v61 = vld [vmem:[%s7295_s2 + $0x2] ss:$0 sm:$0xff] }
 0x156   : > { %v1162_v24 = vadd.f32 %v5812_v12, %v1161_v1  ;;  %v1482_v26 = vadd.f32 %v5812_v12, %v1481_v18  ;;  %4711 = vmatprep.mubr.msk.f32.mxu1 %vm450_vm0, %v5043_v28  ;;  %4911 = vmatprep.mubr.msk.f32.mxu0 %vm450_vm0, %v5043_v28 }
 0x157   : > { %1593 = vst.msk [vmem:[%s5822_s7 + $0x1a8] sm:$0xff] %vm450_vm0, %v1167_v33  ;;  %1657 = vst.msk [vmem:[%s5822_s7 + $0x3a8] sm:$0xff] %vm450_vm0, %v1487_v14  ;;  %v5054_v14 = vld [vmem:[%s5179_s16 + $0x358] sm:$0xff] }
 0x158   : > { %1592 = vst.msk [vmem:[%s5822_s7 + $0x1a0] sm:$0xff] %vm450_vm0, %v1162_v24  ;;  %1656 = vst.msk [vmem:[%s5822_s7 + $0x3a0] sm:$0xff] %vm450_vm0, %v1482_v26  ;;  %v4450_v30 = vpop.f32.mrb[54].mxu0  ;;  %v4546_v32 = vpop.f32.mrb[54].mxu1  ;;  %v5055_v24 = vld [vmem:[%s5179_s16 + $0x360] sm:$0xff] }
 0x159   : > { %v1177_v34 = vadd.f32 %v4450_v30, %v5812_v12  ;;  %v1497_v36 = vadd.f32 %v4546_v32, %v5812_v12  ;;  %v1171_v38 = vpop.f32.mrb[55].mxu0  ;;  %v1491_v40 = vpop.f32.mrb[55].mxu1  ;;  %4712 = vmatmul.mubr.msk.f32.gmra.mrb[160].mxu1 %vm450_vm0, %v5044_v42  ;;  %4912 = vmatmul.mubr.msk.f32.gmra.mrb[160].mxu0 %vm450_vm0, %v5044_v42 }
 0x15a   : > { %v1172_v44 = vadd.f32 %v5812_v12, %v1171_v38  ;;  %v1492_v46 = vadd.f32 %v5812_v12, %v1491_v40  ;;  %4714 = vmatprep.mubr.msk.f32.mxu1 %vm450_vm0, %v5045_v48  ;;  %4914 = vmatprep.mubr.msk.f32.mxu0 %vm450_vm0, %v5045_v48 }
 0x15b   : > { %1595 = vst.msk [vmem:[%s5822_s7 + $0x1b8] sm:$0xff] %vm450_vm0, %v1177_v34  ;;  %1659 = vst.msk [vmem:[%s5822_s7 + $0x3b8] sm:$0xff] %vm450_vm0, %v1497_v36  ;;  %v5056_v36 = vld [vmem:[%s5179_s16 + $0x368] sm:$0xff] }
 0x15c   : > { %1594 = vst.msk [vmem:[%s5822_s7 + $0x1b0] sm:$0xff] %vm450_vm0, %v1172_v44  ;;  %1658 = vst.msk [vmem:[%s5822_s7 + $0x3b0] sm:$0xff] %vm450_vm0, %v1492_v46  ;;  %v4453_v50 = vpop.f32.mrb[56].mxu0  ;;  %v4549_v52 = vpop.f32.mrb[56].mxu1  ;;  %v5057_v44 = vld [vmem:[%s5179_s16 + $0x370] sm:$0xff] }
 0x15d   : > { %v1187_v9 = vadd.f32 %v4453_v50, %v5812_v12  ;;  %v1507_v54 = vadd.f32 %v4549_v52, %v5812_v12  ;;  %v1181_v56 = vpop.f32.mrb[57].mxu0  ;;  %v1501_v58 = vpop.f32.mrb[57].mxu1  ;;  %4715 = vmatmul.mubr.msk.f32.gmra.mrb[162].mxu1 %vm450_vm0, %v5046_v60  ;;  %4915 = vmatmul.mubr.msk.f32.gmra.mrb[162].mxu0 %vm450_vm0, %v5046_v60 }
 0x15e   : > { %v1182_v62 = vadd.f32 %v5812_v12, %v1181_v56  ;;  %v1502_v0 = vadd.f32 %v5812_v12, %v1501_v58  ;;  %4717 = vmatprep.mubr.msk.f32.mxu1 %vm450_vm0, %v5047_v2  ;;  %4917 = vmatprep.mubr.msk.f32.mxu0 %vm450_vm0, %v5047_v2 }
 0x15f   : > { %1597 = vst.msk [vmem:[%s5822_s7 + $0x1c8] sm:$0xff] %vm450_vm0, %v1187_v9  ;;  %1661 = vst.msk [vmem:[%s5822_s7 + $0x3c8] sm:$0xff] %vm450_vm0, %v1507_v54  ;;  %v5058_v54 = vld [vmem:[%s5179_s16 + $0x378] sm:$0xff] }
 0x160   : > { %1596 = vst.msk [vmem:[%s5822_s7 + $0x1c0] sm:$0xff] %vm450_vm0, %v1182_v62  ;;  %1660 = vst.msk [vmem:[%s5822_s7 + $0x3c0] sm:$0xff] %vm450_vm0, %v1502_v0  ;;  %v4456_v49 = vpop.f32.mrb[58].mxu0  ;;  %v4552_v4 = vpop.f32.mrb[58].mxu1  ;;  %v5059_v62 = vld [vmem:[%s5179_s16 + $0x380] sm:$0xff] }
 0x161   : > { %v1197_v6 = vadd.f32 %v4456_v49, %v5812_v12  ;;  %v1517_v8 = vadd.f32 %v4552_v4, %v5812_v12  ;;  %v1191_v10 = vpop.f32.mrb[59].mxu0  ;;  %v1511_v57 = vpop.f32.mrb[59].mxu1  ;;  %4718 = vmatmul.mubr.msk.f32.gmra.mrb[164].mxu1 %vm450_vm0, %v5048_v13  ;;  %4918 = vmatmul.mubr.msk.f32.gmra.mrb[164].mxu0 %vm450_vm0, %v5048_v13 }
 0x162   : > { %v1192_v15 = vadd.f32 %v5812_v12, %v1191_v10  ;;  %v1512_v17 = vadd.f32 %v5812_v12, %v1511_v57  ;;  %4720 = vmatprep.mubr.msk.f32.mxu1 %vm450_vm0, %v5049_v19  ;;  %4920 = vmatprep.mubr.msk.f32.mxu0 %vm450_vm0, %v5049_v19 }
 0x163   : > { %1599 = vst.msk [vmem:[%s5822_s7 + $0x1d8] sm:$0xff] %vm450_vm0, %v1197_v6  ;;  %1663 = vst.msk [vmem:[%s5822_s7 + $0x3d8] sm:$0xff] %vm450_vm0, %v1517_v8  ;;  %v5060_v8 = vld [vmem:[%s5179_s16 + $0x388] sm:$0xff] }
 0x164   : > { %1598 = vst.msk [vmem:[%s5822_s7 + $0x1d0] sm:$0xff] %vm450_vm0, %v1192_v15  ;;  %1662 = vst.msk [vmem:[%s5822_s7 + $0x3d0] sm:$0xff] %vm450_vm0, %v1512_v17  ;;  %v4459_v21 = vpop.f32.mrb[60].mxu0  ;;  %v4555_v23 = vpop.f32.mrb[60].mxu1  ;;  %v5061_v15 = vld [vmem:[%s5179_s16 + $0x390] sm:$0xff] }
 0x165   : > { %v1207_v27 = vadd.f32 %v4459_v21, %v5812_v12  ;;  %v1527_v31 = vadd.f32 %v4555_v23, %v5812_v12  ;;  %v1201_v35 = vpop.f32.mrb[61].mxu0  ;;  %v1521_v39 = vpop.f32.mrb[61].mxu1  ;;  %4721 = vmatmul.mubr.msk.f32.gmra.mrb[166].mxu1 %vm450_vm0, %v5050_v43  ;;  %4921 = vmatmul.mubr.msk.f32.gmra.mrb[166].mxu0 %vm450_vm0, %v5050_v43 }
 0x166   : > { %v1202_v47 = vadd.f32 %v5812_v12, %v1201_v35  ;;  %v1522_v51 = vadd.f32 %v5812_v12, %v1521_v39  ;;  %4723 = vmatprep.mubr.msk.f32.mxu1 %vm450_vm0, %v5051_v55  ;;  %4923 = vmatprep.mubr.msk.f32.mxu0 %vm450_vm0, %v5051_v55 }
 0x167   : > { %1601 = vst.msk [vmem:[%s5822_s7 + $0x1e8] sm:$0xff] %vm450_vm0, %v1207_v27  ;;  %1665 = vst.msk [vmem:[%s5822_s7 + $0x3e8] sm:$0xff] %vm450_vm0, %v1527_v31  ;;  %v5062_v31 = vld [vmem:[%s5179_s16 + $0x398] sm:$0xff] }
 0x168   : > { %1600 = vst.msk [vmem:[%s5822_s7 + $0x1e0] sm:$0xff] %vm450_vm0, %v1202_v47  ;;  %1664 = vst.msk [vmem:[%s5822_s7 + $0x3e0] sm:$0xff] %vm450_vm0, %v1522_v51  ;;  %v4462_v59 = vpop.f32.mrb[62].mxu0  ;;  %v4558_v63 = vpop.f32.mrb[62].mxu1  ;;  %v5063_v47 = vld [vmem:[%s5179_s16 + $0x3a0] sm:$0xff] }
 0x169   : > { %v1217_v3 = vadd.f32 %v4462_v59, %v5812_v12  ;;  %v1537_v7 = vadd.f32 %v4558_v63, %v5812_v12  ;;  %v1211_v11 = vpop.f32.mrb[63].mxu0  ;;  %v1531_v16 = vpop.f32.mrb[63].mxu1  ;;  %4724 = vmatmul.mubr.msk.f32.gmra.mrb[168].mxu1 %vm450_vm0, %v5052_v22  ;;  %4924 = vmatmul.mubr.msk.f32.gmra.mrb[168].mxu0 %vm450_vm0, %v5052_v22 }
 0x16a   : > { %v1212_v29 = vadd.f32 %v5812_v12, %v1211_v11  ;;  %v1532_v37 = vadd.f32 %v5812_v12, %v1531_v16  ;;  %4726 = vmatprep.mubr.msk.f32.mxu1 %vm450_vm0, %v5053_v53  ;;  %4926 = vmatprep.mubr.msk.f32.mxu0 %vm450_vm0, %v5053_v53 }
 0x16b   : > { %1603 = vst.msk [vmem:[%s5822_s7 + $0x1f8] sm:$0xff] %vm450_vm0, %v1217_v3  ;;  %1667 = vst.msk [vmem:[%s5822_s7 + $0x3f8] sm:$0xff] %vm450_vm0, %v1537_v7  ;;  %v5064_v7 = vld [vmem:[%s5179_s16 + $0x3a8] sm:$0xff] }
 0x16c   : > { %1602 = vst.msk [vmem:[%s5822_s7 + $0x1f0] sm:$0xff] %vm450_vm0, %v1212_v29  ;;  %1666 = vst.msk [vmem:[%s5822_s7 + $0x3f0] sm:$0xff] %vm450_vm0, %v1532_v37  ;;  %v4569_v12 = vpop.f32.mrb[64].mxu1  ;;  %v4769_v5 = vpop.f32.mrb[64].mxu0  ;;  %v5065_v29 = vld [vmem:[%s5179_s16 + $0x3b0] sm:$0xff] }
 0x16d   : > { %v1753_v25 = vadd.f32 %v4569_v12, %v6413_v45  ;;  %v2599_v41 = vadd.f32 %v4769_v5, %v6420_v61  ;;  %v1747_v33 = vpop.f32.mrb[65].mxu1  ;;  %4727 = vmatmul.mubr.msk.f32.gmra.mrb[170].mxu1 %vm450_vm0, %v5054_v14  ;;  %v2593_v1 = vpop.f32.mrb[65].mxu0  ;;  %4927 = vmatmul.mubr.msk.f32.gmra.mrb[170].mxu0 %vm450_vm0, %v5054_v14 }
 0x16e   : > { %v1748_v18 = vadd.f32 %v6413_v45, %v1747_v33  ;;  %v2594_v20 = vadd.f32 %v6420_v61, %v2593_v1  ;;  %4729 = vmatprep.mubr.msk.f32.mxu1 %vm450_vm0, %v5055_v24  ;;  %4929 = vmatprep.mubr.msk.f32.mxu0 %vm450_vm0, %v5055_v24 }
 0x16f   : > { %2387 = vst.msk [vmem:[%s6435_s15 + $0x8] sm:$0xff] %vm450_vm0, %v1753_v25  ;;  %3233 = vst.msk [vmem:[%s6441_s22 + $0x8] sm:$0xff] %vm450_vm0, %v2599_v41  ;;  %v5066_v41 = vld [vmem:[%s5179_s16 + $0x3b8] sm:$0xff] }
 0x170   : > { %2386 = vst.msk [vmem:[%s6435_s15] sm:$0xff] %vm450_vm0, %v1748_v18  ;;  %3232 = vst.msk [vmem:[%s6441_s22] sm:$0xff] %vm450_vm0, %v2594_v20  ;;  %v4572_v26 = vpop.f32.mrb[66].mxu1  ;;  %v4772_v28 = vpop.f32.mrb[66].mxu0  ;;  %v5067_v18 = vld [vmem:[%s5179_s16 + $0x3c0] sm:$0xff] }
 0x171   : > { %v1763_v30 = vadd.f32 %v4572_v26, %v6413_v45  ;;  %v2609_v32 = vadd.f32 %v4772_v28, %v6420_v61  ;;  %v1757_v34 = vpop.f32.mrb[67].mxu1  ;;  %4730 = vmatmul.mubr.msk.f32.gmra.mrb[172].mxu1 %vm450_vm0, %v5056_v36  ;;  %v2603_v38 = vpop.f32.mrb[67].mxu0  ;;  %4930 = vmatmul.mubr.msk.f32.gmra.mrb[172].mxu0 %vm450_vm0, %v5056_v36 }
 0x172   : > { %v1758_v40 = vadd.f32 %v6413_v45, %v1757_v34  ;;  %v2604_v42 = vadd.f32 %v6420_v61, %v2603_v38  ;;  %4732 = vmatprep.mubr.msk.f32.mxu1 %vm450_vm0, %v5057_v44  ;;  %4932 = vmatprep.mubr.msk.f32.mxu0 %vm450_vm0, %v5057_v44 }
 0x173   : > { %2389 = vst.msk [vmem:[%s6435_s15 + $0x18] sm:$0xff] %vm450_vm0, %v1763_v30  ;;  %3235 = vst.msk [vmem:[%s6441_s22 + $0x18] sm:$0xff] %vm450_vm0, %v2609_v32  ;;  %v5068_v32 = vld [vmem:[%s5179_s16 + $0x3c8] sm:$0xff] }
 0x174   : > { %2388 = vst.msk [vmem:[%s6435_s15 + $0x10] sm:$0xff] %vm450_vm0, %v1758_v40  ;;  %3234 = vst.msk [vmem:[%s6441_s22 + $0x10] sm:$0xff] %vm450_vm0, %v2604_v42  ;;  %v4575_v46 = vpop.f32.mrb[68].mxu1  ;;  %v4775_v48 = vpop.f32.mrb[68].mxu0  ;;  %v5069_v40 = vld [vmem:[%s5179_s16 + $0x3d0] sm:$0xff] }
 0x175   : > { %v1773_v50 = vadd.f32 %v4575_v46, %v6413_v45  ;;  %v2619_v52 = vadd.f32 %v4775_v48, %v6420_v61  ;;  %v1767_v9 = vpop.f32.mrb[69].mxu1  ;;  %4733 = vmatmul.mubr.msk.f32.gmra.mrb[174].mxu1 %vm450_vm0, %v5058_v54  ;;  %v2613_v56 = vpop.f32.mrb[69].mxu0  ;;  %4933 = vmatmul.mubr.msk.f32.gmra.mrb[174].mxu0 %vm450_vm0, %v5058_v54 }
 0x176   : > { %v1768_v58 = vadd.f32 %v6413_v45, %v1767_v9  ;;  %v2614_v60 = vadd.f32 %v6420_v61, %v2613_v56  ;;  %4735 = vmatprep.mubr.msk.f32.mxu1 %vm450_vm0, %v5059_v62  ;;  %4935 = vmatprep.mubr.msk.f32.mxu0 %vm450_vm0, %v5059_v62 }
 0x177   : > { %2391 = vst.msk [vmem:[%s6435_s15 + $0x28] sm:$0xff] %vm450_vm0, %v1773_v50  ;;  %3237 = vst.msk [vmem:[%s6441_s22 + $0x28] sm:$0xff] %vm450_vm0, %v2619_v52  ;;  %v5070_v52 = vld [vmem:[%s5179_s16 + $0x3d8] sm:$0xff] }
 0x178   : > { %2390 = vst.msk [vmem:[%s6435_s15 + $0x20] sm:$0xff] %vm450_vm0, %v1768_v58  ;;  %3236 = vst.msk [vmem:[%s6441_s22 + $0x20] sm:$0xff] %vm450_vm0, %v2614_v60  ;;  %v4578_v0 = vpop.f32.mrb[70].mxu1  ;;  %v4778_v2 = vpop.f32.mrb[70].mxu0  ;;  %v5071_v58 = vld [vmem:[%s5179_s16 + $0x3e0] sm:$0xff] }
 0x179   : > { %v1783_v49 = vadd.f32 %v4578_v0, %v6413_v45  ;;  %v2629_v4 = vadd.f32 %v4778_v2, %v6420_v61  ;;  %v1777_v6 = vpop.f32.mrb[71].mxu1  ;;  %4736 = vmatmul.mubr.msk.f32.gmra.mrb[176].mxu1 %vm450_vm0, %v5060_v8  ;;  %v2623_v10 = vpop.f32.mrb[71].mxu0  ;;  %4936 = vmatmul.mubr.msk.f32.gmra.mrb[176].mxu0 %vm450_vm0, %v5060_v8 }
 0x17a   : > { %v1778_v57 = vadd.f32 %v6413_v45, %v1777_v6  ;;  %v2624_v13 = vadd.f32 %v6420_v61, %v2623_v10  ;;  %4738 = vmatprep.mubr.msk.f32.mxu1 %vm450_vm0, %v5061_v15  ;;  %4938 = vmatprep.mubr.msk.f32.mxu0 %vm450_vm0, %v5061_v15 }
 0x17b   : > { %2393 = vst.msk [vmem:[%s6435_s15 + $0x38] sm:$0xff] %vm450_vm0, %v1783_v49  ;;  %3239 = vst.msk [vmem:[%s6441_s22 + $0x38] sm:$0xff] %vm450_vm0, %v2629_v4  ;;  %v5072_v4 = vld [vmem:[%s5179_s16 + $0x3e8] sm:$0xff] }
 0x17c   : > { %2392 = vst.msk [vmem:[%s6435_s15 + $0x30] sm:$0xff] %vm450_vm0, %v1778_v57  ;;  %3238 = vst.msk [vmem:[%s6441_s22 + $0x30] sm:$0xff] %vm450_vm0, %v2624_v13  ;;  %v4581_v17 = vpop.f32.mrb[72].mxu1  ;;  %v4781_v19 = vpop.f32.mrb[72].mxu0  ;;  %v5073_v57 = vld [vmem:[%s5179_s16 + $0x3f0] sm:$0xff] }
 0x17d   : > { %v1793_v21 = vadd.f32 %v4581_v17, %v6413_v45  ;;  %v2639_v23 = vadd.f32 %v4781_v19, %v6420_v61  ;;  %v1787_v27 = vpop.f32.mrb[73].mxu1  ;;  %4739 = vmatmul.mubr.msk.f32.gmra.mrb[178].mxu1 %vm450_vm0, %v5062_v31  ;;  %v2633_v35 = vpop.f32.mrb[73].mxu0  ;;  %4939 = vmatmul.mubr.msk.f32.gmra.mrb[178].mxu0 %vm450_vm0, %v5062_v31 }
 0x17e   : > { %v1788_v39 = vadd.f32 %v6413_v45, %v1787_v27  ;;  %v2634_v43 = vadd.f32 %v6420_v61, %v2633_v35  ;;  %4741 = vmatprep.mubr.msk.f32.mxu1 %vm450_vm0, %v5063_v47  ;;  %4941 = vmatprep.mubr.msk.f32.mxu0 %vm450_vm0, %v5063_v47 }
 0x17f   : > { %2395 = vst.msk [vmem:[%s6435_s15 + $0x48] sm:$0xff] %vm450_vm0, %v1793_v21  ;;  %3241 = vst.msk [vmem:[%s6441_s22 + $0x48] sm:$0xff] %vm450_vm0, %v2639_v23  ;;  %v5074_v23 = vld [vmem:[%s5179_s16 + $0x3f8] sm:$0xff] }
 0x180   : > { %2394 = vst.msk [vmem:[%s6435_s15 + $0x40] sm:$0xff] %vm450_vm0, %v1788_v39  ;;  %3240 = vst.msk [vmem:[%s6441_s22 + $0x40] sm:$0xff] %vm450_vm0, %v2634_v43  ;;  %v4584_v51 = vpop.f32.mrb[74].mxu1  ;;  %v4784_v55 = vpop.f32.mrb[74].mxu0 }
 0x181   : > { %v1803_v59 = vadd.f32 %v4584_v51, %v6413_v45  ;;  %v2649_v63 = vadd.f32 %v4784_v55, %v6420_v61  ;;  %v1797_v3 = vpop.f32.mrb[75].mxu1  ;;  %4742 = vmatmul.mubr.msk.f32.gmra.mrb[180].mxu1 %vm450_vm0, %v5064_v7  ;;  %v2643_v11 = vpop.f32.mrb[75].mxu0  ;;  %4942 = vmatmul.mubr.msk.f32.gmra.mrb[180].mxu0 %vm450_vm0, %v5064_v7 }
 0x182   : > { %v1798_v16 = vadd.f32 %v6413_v45, %v1797_v3  ;;  %v2644_v22 = vadd.f32 %v6420_v61, %v2643_v11  ;;  %4744 = vmatprep.mubr.msk.f32.mxu1 %vm450_vm0, %v5065_v29  ;;  %4944 = vmatprep.mubr.msk.f32.mxu0 %vm450_vm0, %v5065_v29 }
 0x183   : > { %2397 = vst.msk [vmem:[%s6435_s15 + $0x58] sm:$0xff] %vm450_vm0, %v1803_v59  ;;  %3243 = vst.msk [vmem:[%s6441_s22 + $0x58] sm:$0xff] %vm450_vm0, %v2649_v63 }
 0x184   : > { %2396 = vst.msk [vmem:[%s6435_s15 + $0x50] sm:$0xff] %vm450_vm0, %v1798_v16  ;;  %3242 = vst.msk [vmem:[%s6441_s22 + $0x50] sm:$0xff] %vm450_vm0, %v2644_v22  ;;  %v4587_v37 = vpop.f32.mrb[76].mxu1  ;;  %v4787_v53 = vpop.f32.mrb[76].mxu0 }
 0x185   : > { %v1813_v12 = vadd.f32 %v4587_v37, %v6413_v45  ;;  %v2659_v5 = vadd.f32 %v4787_v53, %v6420_v61  ;;  %v1807_v25 = vpop.f32.mrb[77].mxu1  ;;  %4745 = vmatmul.mubr.msk.f32.gmra.mrb[182].mxu1 %vm450_vm0, %v5066_v41  ;;  %v2653_v33 = vpop.f32.mrb[77].mxu0  ;;  %4945 = vmatmul.mubr.msk.f32.gmra.mrb[182].mxu0 %vm450_vm0, %v5066_v41 }
 0x186   : > { %v1808_v14 = vadd.f32 %v6413_v45, %v1807_v25  ;;  %v2654_v1 = vadd.f32 %v6420_v61, %v2653_v33  ;;  %4747 = vmatprep.mubr.msk.f32.mxu1 %vm450_vm0, %v5067_v18  ;;  %4947 = vmatprep.mubr.msk.f32.mxu0 %vm450_vm0, %v5067_v18 }
 0x187   : > { %2399 = vst.msk [vmem:[%s6435_s15 + $0x68] sm:$0xff] %vm450_vm0, %v1813_v12  ;;  %3245 = vst.msk [vmem:[%s6441_s22 + $0x68] sm:$0xff] %vm450_vm0, %v2659_v5 }
 0x188   : > { %2398 = vst.msk [vmem:[%s6435_s15 + $0x60] sm:$0xff] %vm450_vm0, %v1808_v14  ;;  %3244 = vst.msk [vmem:[%s6441_s22 + $0x60] sm:$0xff] %vm450_vm0, %v2654_v1  ;;  %v4590_v20 = vpop.f32.mrb[78].mxu1  ;;  %v4790_v24 = vpop.f32.mrb[78].mxu0 }
 0x189   : > { %v1823_v26 = vadd.f32 %v4590_v20, %v6413_v45  ;;  %v2669_v28 = vadd.f32 %v4790_v24, %v6420_v61  ;;  %v1817_v30 = vpop.f32.mrb[79].mxu1  ;;  %4748 = vmatmul.mubr.msk.f32.gmra.mrb[184].mxu1 %vm450_vm0, %v5068_v32  ;;  %v2663_v34 = vpop.f32.mrb[79].mxu0  ;;  %4948 = vmatmul.mubr.msk.f32.gmra.mrb[184].mxu0 %vm450_vm0, %v5068_v32 }
 0x18a   : > { %v1818_v36 = vadd.f32 %v6413_v45, %v1817_v30  ;;  %v2664_v38 = vadd.f32 %v6420_v61, %v2663_v34  ;;  %4750 = vmatprep.mubr.msk.f32.mxu1 %vm450_vm0, %v5069_v40  ;;  %4950 = vmatprep.mubr.msk.f32.mxu0 %vm450_vm0, %v5069_v40 }
 0x18b   : > { %2401 = vst.msk [vmem:[%s6435_s15 + $0x78] sm:$0xff] %vm450_vm0, %v1823_v26  ;;  %3247 = vst.msk [vmem:[%s6441_s22 + $0x78] sm:$0xff] %vm450_vm0, %v2669_v28 }
 0x18c   : > { %2400 = vst.msk [vmem:[%s6435_s15 + $0x70] sm:$0xff] %vm450_vm0, %v1818_v36  ;;  %3246 = vst.msk [vmem:[%s6441_s22 + $0x70] sm:$0xff] %vm450_vm0, %v2664_v38  ;;  %v4593_v42 = vpop.f32.mrb[80].mxu1  ;;  %v4793_v44 = vpop.f32.mrb[80].mxu0 }
 0x18d   : > { %v1833_v46 = vadd.f32 %v4593_v42, %v6413_v45  ;;  %v2679_v48 = vadd.f32 %v4793_v44, %v6420_v61  ;;  %v1827_v50 = vpop.f32.mrb[81].mxu1  ;;  %4751 = vmatmul.mubr.msk.f32.gmra.mrb[186].mxu1 %vm450_vm0, %v5070_v52  ;;  %v2673_v9 = vpop.f32.mrb[81].mxu0  ;;  %4951 = vmatmul.mubr.msk.f32.gmra.mrb[186].mxu0 %vm450_vm0, %v5070_v52 }
 0x18e   : > { %v1828_v54 = vadd.f32 %v6413_v45, %v1827_v50  ;;  %v2674_v56 = vadd.f32 %v6420_v61, %v2673_v9  ;;  %4753 = vmatprep.mubr.msk.f32.mxu1 %vm450_vm0, %v5071_v58  ;;  %4953 = vmatprep.mubr.msk.f32.mxu0 %vm450_vm0, %v5071_v58 }
 0x18f   : > { %2403 = vst.msk [vmem:[%s6435_s15 + $0x88] sm:$0xff] %vm450_vm0, %v1833_v46  ;;  %3249 = vst.msk [vmem:[%s6441_s22 + $0x88] sm:$0xff] %vm450_vm0, %v2679_v48 }
 0x190   : > { %2402 = vst.msk [vmem:[%s6435_s15 + $0x80] sm:$0xff] %vm450_vm0, %v1828_v54  ;;  %3248 = vst.msk [vmem:[%s6441_s22 + $0x80] sm:$0xff] %vm450_vm0, %v2674_v56  ;;  %v4596_v60 = vpop.f32.mrb[82].mxu1  ;;  %v4796_v62 = vpop.f32.mrb[82].mxu0 }
 0x191   : > { %v1843_v0 = vadd.f32 %v4596_v60, %v6413_v45  ;;  %v2689_v2 = vadd.f32 %v4796_v62, %v6420_v61  ;;  %v1837_v49 = vpop.f32.mrb[83].mxu1  ;;  %4754 = vmatmul.mubr.msk.f32.gmra.mrb[188].mxu1 %vm450_vm0, %v5072_v4  ;;  %v2683_v6 = vpop.f32.mrb[83].mxu0  ;;  %4954 = vmatmul.mubr.msk.f32.gmra.mrb[188].mxu0 %vm450_vm0, %v5072_v4 }
 0x192   : > { %v1838_v8 = vadd.f32 %v6413_v45, %v1837_v49  ;;  %v2684_v10 = vadd.f32 %v6420_v61, %v2683_v6  ;;  %4756 = vmatprep.mubr.msk.f32.mxu1 %vm450_vm0, %v5073_v57  ;;  %4956 = vmatprep.mubr.msk.f32.mxu0 %vm450_vm0, %v5073_v57 }
 0x193   : > { %2405 = vst.msk [vmem:[%s6435_s15 + $0x98] sm:$0xff] %vm450_vm0, %v1843_v0  ;;  %3251 = vst.msk [vmem:[%s6441_s22 + $0x98] sm:$0xff] %vm450_vm0, %v2689_v2 }
 0x194   : > { %2404 = vst.msk [vmem:[%s6435_s15 + $0x90] sm:$0xff] %vm450_vm0, %v1838_v8  ;;  %3250 = vst.msk [vmem:[%s6441_s22 + $0x90] sm:$0xff] %vm450_vm0, %v2684_v10  ;;  %v4599_v13 = vpop.f32.mrb[84].mxu1  ;;  %v4799_v15 = vpop.f32.mrb[84].mxu0 }
 0x195   : > { %v1853_v17 = vadd.f32 %v4599_v13, %v6413_v45  ;;  %v2699_v19 = vadd.f32 %v4799_v15, %v6420_v61  ;;  %v1847_v21 = vpop.f32.mrb[85].mxu1  ;;  %4757 = vmatmul.mubr.msk.f32.gmra.mrb[190].mxu1 %vm450_vm0, %v5074_v23  ;;  %v2693_v27 = vpop.f32.mrb[85].mxu0  ;;  %4957 = vmatmul.mubr.msk.f32.gmra.mrb[190].mxu0 %vm450_vm0, %v5074_v23 }
 0x196   : > { %v1848_v31 = vadd.f32 %v6413_v45, %v1847_v21  ;;  %v2694_v35 = vadd.f32 %v6420_v61, %v2693_v27 }
 0x197   : > { %2407 = vst.msk [vmem:[%s6435_s15 + $0xa8] sm:$0xff] %vm450_vm0, %v1853_v17  ;;  %3253 = vst.msk [vmem:[%s6441_s22 + $0xa8] sm:$0xff] %vm450_vm0, %v2699_v19 }
 0x198   : > { %2406 = vst.msk [vmem:[%s6435_s15 + $0xa0] sm:$0xff] %vm450_vm0, %v1848_v31  ;;  %3252 = vst.msk [vmem:[%s6441_s22 + $0xa0] sm:$0xff] %vm450_vm0, %v2694_v35  ;;  %v4602_v39 = vpop.f32.mrb[86].mxu1  ;;  %v4802_v43 = vpop.f32.mrb[86].mxu0 }
 0x199   : > { %v1863_v47 = vadd.f32 %v4602_v39, %v6413_v45  ;;  %v2709_v51 = vadd.f32 %v4802_v43, %v6420_v61  ;;  %v1857_v55 = vpop.f32.mrb[87].mxu1  ;;  %v2703_v59 = vpop.f32.mrb[87].mxu0 }
 0x19a   : > { %v1858_v63 = vadd.f32 %v6413_v45, %v1857_v55  ;;  %v2704_v3 = vadd.f32 %v6420_v61, %v2703_v59 }
 0x19b   : > { %2409 = vst.msk [vmem:[%s6435_s15 + $0xb8] sm:$0xff] %vm450_vm0, %v1863_v47  ;;  %3255 = vst.msk [vmem:[%s6441_s22 + $0xb8] sm:$0xff] %vm450_vm0, %v2709_v51 }
 0x19c   : > { %2408 = vst.msk [vmem:[%s6435_s15 + $0xb0] sm:$0xff] %vm450_vm0, %v1858_v63  ;;  %3254 = vst.msk [vmem:[%s6441_s22 + $0xb0] sm:$0xff] %vm450_vm0, %v2704_v3  ;;  %v4605_v7 = vpop.f32.mrb[88].mxu1  ;;  %v4805_v11 = vpop.f32.mrb[88].mxu0 }
 0x19d   : > { %v1873_v16 = vadd.f32 %v4605_v7, %v6413_v45  ;;  %v2719_v22 = vadd.f32 %v4805_v11, %v6420_v61  ;;  %v1867_v29 = vpop.f32.mrb[89].mxu1  ;;  %v2713_v37 = vpop.f32.mrb[89].mxu0 }
 0x19e   : > { %v1868_v53 = vadd.f32 %v6413_v45, %v1867_v29  ;;  %v2714_v12 = vadd.f32 %v6420_v61, %v2713_v37 }
 0x19f   : > { %2411 = vst.msk [vmem:[%s6435_s15 + $0xc8] sm:$0xff] %vm450_vm0, %v1873_v16  ;;  %3257 = vst.msk [vmem:[%s6441_s22 + $0xc8] sm:$0xff] %vm450_vm0, %v2719_v22 }
 0x1a0   : > { %2410 = vst.msk [vmem:[%s6435_s15 + $0xc0] sm:$0xff] %vm450_vm0, %v1868_v53  ;;  %3256 = vst.msk [vmem:[%s6441_s22 + $0xc0] sm:$0xff] %vm450_vm0, %v2714_v12  ;;  %v4608_v5 = vpop.f32.mrb[90].mxu1  ;;  %v4808_v25 = vpop.f32.mrb[90].mxu0 }
 0x1a1   : > { %v1883_v41 = vadd.f32 %v4608_v5, %v6413_v45  ;;  %v2729_v33 = vadd.f32 %v4808_v25, %v6420_v61  ;;  %v1877_v14 = vpop.f32.mrb[91].mxu1  ;;  %v2723_v1 = vpop.f32.mrb[91].mxu0 }
 0x1a2   : > { %v1878_v18 = vadd.f32 %v6413_v45, %v1877_v14  ;;  %v2724_v20 = vadd.f32 %v6420_v61, %v2723_v1 }
 0x1a3   : > { %2413 = vst.msk [vmem:[%s6435_s15 + $0xd8] sm:$0xff] %vm450_vm0, %v1883_v41  ;;  %3259 = vst.msk [vmem:[%s6441_s22 + $0xd8] sm:$0xff] %vm450_vm0, %v2729_v33 }
 0x1a4   : > { %2412 = vst.msk [vmem:[%s6435_s15 + $0xd0] sm:$0xff] %vm450_vm0, %v1878_v18  ;;  %3258 = vst.msk [vmem:[%s6441_s22 + $0xd0] sm:$0xff] %vm450_vm0, %v2724_v20  ;;  %v4611_v24 = vpop.f32.mrb[92].mxu1  ;;  %v4811_v26 = vpop.f32.mrb[92].mxu0 }
 0x1a5   : > { %v1893_v28 = vadd.f32 %v4611_v24, %v6413_v45  ;;  %v2739_v30 = vadd.f32 %v4811_v26, %v6420_v61  ;;  %v1887_v32 = vpop.f32.mrb[93].mxu1  ;;  %v2733_v34 = vpop.f32.mrb[93].mxu0 }
 0x1a6   : > { %v1888_v36 = vadd.f32 %v6413_v45, %v1887_v32  ;;  %v2734_v38 = vadd.f32 %v6420_v61, %v2733_v34 }
 0x1a7   : > { %2415 = vst.msk [vmem:[%s6435_s15 + $0xe8] sm:$0xff] %vm450_vm0, %v1893_v28  ;;  %3261 = vst.msk [vmem:[%s6441_s22 + $0xe8] sm:$0xff] %vm450_vm0, %v2739_v30 }
 0x1a8   : > { %2414 = vst.msk [vmem:[%s6435_s15 + $0xe0] sm:$0xff] %vm450_vm0, %v1888_v36  ;;  %3260 = vst.msk [vmem:[%s6441_s22 + $0xe0] sm:$0xff] %vm450_vm0, %v2734_v38  ;;  %v4614_v40 = vpop.f32.mrb[94].mxu1  ;;  %v4814_v42 = vpop.f32.mrb[94].mxu0 }
 0x1a9   : > { %v1903_v44 = vadd.f32 %v4614_v40, %v6413_v45  ;;  %v2749_v46 = vadd.f32 %v4814_v42, %v6420_v61  ;;  %v1897_v48 = vpop.f32.mrb[95].mxu1  ;;  %v2743_v50 = vpop.f32.mrb[95].mxu0 }
 0x1aa   : > { %v1898_v52 = vadd.f32 %v6413_v45, %v1897_v48  ;;  %v2744_v9 = vadd.f32 %v6420_v61, %v2743_v50 }
 0x1ab   : > { %2417 = vst.msk [vmem:[%s6435_s15 + $0xf8] sm:$0xff] %vm450_vm0, %v1903_v44  ;;  %3263 = vst.msk [vmem:[%s6441_s22 + $0xf8] sm:$0xff] %vm450_vm0, %v2749_v46 }
 0x1ac   : > { %2416 = vst.msk [vmem:[%s6435_s15 + $0xf0] sm:$0xff] %vm450_vm0, %v1898_v52  ;;  %3262 = vst.msk [vmem:[%s6441_s22 + $0xf0] sm:$0xff] %vm450_vm0, %v2744_v9  ;;  %v4617_v54 = vpop.f32.mrb[96].mxu1  ;;  %v4817_v56 = vpop.f32.mrb[96].mxu0 }
 0x1ad   : > { %v1913_v58 = vadd.f32 %v4617_v54, %v6413_v45  ;;  %v2759_v60 = vadd.f32 %v4817_v56, %v6420_v61  ;;  %v1907_v62 = vpop.f32.mrb[97].mxu1  ;;  %v2753_v0 = vpop.f32.mrb[97].mxu0 }
 0x1ae   : > { %v1908_v2 = vadd.f32 %v6413_v45, %v1907_v62  ;;  %v2754_v49 = vadd.f32 %v6420_v61, %v2753_v0 }
 0x1af   : > { %2419 = vst.msk [vmem:[%s6435_s15 + $0x108] sm:$0xff] %vm450_vm0, %v1913_v58  ;;  %3265 = vst.msk [vmem:[%s6441_s22 + $0x108] sm:$0xff] %vm450_vm0, %v2759_v60 }
 0x1b0   : > { %2418 = vst.msk [vmem:[%s6435_s15 + $0x100] sm:$0xff] %vm450_vm0, %v1908_v2  ;;  %3264 = vst.msk [vmem:[%s6441_s22 + $0x100] sm:$0xff] %vm450_vm0, %v2754_v49  ;;  %v4620_v4 = vpop.f32.mrb[98].mxu1  ;;  %v4820_v6 = vpop.f32.mrb[98].mxu0 }
 0x1b1   : > { %v1923_v8 = vadd.f32 %v4620_v4, %v6413_v45  ;;  %v2769_v10 = vadd.f32 %v4820_v6, %v6420_v61  ;;  %v1917_v57 = vpop.f32.mrb[99].mxu1  ;;  %v2763_v13 = vpop.f32.mrb[99].mxu0 }
 0x1b2   : > { %v1918_v15 = vadd.f32 %v6413_v45, %v1917_v57  ;;  %v2764_v17 = vadd.f32 %v6420_v61, %v2763_v13 }
 0x1b3   : > { %2421 = vst.msk [vmem:[%s6435_s15 + $0x118] sm:$0xff] %vm450_vm0, %v1923_v8  ;;  %3267 = vst.msk [vmem:[%s6441_s22 + $0x118] sm:$0xff] %vm450_vm0, %v2769_v10 }
 0x1b4   : > { %2420 = vst.msk [vmem:[%s6435_s15 + $0x110] sm:$0xff] %vm450_vm0, %v1918_v15  ;;  %3266 = vst.msk [vmem:[%s6441_s22 + $0x110] sm:$0xff] %vm450_vm0, %v2764_v17  ;;  %v4623_v19 = vpop.f32.mrb[100].mxu1  ;;  %v4823_v21 = vpop.f32.mrb[100].mxu0 }
 0x1b5   : > { %v1933_v23 = vadd.f32 %v4623_v19, %v6413_v45  ;;  %v2779_v27 = vadd.f32 %v4823_v21, %v6420_v61  ;;  %v1927_v31 = vpop.f32.mrb[101].mxu1  ;;  %v2773_v35 = vpop.f32.mrb[101].mxu0 }
 0x1b6   : > { %v1928_v39 = vadd.f32 %v6413_v45, %v1927_v31  ;;  %v2774_v43 = vadd.f32 %v6420_v61, %v2773_v35 }
 0x1b7   : > { %2423 = vst.msk [vmem:[%s6435_s15 + $0x128] sm:$0xff] %vm450_vm0, %v1933_v23  ;;  %3269 = vst.msk [vmem:[%s6441_s22 + $0x128] sm:$0xff] %vm450_vm0, %v2779_v27 }
 0x1b8   : > { %2422 = vst.msk [vmem:[%s6435_s15 + $0x120] sm:$0xff] %vm450_vm0, %v1928_v39  ;;  %3268 = vst.msk [vmem:[%s6441_s22 + $0x120] sm:$0xff] %vm450_vm0, %v2774_v43  ;;  %v4626_v47 = vpop.f32.mrb[102].mxu1  ;;  %v4826_v51 = vpop.f32.mrb[102].mxu0 }
 0x1b9   : > { %v1943_v55 = vadd.f32 %v4626_v47, %v6413_v45  ;;  %v2789_v59 = vadd.f32 %v4826_v51, %v6420_v61  ;;  %v1937_v63 = vpop.f32.mrb[103].mxu1  ;;  %v2783_v3 = vpop.f32.mrb[103].mxu0 }
 0x1ba   : > { %v1938_v7 = vadd.f32 %v6413_v45, %v1937_v63  ;;  %v2784_v11 = vadd.f32 %v6420_v61, %v2783_v3 }
 0x1bb   : > { %2425 = vst.msk [vmem:[%s6435_s15 + $0x138] sm:$0xff] %vm450_vm0, %v1943_v55  ;;  %3271 = vst.msk [vmem:[%s6441_s22 + $0x138] sm:$0xff] %vm450_vm0, %v2789_v59 }
 0x1bc   : > { %2424 = vst.msk [vmem:[%s6435_s15 + $0x130] sm:$0xff] %vm450_vm0, %v1938_v7  ;;  %3270 = vst.msk [vmem:[%s6441_s22 + $0x130] sm:$0xff] %vm450_vm0, %v2784_v11  ;;  %v4629_v16 = vpop.f32.mrb[104].mxu1  ;;  %v4829_v22 = vpop.f32.mrb[104].mxu0 }
 0x1bd   : > { %v1953_v29 = vadd.f32 %v4629_v16, %v6413_v45  ;;  %v2799_v37 = vadd.f32 %v4829_v22, %v6420_v61  ;;  %v1947_v53 = vpop.f32.mrb[105].mxu1  ;;  %v2793_v12 = vpop.f32.mrb[105].mxu0 }
 0x1be   : > { %v1948_v5 = vadd.f32 %v6413_v45, %v1947_v53  ;;  %v2794_v25 = vadd.f32 %v6420_v61, %v2793_v12 }
 0x1bf   : > { %2427 = vst.msk [vmem:[%s6435_s15 + $0x148] sm:$0xff] %vm450_vm0, %v1953_v29  ;;  %3273 = vst.msk [vmem:[%s6441_s22 + $0x148] sm:$0xff] %vm450_vm0, %v2799_v37 }
 0x1c0   : > { %2426 = vst.msk [vmem:[%s6435_s15 + $0x140] sm:$0xff] %vm450_vm0, %v1948_v5  ;;  %3272 = vst.msk [vmem:[%s6441_s22 + $0x140] sm:$0xff] %vm450_vm0, %v2794_v25  ;;  %v4632_v41 = vpop.f32.mrb[106].mxu1  ;;  %v4832_v33 = vpop.f32.mrb[106].mxu0 }
 0x1c1   : > { %v1963_v14 = vadd.f32 %v4632_v41, %v6413_v45  ;;  %v2809_v1 = vadd.f32 %v4832_v33, %v6420_v61  ;;  %v1957_v18 = vpop.f32.mrb[107].mxu1  ;;  %v2803_v20 = vpop.f32.mrb[107].mxu0 }
 0x1c2   : > { %v1958_v24 = vadd.f32 %v6413_v45, %v1957_v18  ;;  %v2804_v26 = vadd.f32 %v6420_v61, %v2803_v20 }
 0x1c3   : > { %2429 = vst.msk [vmem:[%s6435_s15 + $0x158] sm:$0xff] %vm450_vm0, %v1963_v14  ;;  %3275 = vst.msk [vmem:[%s6441_s22 + $0x158] sm:$0xff] %vm450_vm0, %v2809_v1 }
 0x1c4   : > { %2428 = vst.msk [vmem:[%s6435_s15 + $0x150] sm:$0xff] %vm450_vm0, %v1958_v24  ;;  %3274 = vst.msk [vmem:[%s6441_s22 + $0x150] sm:$0xff] %vm450_vm0, %v2804_v26  ;;  %v4635_v28 = vpop.f32.mrb[108].mxu1  ;;  %v4835_v30 = vpop.f32.mrb[108].mxu0 }
 0x1c5   : > { %v1973_v32 = vadd.f32 %v4635_v28, %v6413_v45  ;;  %v2819_v34 = vadd.f32 %v4835_v30, %v6420_v61  ;;  %v1967_v36 = vpop.f32.mrb[109].mxu1  ;;  %v2813_v38 = vpop.f32.mrb[109].mxu0 }
 0x1c6   : > { %v1968_v40 = vadd.f32 %v6413_v45, %v1967_v36  ;;  %v2814_v42 = vadd.f32 %v6420_v61, %v2813_v38 }
 0x1c7   : > { %2431 = vst.msk [vmem:[%s6435_s15 + $0x168] sm:$0xff] %vm450_vm0, %v1973_v32  ;;  %3277 = vst.msk [vmem:[%s6441_s22 + $0x168] sm:$0xff] %vm450_vm0, %v2819_v34 }
 0x1c8   : > { %2430 = vst.msk [vmem:[%s6435_s15 + $0x160] sm:$0xff] %vm450_vm0, %v1968_v40  ;;  %3276 = vst.msk [vmem:[%s6441_s22 + $0x160] sm:$0xff] %vm450_vm0, %v2814_v42  ;;  %v4638_v44 = vpop.f32.mrb[110].mxu1  ;;  %v4838_v46 = vpop.f32.mrb[110].mxu0 }
 0x1c9   : > { %v1983_v48 = vadd.f32 %v4638_v44, %v6413_v45  ;;  %v2829_v50 = vadd.f32 %v4838_v46, %v6420_v61  ;;  %v1977_v52 = vpop.f32.mrb[111].mxu1  ;;  %v2823_v9 = vpop.f32.mrb[111].mxu0 }
 0x1ca   : > { %v1978_v54 = vadd.f32 %v6413_v45, %v1977_v52  ;;  %v2824_v56 = vadd.f32 %v6420_v61, %v2823_v9 }
 0x1cb   : > { %2433 = vst.msk [vmem:[%s6435_s15 + $0x178] sm:$0xff] %vm450_vm0, %v1983_v48  ;;  %3279 = vst.msk [vmem:[%s6441_s22 + $0x178] sm:$0xff] %vm450_vm0, %v2829_v50 }
 0x1cc   : > { %2432 = vst.msk [vmem:[%s6435_s15 + $0x170] sm:$0xff] %vm450_vm0, %v1978_v54  ;;  %3278 = vst.msk [vmem:[%s6441_s22 + $0x170] sm:$0xff] %vm450_vm0, %v2824_v56  ;;  %v4641_v58 = vpop.f32.mrb[112].mxu1  ;;  %v4841_v60 = vpop.f32.mrb[112].mxu0 }
 0x1cd   : > { %v1993_v62 = vadd.f32 %v4641_v58, %v6413_v45  ;;  %v2839_v0 = vadd.f32 %v4841_v60, %v6420_v61  ;;  %v1987_v2 = vpop.f32.mrb[113].mxu1  ;;  %v2833_v49 = vpop.f32.mrb[113].mxu0 }
 0x1ce   : > { %v1988_v4 = vadd.f32 %v6413_v45, %v1987_v2  ;;  %v2834_v6 = vadd.f32 %v6420_v61, %v2833_v49 }
 0x1cf   : > { %2435 = vst.msk [vmem:[%s6435_s15 + $0x188] sm:$0xff] %vm450_vm0, %v1993_v62  ;;  %3281 = vst.msk [vmem:[%s6441_s22 + $0x188] sm:$0xff] %vm450_vm0, %v2839_v0 }
 0x1d0   : > { %2434 = vst.msk [vmem:[%s6435_s15 + $0x180] sm:$0xff] %vm450_vm0, %v1988_v4  ;;  %3280 = vst.msk [vmem:[%s6441_s22 + $0x180] sm:$0xff] %vm450_vm0, %v2834_v6  ;;  %v4644_v8 = vpop.f32.mrb[114].mxu1  ;;  %v4844_v10 = vpop.f32.mrb[114].mxu0 }
 0x1d1   : > { %v2003_v57 = vadd.f32 %v4644_v8, %v6413_v45  ;;  %v2849_v13 = vadd.f32 %v4844_v10, %v6420_v61  ;;  %v1997_v15 = vpop.f32.mrb[115].mxu1  ;;  %v2843_v17 = vpop.f32.mrb[115].mxu0 }
 0x1d2   : > { %v1998_v19 = vadd.f32 %v6413_v45, %v1997_v15  ;;  %v2844_v21 = vadd.f32 %v6420_v61, %v2843_v17 }
 0x1d3   : > { %2437 = vst.msk [vmem:[%s6435_s15 + $0x198] sm:$0xff] %vm450_vm0, %v2003_v57  ;;  %3283 = vst.msk [vmem:[%s6441_s22 + $0x198] sm:$0xff] %vm450_vm0, %v2849_v13 }
 0x1d4   : > { %2436 = vst.msk [vmem:[%s6435_s15 + $0x190] sm:$0xff] %vm450_vm0, %v1998_v19  ;;  %3282 = vst.msk [vmem:[%s6441_s22 + $0x190] sm:$0xff] %vm450_vm0, %v2844_v21  ;;  %v4647_v23 = vpop.f32.mrb[116].mxu1  ;;  %v4847_v27 = vpop.f32.mrb[116].mxu0 }
 0x1d5   : > { %v2013_v31 = vadd.f32 %v4647_v23, %v6413_v45  ;;  %v2859_v35 = vadd.f32 %v4847_v27, %v6420_v61  ;;  %v2007_v39 = vpop.f32.mrb[117].mxu1  ;;  %v2853_v43 = vpop.f32.mrb[117].mxu0 }
 0x1d6   : > { %v2008_v47 = vadd.f32 %v6413_v45, %v2007_v39  ;;  %v2854_v51 = vadd.f32 %v6420_v61, %v2853_v43 }
 0x1d7   : > { %2439 = vst.msk [vmem:[%s6435_s15 + $0x1a8] sm:$0xff] %vm450_vm0, %v2013_v31  ;;  %3285 = vst.msk [vmem:[%s6441_s22 + $0x1a8] sm:$0xff] %vm450_vm0, %v2859_v35 }
 0x1d8   : > { %2438 = vst.msk [vmem:[%s6435_s15 + $0x1a0] sm:$0xff] %vm450_vm0, %v2008_v47  ;;  %3284 = vst.msk [vmem:[%s6441_s22 + $0x1a0] sm:$0xff] %vm450_vm0, %v2854_v51  ;;  %v4650_v55 = vpop.f32.mrb[118].mxu1  ;;  %v4850_v59 = vpop.f32.mrb[118].mxu0 }
 0x1d9   : > { %v2023_v63 = vadd.f32 %v4650_v55, %v6413_v45  ;;  %v2869_v3 = vadd.f32 %v4850_v59, %v6420_v61  ;;  %v2017_v7 = vpop.f32.mrb[119].mxu1  ;;  %v2863_v11 = vpop.f32.mrb[119].mxu0 }
 0x1da   : > { %v2018_v16 = vadd.f32 %v6413_v45, %v2017_v7  ;;  %v2864_v22 = vadd.f32 %v6420_v61, %v2863_v11 }
 0x1db   : > { %2441 = vst.msk [vmem:[%s6435_s15 + $0x1b8] sm:$0xff] %vm450_vm0, %v2023_v63  ;;  %3287 = vst.msk [vmem:[%s6441_s22 + $0x1b8] sm:$0xff] %vm450_vm0, %v2869_v3 }
 0x1dc   : > { %2440 = vst.msk [vmem:[%s6435_s15 + $0x1b0] sm:$0xff] %vm450_vm0, %v2018_v16  ;;  %3286 = vst.msk [vmem:[%s6441_s22 + $0x1b0] sm:$0xff] %vm450_vm0, %v2864_v22  ;;  %v4653_v29 = vpop.f32.mrb[120].mxu1  ;;  %v4853_v37 = vpop.f32.mrb[120].mxu0 }
 0x1dd   : > { %v2033_v53 = vadd.f32 %v4653_v29, %v6413_v45  ;;  %v2879_v12 = vadd.f32 %v4853_v37, %v6420_v61  ;;  %v2027_v5 = vpop.f32.mrb[121].mxu1  ;;  %v2873_v25 = vpop.f32.mrb[121].mxu0 }
 0x1de   : > { %v2028_v41 = vadd.f32 %v6413_v45, %v2027_v5  ;;  %v2874_v33 = vadd.f32 %v6420_v61, %v2873_v25 }
 0x1df   : > { %2443 = vst.msk [vmem:[%s6435_s15 + $0x1c8] sm:$0xff] %vm450_vm0, %v2033_v53  ;;  %3289 = vst.msk [vmem:[%s6441_s22 + $0x1c8] sm:$0xff] %vm450_vm0, %v2879_v12 }
 0x1e0   : > { %2442 = vst.msk [vmem:[%s6435_s15 + $0x1c0] sm:$0xff] %vm450_vm0, %v2028_v41  ;;  %3288 = vst.msk [vmem:[%s6441_s22 + $0x1c0] sm:$0xff] %vm450_vm0, %v2874_v33  ;;  %v4656_v14 = vpop.f32.mrb[122].mxu1  ;;  %v4856_v1 = vpop.f32.mrb[122].mxu0 }
 0x1e1   : > { %v2043_v18 = vadd.f32 %v4656_v14, %v6413_v45  ;;  %v2889_v20 = vadd.f32 %v4856_v1, %v6420_v61  ;;  %v2037_v24 = vpop.f32.mrb[123].mxu1  ;;  %v2883_v26 = vpop.f32.mrb[123].mxu0 }
 0x1e2   : > { %v2038_v28 = vadd.f32 %v6413_v45, %v2037_v24  ;;  %v2884_v30 = vadd.f32 %v6420_v61, %v2883_v26 }
 0x1e3   : > { %2445 = vst.msk [vmem:[%s6435_s15 + $0x1d8] sm:$0xff] %vm450_vm0, %v2043_v18  ;;  %3291 = vst.msk [vmem:[%s6441_s22 + $0x1d8] sm:$0xff] %vm450_vm0, %v2889_v20 }
 0x1e4   : > { %2444 = vst.msk [vmem:[%s6435_s15 + $0x1d0] sm:$0xff] %vm450_vm0, %v2038_v28  ;;  %3290 = vst.msk [vmem:[%s6441_s22 + $0x1d0] sm:$0xff] %vm450_vm0, %v2884_v30  ;;  %v4659_v32 = vpop.f32.mrb[124].mxu1  ;;  %v4859_v34 = vpop.f32.mrb[124].mxu0 }
 0x1e5   : > { %v2053_v36 = vadd.f32 %v4659_v32, %v6413_v45  ;;  %v2899_v38 = vadd.f32 %v4859_v34, %v6420_v61  ;;  %v2047_v40 = vpop.f32.mrb[125].mxu1  ;;  %v2893_v42 = vpop.f32.mrb[125].mxu0 }
 0x1e6   : > { %v2048_v44 = vadd.f32 %v6413_v45, %v2047_v40  ;;  %v2894_v46 = vadd.f32 %v6420_v61, %v2893_v42 }
 0x1e7   : > { %2447 = vst.msk [vmem:[%s6435_s15 + $0x1e8] sm:$0xff] %vm450_vm0, %v2053_v36  ;;  %3293 = vst.msk [vmem:[%s6441_s22 + $0x1e8] sm:$0xff] %vm450_vm0, %v2899_v38 }
 0x1e8   : > { %2446 = vst.msk [vmem:[%s6435_s15 + $0x1e0] sm:$0xff] %vm450_vm0, %v2048_v44  ;;  %3292 = vst.msk [vmem:[%s6441_s22 + $0x1e0] sm:$0xff] %vm450_vm0, %v2894_v46  ;;  %v4662_v48 = vpop.f32.mrb[126].mxu1  ;;  %v4862_v50 = vpop.f32.mrb[126].mxu0 }
 0x1e9   : > { %v2063_v52 = vadd.f32 %v4662_v48, %v6413_v45  ;;  %v2909_v9 = vadd.f32 %v4862_v50, %v6420_v61  ;;  %v2057_v54 = vpop.f32.mrb[127].mxu1  ;;  %v2903_v56 = vpop.f32.mrb[127].mxu0  ;;  %v6967_v48 = vld [vmem:[%s7295_s2 + $0x1] ss:$0 sm:$0xff] }
 0x1ea   : > { %v2058_v58 = vadd.f32 %v6413_v45, %v2057_v54  ;;  %v2904_v60 = vadd.f32 %v6420_v61, %v2903_v56 }
 0x1eb   : > { %2449 = vst.msk [vmem:[%s6435_s15 + $0x1f8] sm:$0xff] %vm450_vm0, %v2063_v52  ;;  %3295 = vst.msk [vmem:[%s6441_s22 + $0x1f8] sm:$0xff] %vm450_vm0, %v2909_v9  ;;  %v6973_v52 = vld [vmem:[%s7295_s2 + $0x2] ss:$0 sm:$0xff] }
 0x1ec   : > { %2448 = vst.msk [vmem:[%s6435_s15 + $0x1f0] sm:$0xff] %vm450_vm0, %v2058_v58  ;;  %3294 = vst.msk [vmem:[%s6441_s22 + $0x1f0] sm:$0xff] %vm450_vm0, %v2904_v60  ;;  %v4665_v62 = vpop.f32.mrb[128].mxu1  ;;  %v4865_v0 = vpop.f32.mrb[128].mxu0 }
 0x1ed   : > { %v2073_v2 = vadd.f32 %v4665_v62, %v6413_v45  ;;  %v2919_v49 = vadd.f32 %v4865_v0, %v6420_v61  ;;  %v2067_v4 = vpop.f32.mrb[129].mxu1  ;;  %v2913_v6 = vpop.f32.mrb[129].mxu0 }
 0x1ee   : > { %v2068_v8 = vadd.f32 %v6413_v45, %v2067_v4  ;;  %v2914_v10 = vadd.f32 %v6420_v61, %v2913_v6 }
 0x1ef   : > { %2451 = vst.msk [vmem:[%s6435_s15 + $0x208] sm:$0xff] %vm450_vm0, %v2073_v2  ;;  %3297 = vst.msk [vmem:[%s6441_s22 + $0x208] sm:$0xff] %vm450_vm0, %v2919_v49 }
 0x1f0   : > { %2450 = vst.msk [vmem:[%s6435_s15 + $0x200] sm:$0xff] %vm450_vm0, %v2068_v8  ;;  %3296 = vst.msk [vmem:[%s6441_s22 + $0x200] sm:$0xff] %vm450_vm0, %v2914_v10  ;;  %v4668_v57 = vpop.f32.mrb[130].mxu1  ;;  %v4868_v13 = vpop.f32.mrb[130].mxu0 }
 0x1f1   : > { %v2083_v15 = vadd.f32 %v4668_v57, %v6413_v45  ;;  %v2929_v17 = vadd.f32 %v4868_v13, %v6420_v61  ;;  %v2077_v19 = vpop.f32.mrb[131].mxu1  ;;  %v2923_v21 = vpop.f32.mrb[131].mxu0 }
 0x1f2   : > { %v2078_v23 = vadd.f32 %v6413_v45, %v2077_v19  ;;  %v2924_v27 = vadd.f32 %v6420_v61, %v2923_v21 }
 0x1f3   : > { %2453 = vst.msk [vmem:[%s6435_s15 + $0x218] sm:$0xff] %vm450_vm0, %v2083_v15  ;;  %3299 = vst.msk [vmem:[%s6441_s22 + $0x218] sm:$0xff] %vm450_vm0, %v2929_v17 }
 0x1f4   : > { %2452 = vst.msk [vmem:[%s6435_s15 + $0x210] sm:$0xff] %vm450_vm0, %v2078_v23  ;;  %3298 = vst.msk [vmem:[%s6441_s22 + $0x210] sm:$0xff] %vm450_vm0, %v2924_v27  ;;  %v4671_v31 = vpop.f32.mrb[132].mxu1  ;;  %v4871_v35 = vpop.f32.mrb[132].mxu0 }
 0x1f5   : > { %v2093_v39 = vadd.f32 %v4671_v31, %v6413_v45  ;;  %v2939_v43 = vadd.f32 %v4871_v35, %v6420_v61  ;;  %v2087_v47 = vpop.f32.mrb[133].mxu1  ;;  %v2933_v51 = vpop.f32.mrb[133].mxu0 }
 0x1f6   : > { %v2088_v55 = vadd.f32 %v6413_v45, %v2087_v47  ;;  %v2934_v59 = vadd.f32 %v6420_v61, %v2933_v51 }
 0x1f7   : > { %2455 = vst.msk [vmem:[%s6435_s15 + $0x228] sm:$0xff] %vm450_vm0, %v2093_v39  ;;  %3301 = vst.msk [vmem:[%s6441_s22 + $0x228] sm:$0xff] %vm450_vm0, %v2939_v43 }
 0x1f8   : > { %2454 = vst.msk [vmem:[%s6435_s15 + $0x220] sm:$0xff] %vm450_vm0, %v2088_v55  ;;  %3300 = vst.msk [vmem:[%s6441_s22 + $0x220] sm:$0xff] %vm450_vm0, %v2934_v59  ;;  %v4674_v63 = vpop.f32.mrb[134].mxu1  ;;  %v4874_v3 = vpop.f32.mrb[134].mxu0 }
 0x1f9   : > { %v2103_v7 = vadd.f32 %v4674_v63, %v6413_v45  ;;  %v2949_v11 = vadd.f32 %v4874_v3, %v6420_v61  ;;  %v2097_v16 = vpop.f32.mrb[135].mxu1  ;;  %v2943_v22 = vpop.f32.mrb[135].mxu0 }
 0x1fa   : > { %v2098_v29 = vadd.f32 %v6413_v45, %v2097_v16  ;;  %v2944_v37 = vadd.f32 %v6420_v61, %v2943_v22 }
 0x1fb   : > { %2457 = vst.msk [vmem:[%s6435_s15 + $0x238] sm:$0xff] %vm450_vm0, %v2103_v7  ;;  %3303 = vst.msk [vmem:[%s6441_s22 + $0x238] sm:$0xff] %vm450_vm0, %v2949_v11 }
 0x1fc   : > { %2456 = vst.msk [vmem:[%s6435_s15 + $0x230] sm:$0xff] %vm450_vm0, %v2098_v29  ;;  %3302 = vst.msk [vmem:[%s6441_s22 + $0x230] sm:$0xff] %vm450_vm0, %v2944_v37  ;;  %v4677_v53 = vpop.f32.mrb[136].mxu1  ;;  %v4877_v12 = vpop.f32.mrb[136].mxu0 }
 0x1fd   : > { %v2113_v5 = vadd.f32 %v4677_v53, %v6413_v45  ;;  %v2959_v25 = vadd.f32 %v4877_v12, %v6420_v61  ;;  %v2107_v41 = vpop.f32.mrb[137].mxu1  ;;  %v2953_v33 = vpop.f32.mrb[137].mxu0 }
 0x1fe   : > { %v2108_v14 = vadd.f32 %v6413_v45, %v2107_v41  ;;  %v2954_v1 = vadd.f32 %v6420_v61, %v2953_v33 }
 0x1ff   : > { %2459 = vst.msk [vmem:[%s6435_s15 + $0x248] sm:$0xff] %vm450_vm0, %v2113_v5  ;;  %3305 = vst.msk [vmem:[%s6441_s22 + $0x248] sm:$0xff] %vm450_vm0, %v2959_v25 }
 0x200   : > { %2458 = vst.msk [vmem:[%s6435_s15 + $0x240] sm:$0xff] %vm450_vm0, %v2108_v14  ;;  %3304 = vst.msk [vmem:[%s6441_s22 + $0x240] sm:$0xff] %vm450_vm0, %v2954_v1  ;;  %v4680_v18 = vpop.f32.mrb[138].mxu1  ;;  %v4880_v20 = vpop.f32.mrb[138].mxu0 }
 0x201   : > { %v2123_v24 = vadd.f32 %v4680_v18, %v6413_v45  ;;  %v2969_v26 = vadd.f32 %v4880_v20, %v6420_v61  ;;  %v2117_v28 = vpop.f32.mrb[139].mxu1  ;;  %v2963_v30 = vpop.f32.mrb[139].mxu0 }
 0x202   : > { %v2118_v32 = vadd.f32 %v6413_v45, %v2117_v28  ;;  %v2964_v34 = vadd.f32 %v6420_v61, %v2963_v30 }
 0x203   : > { %2461 = vst.msk [vmem:[%s6435_s15 + $0x258] sm:$0xff] %vm450_vm0, %v2123_v24  ;;  %3307 = vst.msk [vmem:[%s6441_s22 + $0x258] sm:$0xff] %vm450_vm0, %v2969_v26 }
 0x204   : > { %2460 = vst.msk [vmem:[%s6435_s15 + $0x250] sm:$0xff] %vm450_vm0, %v2118_v32  ;;  %3306 = vst.msk [vmem:[%s6441_s22 + $0x250] sm:$0xff] %vm450_vm0, %v2964_v34  ;;  %v4683_v36 = vpop.f32.mrb[140].mxu1  ;;  %v4883_v38 = vpop.f32.mrb[140].mxu0 }
 0x205   : > { %v2133_v40 = vadd.f32 %v4683_v36, %v6413_v45  ;;  %v2979_v42 = vadd.f32 %v4883_v38, %v6420_v61  ;;  %v2127_v44 = vpop.f32.mrb[141].mxu1  ;;  %v2973_v46 = vpop.f32.mrb[141].mxu0 }
 0x206   : > { %v2128_v50 = vadd.f32 %v6967_v48, %v2127_v44  ;;  %v2974_v45 = vadd.f32 %v6973_v52, %v2973_v46 }
 0x207   : > { %2463 = vst.msk [vmem:[%s6435_s15 + $0x268] sm:$0xff] %vm450_vm0, %v2133_v40  ;;  %3309 = vst.msk [vmem:[%s6441_s22 + $0x268] sm:$0xff] %vm450_vm0, %v2979_v42 }
 0x208   : > { %2462 = vst.msk [vmem:[%s6435_s15 + $0x260] sm:$0xff] %vm450_vm0, %v2128_v50  ;;  %3308 = vst.msk [vmem:[%s6441_s22 + $0x260] sm:$0xff] %vm450_vm0, %v2974_v45  ;;  %v4686_v61 = vpop.f32.mrb[142].mxu1  ;;  %v4886_v9 = vpop.f32.mrb[142].mxu0 }
 0x209   : > { %v2143_v54 = vadd.f32 %v6967_v48, %v4686_v61  ;;  %v2989_v56 = vadd.f32 %v6973_v52, %v4886_v9  ;;  %v2137_v58 = vpop.f32.mrb[143].mxu1  ;;  %v2983_v60 = vpop.f32.mrb[143].mxu0 }
 0x20a   : > { %v2138_v62 = vadd.f32 %v6967_v48, %v2137_v58  ;;  %v2984_v0 = vadd.f32 %v6973_v52, %v2983_v60 }
 0x20b   : > { %2465 = vst.msk [vmem:[%s6435_s15 + $0x278] sm:$0xff] %vm450_vm0, %v2143_v54  ;;  %3311 = vst.msk [vmem:[%s6441_s22 + $0x278] sm:$0xff] %vm450_vm0, %v2989_v56 }
 0x20c   : > { %2464 = vst.msk [vmem:[%s6435_s15 + $0x270] sm:$0xff] %vm450_vm0, %v2138_v62  ;;  %3310 = vst.msk [vmem:[%s6441_s22 + $0x270] sm:$0xff] %vm450_vm0, %v2984_v0  ;;  %v4689_v2 = vpop.f32.mrb[144].mxu1  ;;  %v4889_v49 = vpop.f32.mrb[144].mxu0 }
 0x20d   : > { %v2153_v4 = vadd.f32 %v6967_v48, %v4689_v2  ;;  %v2999_v6 = vadd.f32 %v6973_v52, %v4889_v49  ;;  %v2147_v8 = vpop.f32.mrb[145].mxu1  ;;  %v2993_v10 = vpop.f32.mrb[145].mxu0 }
 0x20e   : > { %v2148_v57 = vadd.f32 %v6967_v48, %v2147_v8  ;;  %v2994_v13 = vadd.f32 %v6973_v52, %v2993_v10 }
 0x20f   : > { %2467 = vst.msk [vmem:[%s6435_s15 + $0x288] sm:$0xff] %vm450_vm0, %v2153_v4  ;;  %3313 = vst.msk [vmem:[%s6441_s22 + $0x288] sm:$0xff] %vm450_vm0, %v2999_v6 }
 0x210   : > { %2466 = vst.msk [vmem:[%s6435_s15 + $0x280] sm:$0xff] %vm450_vm0, %v2148_v57  ;;  %3312 = vst.msk [vmem:[%s6441_s22 + $0x280] sm:$0xff] %vm450_vm0, %v2994_v13  ;;  %v4692_v15 = vpop.f32.mrb[146].mxu1  ;;  %v4892_v17 = vpop.f32.mrb[146].mxu0 }
 0x211   : > { %v2163_v19 = vadd.f32 %v6967_v48, %v4692_v15  ;;  %v3009_v21 = vadd.f32 %v6973_v52, %v4892_v17  ;;  %v2157_v23 = vpop.f32.mrb[147].mxu1  ;;  %v3003_v27 = vpop.f32.mrb[147].mxu0 }
 0x212   : > { %v2158_v31 = vadd.f32 %v6967_v48, %v2157_v23  ;;  %v3004_v35 = vadd.f32 %v6973_v52, %v3003_v27 }
 0x213   : > { %2469 = vst.msk [vmem:[%s6435_s15 + $0x298] sm:$0xff] %vm450_vm0, %v2163_v19  ;;  %3315 = vst.msk [vmem:[%s6441_s22 + $0x298] sm:$0xff] %vm450_vm0, %v3009_v21 }
 0x214   : > { %2468 = vst.msk [vmem:[%s6435_s15 + $0x290] sm:$0xff] %vm450_vm0, %v2158_v31  ;;  %3314 = vst.msk [vmem:[%s6441_s22 + $0x290] sm:$0xff] %vm450_vm0, %v3004_v35  ;;  %v4695_v39 = vpop.f32.mrb[148].mxu1  ;;  %v4895_v43 = vpop.f32.mrb[148].mxu0 }
 0x215   : > { %v2173_v47 = vadd.f32 %v6967_v48, %v4695_v39  ;;  %v3019_v51 = vadd.f32 %v6973_v52, %v4895_v43  ;;  %v2167_v55 = vpop.f32.mrb[149].mxu1  ;;  %v3013_v59 = vpop.f32.mrb[149].mxu0 }
 0x216   : > { %v2168_v63 = vadd.f32 %v6967_v48, %v2167_v55  ;;  %v3014_v3 = vadd.f32 %v6973_v52, %v3013_v59 }
 0x217   : > { %2471 = vst.msk [vmem:[%s6435_s15 + $0x2a8] sm:$0xff] %vm450_vm0, %v2173_v47  ;;  %3317 = vst.msk [vmem:[%s6441_s22 + $0x2a8] sm:$0xff] %vm450_vm0, %v3019_v51 }
 0x218   : > { %2470 = vst.msk [vmem:[%s6435_s15 + $0x2a0] sm:$0xff] %vm450_vm0, %v2168_v63  ;;  %3316 = vst.msk [vmem:[%s6441_s22 + $0x2a0] sm:$0xff] %vm450_vm0, %v3014_v3  ;;  %v4698_v7 = vpop.f32.mrb[150].mxu1  ;;  %v4898_v11 = vpop.f32.mrb[150].mxu0 }
 0x219   : > { %v2183_v16 = vadd.f32 %v6967_v48, %v4698_v7  ;;  %v3029_v22 = vadd.f32 %v6973_v52, %v4898_v11  ;;  %v2177_v29 = vpop.f32.mrb[151].mxu1  ;;  %v3023_v37 = vpop.f32.mrb[151].mxu0 }
 0x21a   : > { %v2178_v53 = vadd.f32 %v6967_v48, %v2177_v29  ;;  %v3024_v12 = vadd.f32 %v6973_v52, %v3023_v37 }
 0x21b   : > { %2473 = vst.msk [vmem:[%s6435_s15 + $0x2b8] sm:$0xff] %vm450_vm0, %v2183_v16  ;;  %3319 = vst.msk [vmem:[%s6441_s22 + $0x2b8] sm:$0xff] %vm450_vm0, %v3029_v22 }
 0x21c   : > { %2472 = vst.msk [vmem:[%s6435_s15 + $0x2b0] sm:$0xff] %vm450_vm0, %v2178_v53  ;;  %3318 = vst.msk [vmem:[%s6441_s22 + $0x2b0] sm:$0xff] %vm450_vm0, %v3024_v12  ;;  %v4701_v5 = vpop.f32.mrb[152].mxu1  ;;  %v4901_v25 = vpop.f32.mrb[152].mxu0 }
 0x21d   : > { %v2193_v41 = vadd.f32 %v6967_v48, %v4701_v5  ;;  %v3039_v33 = vadd.f32 %v6973_v52, %v4901_v25  ;;  %v2187_v14 = vpop.f32.mrb[153].mxu1  ;;  %v3033_v1 = vpop.f32.mrb[153].mxu0 }
 0x21e   : > { %v2188_v18 = vadd.f32 %v6967_v48, %v2187_v14  ;;  %v3034_v20 = vadd.f32 %v6973_v52, %v3033_v1 }
 0x21f   : > { %2475 = vst.msk [vmem:[%s6435_s15 + $0x2c8] sm:$0xff] %vm450_vm0, %v2193_v41  ;;  %3321 = vst.msk [vmem:[%s6441_s22 + $0x2c8] sm:$0xff] %vm450_vm0, %v3039_v33 }
 0x220   : > { %2474 = vst.msk [vmem:[%s6435_s15 + $0x2c0] sm:$0xff] %vm450_vm0, %v2188_v18  ;;  %3320 = vst.msk [vmem:[%s6441_s22 + $0x2c0] sm:$0xff] %vm450_vm0, %v3034_v20  ;;  %v4704_v24 = vpop.f32.mrb[154].mxu1  ;;  %v4904_v26 = vpop.f32.mrb[154].mxu0 }
 0x221   : > { %v2203_v28 = vadd.f32 %v6967_v48, %v4704_v24  ;;  %v3049_v30 = vadd.f32 %v6973_v52, %v4904_v26  ;;  %v2197_v32 = vpop.f32.mrb[155].mxu1  ;;  %v3043_v34 = vpop.f32.mrb[155].mxu0 }
 0x222   : > { %v2198_v36 = vadd.f32 %v6967_v48, %v2197_v32  ;;  %v3044_v38 = vadd.f32 %v6973_v52, %v3043_v34 }
 0x223   : > { %2477 = vst.msk [vmem:[%s6435_s15 + $0x2d8] sm:$0xff] %vm450_vm0, %v2203_v28  ;;  %3323 = vst.msk [vmem:[%s6441_s22 + $0x2d8] sm:$0xff] %vm450_vm0, %v3049_v30 }
 0x224   : > { %2476 = vst.msk [vmem:[%s6435_s15 + $0x2d0] sm:$0xff] %vm450_vm0, %v2198_v36  ;;  %3322 = vst.msk [vmem:[%s6441_s22 + $0x2d0] sm:$0xff] %vm450_vm0, %v3044_v38  ;;  %v4707_v40 = vpop.f32.mrb[156].mxu1  ;;  %v4907_v42 = vpop.f32.mrb[156].mxu0 }
 0x225   : > { %v2213_v44 = vadd.f32 %v6967_v48, %v4707_v40  ;;  %v3059_v46 = vadd.f32 %v6973_v52, %v4907_v42  ;;  %v2207_v50 = vpop.f32.mrb[157].mxu1  ;;  %v3053_v45 = vpop.f32.mrb[157].mxu0 }
 0x226   : > { %v2208_v61 = vadd.f32 %v6967_v48, %v2207_v50  ;;  %v3054_v9 = vadd.f32 %v6973_v52, %v3053_v45 }
 0x227   : > { %2479 = vst.msk [vmem:[%s6435_s15 + $0x2e8] sm:$0xff] %vm450_vm0, %v2213_v44  ;;  %3325 = vst.msk [vmem:[%s6441_s22 + $0x2e8] sm:$0xff] %vm450_vm0, %v3059_v46 }
 0x228   : > { %2478 = vst.msk [vmem:[%s6435_s15 + $0x2e0] sm:$0xff] %vm450_vm0, %v2208_v61  ;;  %3324 = vst.msk [vmem:[%s6441_s22 + $0x2e0] sm:$0xff] %vm450_vm0, %v3054_v9  ;;  %v4710_v54 = vpop.f32.mrb[158].mxu1  ;;  %v4910_v56 = vpop.f32.mrb[158].mxu0 }
 0x229   : > { %v2223_v58 = vadd.f32 %v6967_v48, %v4710_v54  ;;  %v3069_v60 = vadd.f32 %v6973_v52, %v4910_v56  ;;  %v2217_v62 = vpop.f32.mrb[159].mxu1  ;;  %v3063_v0 = vpop.f32.mrb[159].mxu0 }
 0x22a   : > { %v2218_v2 = vadd.f32 %v6967_v48, %v2217_v62  ;;  %v3064_v49 = vadd.f32 %v6973_v52, %v3063_v0 }
 0x22b   : > { %2481 = vst.msk [vmem:[%s6435_s15 + $0x2f8] sm:$0xff] %vm450_vm0, %v2223_v58  ;;  %3327 = vst.msk [vmem:[%s6441_s22 + $0x2f8] sm:$0xff] %vm450_vm0, %v3069_v60 }
 0x22c   : > { %2480 = vst.msk [vmem:[%s6435_s15 + $0x2f0] sm:$0xff] %vm450_vm0, %v2218_v2  ;;  %3326 = vst.msk [vmem:[%s6441_s22 + $0x2f0] sm:$0xff] %vm450_vm0, %v3064_v49  ;;  %v4713_v4 = vpop.f32.mrb[160].mxu1  ;;  %v4913_v6 = vpop.f32.mrb[160].mxu0 }
 0x22d   : > { %v2233_v8 = vadd.f32 %v6967_v48, %v4713_v4  ;;  %v3079_v10 = vadd.f32 %v6973_v52, %v4913_v6  ;;  %v2227_v57 = vpop.f32.mrb[161].mxu1  ;;  %v3073_v13 = vpop.f32.mrb[161].mxu0 }
 0x22e   : > { %v2228_v15 = vadd.f32 %v6967_v48, %v2227_v57  ;;  %v3074_v17 = vadd.f32 %v6973_v52, %v3073_v13 }
 0x22f   : > { %2483 = vst.msk [vmem:[%s6435_s15 + $0x308] sm:$0xff] %vm450_vm0, %v2233_v8  ;;  %3329 = vst.msk [vmem:[%s6441_s22 + $0x308] sm:$0xff] %vm450_vm0, %v3079_v10 }
 0x230   : > { %2482 = vst.msk [vmem:[%s6435_s15 + $0x300] sm:$0xff] %vm450_vm0, %v2228_v15  ;;  %3328 = vst.msk [vmem:[%s6441_s22 + $0x300] sm:$0xff] %vm450_vm0, %v3074_v17  ;;  %v4716_v19 = vpop.f32.mrb[162].mxu1  ;;  %v4916_v21 = vpop.f32.mrb[162].mxu0 }
 0x231   : > { %v2243_v23 = vadd.f32 %v6967_v48, %v4716_v19  ;;  %v3089_v27 = vadd.f32 %v6973_v52, %v4916_v21  ;;  %v2237_v31 = vpop.f32.mrb[163].mxu1  ;;  %v3083_v35 = vpop.f32.mrb[163].mxu0 }
 0x232   : > { %v2238_v39 = vadd.f32 %v6967_v48, %v2237_v31  ;;  %v3084_v43 = vadd.f32 %v6973_v52, %v3083_v35 }
 0x233   : > { %2485 = vst.msk [vmem:[%s6435_s15 + $0x318] sm:$0xff] %vm450_vm0, %v2243_v23  ;;  %3331 = vst.msk [vmem:[%s6441_s22 + $0x318] sm:$0xff] %vm450_vm0, %v3089_v27 }
 0x234   : > { %2484 = vst.msk [vmem:[%s6435_s15 + $0x310] sm:$0xff] %vm450_vm0, %v2238_v39  ;;  %3330 = vst.msk [vmem:[%s6441_s22 + $0x310] sm:$0xff] %vm450_vm0, %v3084_v43  ;;  %v4719_v47 = vpop.f32.mrb[164].mxu1  ;;  %v4919_v51 = vpop.f32.mrb[164].mxu0 }
 0x235   : > { %v2253_v55 = vadd.f32 %v6967_v48, %v4719_v47  ;;  %v3099_v59 = vadd.f32 %v6973_v52, %v4919_v51  ;;  %v2247_v63 = vpop.f32.mrb[165].mxu1  ;;  %v3093_v3 = vpop.f32.mrb[165].mxu0 }
 0x236   : > { %v2248_v7 = vadd.f32 %v6967_v48, %v2247_v63  ;;  %v3094_v11 = vadd.f32 %v6973_v52, %v3093_v3 }
 0x237   : > { %2487 = vst.msk [vmem:[%s6435_s15 + $0x328] sm:$0xff] %vm450_vm0, %v2253_v55  ;;  %3333 = vst.msk [vmem:[%s6441_s22 + $0x328] sm:$0xff] %vm450_vm0, %v3099_v59 }
 0x238   : > { %2486 = vst.msk [vmem:[%s6435_s15 + $0x320] sm:$0xff] %vm450_vm0, %v2248_v7  ;;  %3332 = vst.msk [vmem:[%s6441_s22 + $0x320] sm:$0xff] %vm450_vm0, %v3094_v11  ;;  %v4722_v16 = vpop.f32.mrb[166].mxu1  ;;  %v4922_v22 = vpop.f32.mrb[166].mxu0 }
 0x239   : > { %v2263_v29 = vadd.f32 %v6967_v48, %v4722_v16  ;;  %v3109_v37 = vadd.f32 %v6973_v52, %v4922_v22  ;;  %v2257_v53 = vpop.f32.mrb[167].mxu1  ;;  %v3103_v12 = vpop.f32.mrb[167].mxu0 }
 0x23a   : > { %v2258_v5 = vadd.f32 %v6967_v48, %v2257_v53  ;;  %v3104_v25 = vadd.f32 %v6973_v52, %v3103_v12 }
 0x23b   : > { %2489 = vst.msk [vmem:[%s6435_s15 + $0x338] sm:$0xff] %vm450_vm0, %v2263_v29  ;;  %3335 = vst.msk [vmem:[%s6441_s22 + $0x338] sm:$0xff] %vm450_vm0, %v3109_v37 }
 0x23c   : > { %2488 = vst.msk [vmem:[%s6435_s15 + $0x330] sm:$0xff] %vm450_vm0, %v2258_v5  ;;  %3334 = vst.msk [vmem:[%s6441_s22 + $0x330] sm:$0xff] %vm450_vm0, %v3104_v25  ;;  %v4725_v41 = vpop.f32.mrb[168].mxu1  ;;  %v4925_v33 = vpop.f32.mrb[168].mxu0 }
 0x23d   : > { %v2273_v14 = vadd.f32 %v6967_v48, %v4725_v41  ;;  %v3119_v1 = vadd.f32 %v6973_v52, %v4925_v33  ;;  %v2267_v18 = vpop.f32.mrb[169].mxu1  ;;  %v3113_v20 = vpop.f32.mrb[169].mxu0 }
 0x23e   : > { %v2268_v24 = vadd.f32 %v6967_v48, %v2267_v18  ;;  %v3114_v26 = vadd.f32 %v6973_v52, %v3113_v20 }
 0x23f   : > { %2491 = vst.msk [vmem:[%s6435_s15 + $0x348] sm:$0xff] %vm450_vm0, %v2273_v14  ;;  %3337 = vst.msk [vmem:[%s6441_s22 + $0x348] sm:$0xff] %vm450_vm0, %v3119_v1 }
 0x240   : > { %2490 = vst.msk [vmem:[%s6435_s15 + $0x340] sm:$0xff] %vm450_vm0, %v2268_v24  ;;  %3336 = vst.msk [vmem:[%s6441_s22 + $0x340] sm:$0xff] %vm450_vm0, %v3114_v26  ;;  %v4728_v28 = vpop.f32.mrb[170].mxu1  ;;  %v4928_v30 = vpop.f32.mrb[170].mxu0 }
 0x241   : > { %v2283_v32 = vadd.f32 %v6967_v48, %v4728_v28  ;;  %v3129_v34 = vadd.f32 %v6973_v52, %v4928_v30  ;;  %v2277_v36 = vpop.f32.mrb[171].mxu1  ;;  %v3123_v38 = vpop.f32.mrb[171].mxu0 }
 0x242   : > { %v2278_v40 = vadd.f32 %v6967_v48, %v2277_v36  ;;  %v3124_v42 = vadd.f32 %v6973_v52, %v3123_v38 }
 0x243   : > { %2493 = vst.msk [vmem:[%s6435_s15 + $0x358] sm:$0xff] %vm450_vm0, %v2283_v32  ;;  %3339 = vst.msk [vmem:[%s6441_s22 + $0x358] sm:$0xff] %vm450_vm0, %v3129_v34 }
 0x244   : > { %2492 = vst.msk [vmem:[%s6435_s15 + $0x350] sm:$0xff] %vm450_vm0, %v2278_v40  ;;  %3338 = vst.msk [vmem:[%s6441_s22 + $0x350] sm:$0xff] %vm450_vm0, %v3124_v42  ;;  %v4731_v44 = vpop.f32.mrb[172].mxu1  ;;  %v4931_v46 = vpop.f32.mrb[172].mxu0 }
 0x245   : > { %v2293_v50 = vadd.f32 %v6967_v48, %v4731_v44  ;;  %v3139_v45 = vadd.f32 %v6973_v52, %v4931_v46  ;;  %v2287_v61 = vpop.f32.mrb[173].mxu1  ;;  %v3133_v9 = vpop.f32.mrb[173].mxu0 }
 0x246   : > { %v2288_v54 = vadd.f32 %v6967_v48, %v2287_v61  ;;  %v3134_v56 = vadd.f32 %v6973_v52, %v3133_v9 }
 0x247   : > { %2495 = vst.msk [vmem:[%s6435_s15 + $0x368] sm:$0xff] %vm450_vm0, %v2293_v50  ;;  %3341 = vst.msk [vmem:[%s6441_s22 + $0x368] sm:$0xff] %vm450_vm0, %v3139_v45 }
 0x248   : > { %2494 = vst.msk [vmem:[%s6435_s15 + $0x360] sm:$0xff] %vm450_vm0, %v2288_v54  ;;  %3340 = vst.msk [vmem:[%s6441_s22 + $0x360] sm:$0xff] %vm450_vm0, %v3134_v56  ;;  %v4734_v58 = vpop.f32.mrb[174].mxu1  ;;  %v4934_v60 = vpop.f32.mrb[174].mxu0 }
 0x249   : > { %v2303_v62 = vadd.f32 %v6967_v48, %v4734_v58  ;;  %v3149_v0 = vadd.f32 %v6973_v52, %v4934_v60  ;;  %v2297_v2 = vpop.f32.mrb[175].mxu1  ;;  %v3143_v49 = vpop.f32.mrb[175].mxu0 }
 0x24a   : > { %v2298_v4 = vadd.f32 %v6967_v48, %v2297_v2  ;;  %v3144_v6 = vadd.f32 %v6973_v52, %v3143_v49 }
 0x24b   : > { %2497 = vst.msk [vmem:[%s6435_s15 + $0x378] sm:$0xff] %vm450_vm0, %v2303_v62  ;;  %3343 = vst.msk [vmem:[%s6441_s22 + $0x378] sm:$0xff] %vm450_vm0, %v3149_v0 }
 0x24c   : > { %2496 = vst.msk [vmem:[%s6435_s15 + $0x370] sm:$0xff] %vm450_vm0, %v2298_v4  ;;  %3342 = vst.msk [vmem:[%s6441_s22 + $0x370] sm:$0xff] %vm450_vm0, %v3144_v6  ;;  %v4737_v8 = vpop.f32.mrb[176].mxu1  ;;  %v4937_v10 = vpop.f32.mrb[176].mxu0 }
 0x24d   : > { %v2313_v57 = vadd.f32 %v6967_v48, %v4737_v8  ;;  %v3159_v13 = vadd.f32 %v6973_v52, %v4937_v10  ;;  %v2307_v15 = vpop.f32.mrb[177].mxu1  ;;  %v3153_v17 = vpop.f32.mrb[177].mxu0 }
 0x24e   : > { %v2308_v19 = vadd.f32 %v6967_v48, %v2307_v15  ;;  %v3154_v21 = vadd.f32 %v6973_v52, %v3153_v17 }
 0x24f   : > { %2499 = vst.msk [vmem:[%s6435_s15 + $0x388] sm:$0xff] %vm450_vm0, %v2313_v57  ;;  %3345 = vst.msk [vmem:[%s6441_s22 + $0x388] sm:$0xff] %vm450_vm0, %v3159_v13 }
 0x250   : > { %2498 = vst.msk [vmem:[%s6435_s15 + $0x380] sm:$0xff] %vm450_vm0, %v2308_v19  ;;  %3344 = vst.msk [vmem:[%s6441_s22 + $0x380] sm:$0xff] %vm450_vm0, %v3154_v21  ;;  %v4740_v23 = vpop.f32.mrb[178].mxu1  ;;  %v4940_v27 = vpop.f32.mrb[178].mxu0 }
 0x251   : > { %v2323_v31 = vadd.f32 %v6967_v48, %v4740_v23  ;;  %v3169_v35 = vadd.f32 %v6973_v52, %v4940_v27  ;;  %v2317_v39 = vpop.f32.mrb[179].mxu1  ;;  %v3163_v43 = vpop.f32.mrb[179].mxu0 }
 0x252   : > { %v2318_v47 = vadd.f32 %v6967_v48, %v2317_v39  ;;  %v3164_v51 = vadd.f32 %v6973_v52, %v3163_v43 }
 0x253   : > { %2501 = vst.msk [vmem:[%s6435_s15 + $0x398] sm:$0xff] %vm450_vm0, %v2323_v31  ;;  %3347 = vst.msk [vmem:[%s6441_s22 + $0x398] sm:$0xff] %vm450_vm0, %v3169_v35 }
 0x254   : > { %2500 = vst.msk [vmem:[%s6435_s15 + $0x390] sm:$0xff] %vm450_vm0, %v2318_v47  ;;  %3346 = vst.msk [vmem:[%s6441_s22 + $0x390] sm:$0xff] %vm450_vm0, %v3164_v51  ;;  %v4743_v55 = vpop.f32.mrb[180].mxu1  ;;  %v4943_v59 = vpop.f32.mrb[180].mxu0 }
 0x255   : > { %v2333_v63 = vadd.f32 %v6967_v48, %v4743_v55  ;;  %v3179_v3 = vadd.f32 %v6973_v52, %v4943_v59  ;;  %v2327_v7 = vpop.f32.mrb[181].mxu1  ;;  %v3173_v11 = vpop.f32.mrb[181].mxu0 }
 0x256   : > { %v2328_v16 = vadd.f32 %v6967_v48, %v2327_v7  ;;  %v3174_v22 = vadd.f32 %v6973_v52, %v3173_v11 }
 0x257   : > { %2503 = vst.msk [vmem:[%s6435_s15 + $0x3a8] sm:$0xff] %vm450_vm0, %v2333_v63  ;;  %3349 = vst.msk [vmem:[%s6441_s22 + $0x3a8] sm:$0xff] %vm450_vm0, %v3179_v3 }
 0x258   : > { %2502 = vst.msk [vmem:[%s6435_s15 + $0x3a0] sm:$0xff] %vm450_vm0, %v2328_v16  ;;  %3348 = vst.msk [vmem:[%s6441_s22 + $0x3a0] sm:$0xff] %vm450_vm0, %v3174_v22  ;;  %v4746_v29 = vpop.f32.mrb[182].mxu1  ;;  %v4946_v37 = vpop.f32.mrb[182].mxu0 }
 0x259   : > { %v2343_v53 = vadd.f32 %v6967_v48, %v4746_v29  ;;  %v3189_v12 = vadd.f32 %v6973_v52, %v4946_v37  ;;  %v2337_v5 = vpop.f32.mrb[183].mxu1  ;;  %v3183_v25 = vpop.f32.mrb[183].mxu0 }
 0x25a   : > { %v2338_v41 = vadd.f32 %v6967_v48, %v2337_v5  ;;  %v3184_v33 = vadd.f32 %v6973_v52, %v3183_v25 }
 0x25b   : > { %2505 = vst.msk [vmem:[%s6435_s15 + $0x3b8] sm:$0xff] %vm450_vm0, %v2343_v53  ;;  %3351 = vst.msk [vmem:[%s6441_s22 + $0x3b8] sm:$0xff] %vm450_vm0, %v3189_v12 }
 0x25c   : > { %2504 = vst.msk [vmem:[%s6435_s15 + $0x3b0] sm:$0xff] %vm450_vm0, %v2338_v41  ;;  %3350 = vst.msk [vmem:[%s6441_s22 + $0x3b0] sm:$0xff] %vm450_vm0, %v3184_v33  ;;  %v4749_v14 = vpop.f32.mrb[184].mxu1  ;;  %v4949_v1 = vpop.f32.mrb[184].mxu0 }
 0x25d   : > { %v2353_v18 = vadd.f32 %v6967_v48, %v4749_v14  ;;  %v3199_v20 = vadd.f32 %v6973_v52, %v4949_v1  ;;  %v2347_v24 = vpop.f32.mrb[185].mxu1  ;;  %v3193_v26 = vpop.f32.mrb[185].mxu0 }
 0x25e   : > { %v2348_v28 = vadd.f32 %v6967_v48, %v2347_v24  ;;  %v3194_v30 = vadd.f32 %v6973_v52, %v3193_v26 }
 0x25f   : > { %2507 = vst.msk [vmem:[%s6435_s15 + $0x3c8] sm:$0xff] %vm450_vm0, %v2353_v18  ;;  %3353 = vst.msk [vmem:[%s6441_s22 + $0x3c8] sm:$0xff] %vm450_vm0, %v3199_v20 }
 0x260   : > { %2506 = vst.msk [vmem:[%s6435_s15 + $0x3c0] sm:$0xff] %vm450_vm0, %v2348_v28  ;;  %3352 = vst.msk [vmem:[%s6441_s22 + $0x3c0] sm:$0xff] %vm450_vm0, %v3194_v30  ;;  %v4752_v32 = vpop.f32.mrb[186].mxu1  ;;  %v4952_v34 = vpop.f32.mrb[186].mxu0 }
 0x261   : > { %v2363_v36 = vadd.f32 %v6967_v48, %v4752_v32  ;;  %v3209_v38 = vadd.f32 %v6973_v52, %v4952_v34  ;;  %v2357_v40 = vpop.f32.mrb[187].mxu1  ;;  %v3203_v42 = vpop.f32.mrb[187].mxu0 }
 0x262   : > { %v2358_v44 = vadd.f32 %v6967_v48, %v2357_v40  ;;  %v3204_v46 = vadd.f32 %v6973_v52, %v3203_v42 }
 0x263   : > { %2509 = vst.msk [vmem:[%s6435_s15 + $0x3d8] sm:$0xff] %vm450_vm0, %v2363_v36  ;;  %3355 = vst.msk [vmem:[%s6441_s22 + $0x3d8] sm:$0xff] %vm450_vm0, %v3209_v38 }
 0x264   : > { %2508 = vst.msk [vmem:[%s6435_s15 + $0x3d0] sm:$0xff] %vm450_vm0, %v2358_v44  ;;  %3354 = vst.msk [vmem:[%s6441_s22 + $0x3d0] sm:$0xff] %vm450_vm0, %v3204_v46  ;;  %v4755_v50 = vpop.f32.mrb[188].mxu1  ;;  %v4955_v45 = vpop.f32.mrb[188].mxu0 }
 0x265   : > { %v2373_v61 = vadd.f32 %v6967_v48, %v4755_v50  ;;  %v3219_v9 = vadd.f32 %v6973_v52, %v4955_v45  ;;  %v2367_v54 = vpop.f32.mrb[189].mxu1  ;;  %v3213_v56 = vpop.f32.mrb[189].mxu0 }
 0x266   : > { %v2368_v58 = vadd.f32 %v6967_v48, %v2367_v54  ;;  %v3214_v60 = vadd.f32 %v6973_v52, %v3213_v56 }
 0x267   : > { %2511 = vst.msk [vmem:[%s6435_s15 + $0x3e8] sm:$0xff] %vm450_vm0, %v2373_v61  ;;  %3357 = vst.msk [vmem:[%s6441_s22 + $0x3e8] sm:$0xff] %vm450_vm0, %v3219_v9 }
 0x268   : > { %2510 = vst.msk [vmem:[%s6435_s15 + $0x3e0] sm:$0xff] %vm450_vm0, %v2368_v58  ;;  %3356 = vst.msk [vmem:[%s6441_s22 + $0x3e0] sm:$0xff] %vm450_vm0, %v3214_v60  ;;  %v4758_v62 = vpop.f32.mrb[190].mxu1  ;;  %v4958_v0 = vpop.f32.mrb[190].mxu0 }
 0x269   : > { %v2383_v2 = vadd.f32 %v6967_v48, %v4758_v62  ;;  %v3229_v49 = vadd.f32 %v6973_v52, %v4958_v0  ;;  %v2377_v4 = vpop.f32.mrb[191].mxu1  ;;  %v3223_v6 = vpop.f32.mrb[191].mxu0 }
 0x26a   : > { %v2378_v8 = vadd.f32 %v6967_v48, %v2377_v4  ;;  %v3224_v10 = vadd.f32 %v6973_v52, %v3223_v6 }
 0x26b   : > { %2513 = vst.msk [vmem:[%s6435_s15 + $0x3f8] sm:$0xff] %vm450_vm0, %v2383_v2  ;;  %3359 = vst.msk [vmem:[%s6441_s22 + $0x3f8] sm:$0xff] %vm450_vm0, %v3229_v49 }
 0x26c   : > { %2512 = vst.msk [vmem:[%s6435_s15 + $0x3f0] sm:$0xff] %vm450_vm0, %v2378_v8  ;;  %3358 = vst.msk [vmem:[%s6441_s22 + $0x3f0] sm:$0xff] %vm450_vm0, %v3224_v10 }
 0x26d PF: > { %s16_s20 = sadd.s32 1, %s5099_s20   ;;  %s7315_s18 = smov %s5095_s19 }
 0x26e   : > { %p13_p5 = scmp.ge.s32.totalorder %s16_s20, 4   ;;  %s7316_s19 = smov %s7318_s21 }
 0x270   :  { %15 = sbr.rel (!%p13_p5) target bundleno = 2 (0x2), region = 90 }

</bundles_post_ra>
